<compile_context>
chip_gen: v7x
topology: tpu7x:2x2x1
jax: 0.10.0
libtpu: 0.0.40
codegen_flags: <defaults>
</compile_context>

<pallas_src>
import jax
import jax.numpy as jnp
from jax.experimental import pallas as pl
from jax.experimental.pallas import tpu as pltpu

EPS = 1e-5    # PyTorch BatchNorm2d default eps
LANE = 128


def _round_up(x, m):
    return (x + m - 1) // m * m


# ----------------------------- Pallas kernels ------------------------------
# BN scale is pre-folded into the weights, so the epilogue is a bias add
# (+ optional residual, or per-column ReLU mask) and ReLU.  Operands are bf16
# (native MXU), accumulation/epilogue in f32, single lane-dense bf16 store.

def _mm_shift_relu_kernel(p_ref, w_ref, shift_ref, o_ref):
    acc = jnp.dot(p_ref[...], w_ref[...], preferred_element_type=jnp.float32)
    o_ref[...] = jnp.maximum(acc + shift_ref[...], 0.0).astype(o_ref.dtype)


def _mm_shift_colrelu_kernel(p_ref, w_ref, shift_ref, mask_ref, o_ref):
    # ReLU only where mask==1 (conv columns); skip columns pass through raw.
    acc = jnp.dot(p_ref[...], w_ref[...], preferred_element_type=jnp.float32)
    y = acc + shift_ref[...]
    m = mask_ref[...]
    o_ref[...] = (m * jnp.maximum(y, 0.0) + (1.0 - m) * y).astype(o_ref.dtype)


def _mm_shift_skip_relu_kernel(p_ref, w_ref, shift_ref, skip_ref, o_ref):
    acc = jnp.dot(p_ref[...], w_ref[...], preferred_element_type=jnp.float32)
    y = acc + shift_ref[...] + skip_ref[...].astype(jnp.float32)
    o_ref[...] = jnp.maximum(y, 0.0).astype(o_ref.dtype)


# ----------------------------- Pallas wrapper -------------------------------

def fused_matmul(P, Wm, shift, *, relu_mask=None, skip=None, real_cols,
                 out_dtype=jnp.bfloat16):
    """out = epilogue(P @ Wm + shift) — the conv hot path.

    P         (M, K)       bf16  im2col patches (K = 9 * real Cin)
    Wm        (K, Cout_p)  bf16  BN scale folded, Cout padded to 128 lanes
    shift     (Cout_p,)    f32   folded BN shift / bias (zero in padded lanes)
    relu_mask (Cout_p,)    f32   1 -> ReLU, 0 -> pass-through (fused skip cols)
    skip      (M, Cout_p)  bf16  optional residual, added before ReLU
    real_cols int                real (unpadded) output columns, for CostEstimate
    """
    assert not (relu_mask is not None and skip is not None)
    M, K = P.shape
    Cout_p = Wm.shape[1]

    # Row-tile policy: 2 parallel blocks when M allows (v7x dual TC), single
    # block otherwise (per-step pipeline overhead > compute at these sizes).
    if M >= 512:
        tm = 256
    elif M >= 128:
        tm = 128
    else:
        tm = _round_up(M, 8)
    M_p = _round_up(M, tm)
    if M_p != M:
        P = jnp.pad(P, ((0, M_p - M), (0, 0)))
        if skip is not None:
            skip = jnp.pad(skip, ((0, M_p - M), (0, 0)))

    shift2 = shift.reshape(1, Cout_p).astype(jnp.float32)

    in_specs = [
        pl.BlockSpec((tm, K), lambda i: (i, 0)),
        pl.BlockSpec((K, Cout_p), lambda i: (0, 0)),
        pl.BlockSpec((1, Cout_p), lambda i: (0, 0)),
    ]
    args = [P, Wm, shift2]
    if relu_mask is not None:
        in_specs.append(pl.BlockSpec((1, Cout_p), lambda i: (0, 0)))
        args.append(relu_mask.reshape(1, Cout_p).astype(jnp.float32))
        kernel = _mm_shift_colrelu_kernel
    elif skip is not None:
        in_specs.append(pl.BlockSpec((tm, Cout_p), lambda i: (i, 0)))
        args.append(skip)
        kernel = _mm_shift_skip_relu_kernel
    else:
        kernel = _mm_shift_relu_kernel

    # Cost estimate from REAL (unpadded) sizes — advisory for XLA scheduling.
    bytes_accessed = (M * K * 2 + K * real_cols * 2 + real_cols * 4
                      + M * real_cols * 2
                      + (M * real_cols * 2 if skip is not None else 0))
    out = pl.pallas_call(
        kernel,
        out_shape=jax.ShapeDtypeStruct((M_p, Cout_p), out_dtype),
        grid=(M_p // tm,),
        in_specs=in_specs,
        out_specs=pl.BlockSpec((tm, Cout_p), lambda i: (i, 0)),
        compiler_params=pltpu.CompilerParams(
            dimension_semantics=("parallel",),
            vmem_limit_bytes=32 * 1024 * 1024),
        cost_estimate=pl.CostEstimate(flops=2 * M * K * real_cols,
                                      transcendentals=0,
                                      bytes_accessed=int(bytes_accessed)),
    )(*args)
    return out[:M] if M_p != M else out


# ------------------------------- JAX glue ----------------------------------

def im2col(x, ksize, stride, pad):
    """NHWC -> (N*Ho*Wo, k*k*C) patch matrix (tap order ky, kx; bf16)."""
    N, H, W, C = x.shape
    if pad:
        x = jnp.pad(x, ((0, 0), (pad, pad), (pad, pad), (0, 0)))
    Ho = (H + 2 * pad - ksize) // stride + 1
    Wo = (W + 2 * pad - ksize) // stride + 1
    if ksize == 1:
        P = x[:, ::stride, ::stride, :]
    else:
        cols = [x[:, ky:ky + stride * Ho:stride, kx:kx + stride * Wo:stride, :]
                for ky in range(ksize) for kx in range(ksize)]
        P = jnp.concatenate(cols, axis=-1)
    return P.reshape(N * Ho * Wo, ksize * ksize * C), (N, Ho, Wo)


def _prep_conv(conv, bn, fold_skip=None, append_skip=None):
    """Fold BN scale/shift into the conv weights.  Optionally:
      - fold_skip:   same-input 1x1 conv folded into the centre tap (same cols)
      - append_skip: same-input 1x1 stride-matched conv appended as EXTRA
                     output columns at the centre-tap rows (no ReLU on them)
    Cin stays at its real width; Cout is zero-padded to a multiple of 128.
    Returns (Wm bf16 (k*k*cin, cout_p), shift f32 (cout_p,), relu_mask f32,
             n_relu_cols, n_real_cols)."""
    w = conv["w"].astype(jnp.float32)            # (k, k, Cin, Cout) HWIO
    shift = conv["b"].astype(jnp.float32)
    k, _, cin, cout = w.shape
    if bn is not None:
        scale = bn["gamma"] / jnp.sqrt(bn["var"] + EPS)
        w = w * scale[None, None, None, :]
        shift = (shift - bn["mean"]) * scale + bn["beta"]
    if fold_skip is not None:
        w = w.at[k // 2, k // 2].add(fold_skip["w"].astype(jnp.float32)[0, 0])
        shift = shift + fold_skip["b"].astype(jnp.float32)
    n_relu = cout
    if append_skip is not None:
        sw = append_skip["w"].astype(jnp.float32)            # (1,1,Cin,Cout_s)
        cout_s = sw.shape[-1]
        extra = jnp.zeros((k, k, cin, cout_s), jnp.float32)
        extra = extra.at[k // 2, k // 2].set(sw[0, 0])        # centre-tap only
        w = jnp.concatenate([w, extra], axis=-1)
        shift = jnp.concatenate([shift, append_skip["b"].astype(jnp.float32)])
    n_real = w.shape[-1]
    cout_p = _round_up(n_real, LANE)
    w = jnp.pad(w, ((0, 0), (0, 0), (0, 0), (0, cout_p - n_real)))
    shift = jnp.pad(shift, (0, cout_p - n_real))
    relu_mask = (jnp.arange(cout_p) < n_relu).astype(jnp.float32)
    return (w.reshape(k * k * cin, cout_p).astype(jnp.bfloat16),
            shift, relu_mask, n_relu, n_real)


def forward(params, x_nchw):
    x = jnp.transpose(x_nchw, (0, 2, 3, 1)).astype(jnp.bfloat16)  # NCHW -> NHWC

    # weight prep: BN folded, real Cin, Cout padded to 128 lanes, bf16 operands
    W1, s1, _,  r1, _  = _prep_conv(params["conv1"], params["bn1"])
    W2, s2, _,  r2, _  = _prep_conv(params["conv2"], params["bn2"],
                                    fold_skip=params["skip_conv1"])
    W3, s3, m3, r3, a3 = _prep_conv(params["conv3"], params["bn3"],
                                    append_skip=params["skip_conv2"])
    W4, s4, _,  r4, _  = _prep_conv(params["conv4"], params["bn4"])
    W5, s5, m5, r5, a5 = _prep_conv(params["conv5"], params["bn5"],
                                    append_skip=params["skip_conv3"])
    W6, s6, _,  r6, _  = _prep_conv(params["conv6"], params["bn6"])

    def conv_layer(v, Wm, shift, stride, real_cols, relu_mask=None, skip=None):
        P, (N, Ho, Wo) = im2col(v, 3, stride, 1)
        y = fused_matmul(P, Wm, shift, relu_mask=relu_mask, skip=skip,
                         real_cols=real_cols)
        return y, (N, Ho, Wo)

    # ---- block 1 (skip_conv1 folded into conv2's centre tap) ----
    y, (N, Ho, Wo) = conv_layer(x, W1, s1, 1, r1)
    x1 = y[:, :r1].reshape(N, Ho, Wo, r1)                       # (N,16,16,32)
    y, (N, Ho, Wo) = conv_layer(x1, W2, s2, 1, r2)
    x2 = y[:, :r2].reshape(N, Ho, Wo, r2)                       # (N,16,16,32)

    # ---- block 2 (skip_conv2 rides as extra output columns of conv3) ----
    y, (N, Ho, Wo) = conv_layer(x2, W3, s3, 2, a3, relu_mask=m3)  # (N*64, 128)
    x3 = y[:, :r3].reshape(N, Ho, Wo, r3)                       # (N,8,8,64)
    skip4 = y[:, r3:a3]                                         # raw skip, 64 ch
    if skip4.shape[1] != W4.shape[1]:
        skip4 = jnp.pad(skip4, ((0, 0), (0, W4.shape[1] - skip4.shape[1])))
    y, (N, Ho, Wo) = conv_layer(x3, W4, s4, 1, r4, skip=skip4)
    x4 = y[:, :r4].reshape(N, Ho, Wo, r4)                       # (N,8,8,64)

    # ---- block 3 (skip_conv3 rides as extra output columns of conv5) ----
    y, (N, Ho, Wo) = conv_layer(x4, W5, s5, 2, a5, relu_mask=m5)  # (N*16, 256)
    x5 = y[:, :r5].reshape(N, Ho, Wo, r5)                       # (N,4,4,128)
    skip6 = y[:, r5:a5]                                         # raw skip, 128 ch
    y, (N, Ho, Wo) = conv_layer(x5, W6, s6, 1, r6, skip=skip6)
    x6 = y[:, :r6].reshape(N, Ho, Wo, r6)                       # (N,4,4,128)

    # head: tiny (N,128)/(N,10) tensors — plain JAX, XLA fuses GAP + FC
    pooled = jnp.mean(x6.astype(jnp.float32), axis=(1, 2))      # (N, 128)
    return pooled @ params["fc"]["w"] + params["fc"]["b"]       # (N, 10)


# ---------------------- deterministic parameter init -----------------------

def init_params(key):
    keys = iter(jax.random.split(key, 64))

    def rnd(shape, s=0.1):
        return s * jax.random.normal(next(keys), shape, jnp.float32)

    params = {}
    conv_defs = {
        "conv1": (3, 3, 32), "conv2": (3, 32, 32), "conv3": (3, 32, 64),
        "conv4": (3, 64, 64), "conv5": (3, 64, 128), "conv6": (3, 128, 128),
        "skip_conv1": (1, 32, 32), "skip_conv2": (1, 32, 64),
        "skip_conv3": (1, 64, 128),
    }
    for name, (k, cin, cout) in conv_defs.items():
        params[name] = {"w": rnd((k, k, cin, cout)), "b": rnd((cout,))}
    for name, c in [("bn1", 32), ("bn2", 32), ("bn3", 64),
                    ("bn4", 64), ("bn5", 128), ("bn6", 128)]:
        params[name] = {
            "gamma": 1.0 + rnd((c,)),
            "beta": rnd((c,)),
            "mean": rnd((c,)),
            "var": 1.0 + jnp.abs(rnd((c,))),
        }
    params["fc"] = {"w": rnd((128, 10)), "b": rnd((10,))}
    return params


# ----------------------------- pure-JAX reference ---------------------------

def reference_forward(params, x_nchw):
    x = jnp.transpose(x_nchw, (0, 2, 3, 1))

    def conv(v, p, stride, pad):
        y = jax.lax.conv_general_dilated(
            v, p["w"], (stride, stride), [(pad, pad), (pad, pad)],
            dimension_numbers=("NHWC", "HWIO", "NHWC"))
        return y + p["b"]

    def bn(v, p):
        return (v - p["mean"]) / jnp.sqrt(p["var"] + EPS) * p["gamma"] + p["beta"]

    relu = lambda v: jnp.maximum(v, 0.0)
    x1 = relu(bn(conv(x, params["conv1"], 1, 1), params["bn1"]))
    x2 = relu(bn(conv(x1, params["conv2"], 1, 1), params["bn2"])
              + conv(x1, params["skip_conv1"], 1, 0))
    r = x2
    x3 = relu(bn(conv(x2, params["conv3"], 2, 1), params["bn3"]))
    x4 = relu(bn(conv(x3, params["conv4"], 1, 1), params["bn4"])
              + conv(r, params["skip_conv2"], 2, 0))
    r = x4
    x5 = relu(bn(conv(x4, params["conv5"], 2, 1), params["bn5"]))
    x6 = relu(bn(conv(x5, params["conv6"], 1, 1), params["bn6"])
              + conv(r, params["skip_conv3"], 2, 0))
    pooled = jnp.mean(x6, axis=(1, 2))
    return pooled @ params["fc"]["w"] + params["fc"]["b"]


# ---------------------------------- main ------------------------------------

if __name__ == "__main__":
    key = jax.random.PRNGKey(0)
    pkey, xkey = jax.random.split(key)
    params = init_params(pkey)
    x = jax.random.normal(xkey, (2, 3, 16, 16), jnp.float32)   # NCHW, like torch

    out = jax.jit(forward)(params, x)
    out = jax.block_until_ready(out)
    assert out.shape == (2, 10)

    ref = reference_forward(params, x)
    # bf16 MXU operands + bf16 activations vs an f32 reference: ~1% relative
    # error through 6 conv layers is expected, so compare at 5e-2.
    if not bool(jnp.allclose(out, ref, rtol=5e-2, atol=5e-2)):
        err = float(jnp.max(jnp.abs(out - ref)))
        raise AssertionError(f"Pallas output mismatch vs reference (max |diff|={err})")

    print("KERNEL_OK")
</pallas_src>

<mosaic_0001>
module attributes {stable_mosaic.version = 11 : i64} {
  func.func @_mm_shift_relu_kernel(%arg0: i32, %arg1: memref<256x27xbf16, #tpu.memory_space<vmem>>, %arg2: memref<27x128xbf16, #tpu.memory_space<vmem>>, %arg3: memref<1x128xf32, #tpu.memory_space<vmem>>, %arg4: memref<256x128xbf16, #tpu.memory_space<vmem>>) attributes {dimension_semantics = [#tpu.dimension_semantics<parallel>], iteration_bounds = array<i64: 2>, scalar_prefetch = 0 : i64, scratch_operands = 0 : i64, tpu.core_type = #tpu.core_type<tc>, window_params = [{transform_indices = @transform_0, window_bounds = array<i64: 256, 27>}, {pipeline_mode = #tpu.pipeline_mode<synchronous>, transform_indices = @transform_1, window_bounds = array<i64: 27, 128>}, {pipeline_mode = #tpu.pipeline_mode<synchronous>, transform_indices = @transform_2, window_bounds = array<i64: 1, 128>}, {transform_indices = @transform_3, window_bounds = array<i64: 256, 128>}]} {
    %c0 = arith.constant 0 : index
    %c0_0 = arith.constant 0 : index
    %0 = vector.load %arg1[%c0, %c0_0] : memref<256x27xbf16, #tpu.memory_space<vmem>>, vector<256x27xbf16>
    %c0_1 = arith.constant 0 : index
    %c0_2 = arith.constant 0 : index
    %1 = vector.load %arg2[%c0_1, %c0_2] : memref<27x128xbf16, #tpu.memory_space<vmem>>, vector<27x128xbf16>
    %cst = arith.constant dense<0.000000e+00> : vector<256x128xf32>
    %2 = tpu.matmul %0, %1, %cst {dimension_numbers = #tpu.dot_dimension_numbers<[1], [0], [0], [1], [0, 0, 1, 1], [], []>} : vector<256x27xbf16>, vector<27x128xbf16>, vector<256x128xf32> -> vector<256x128xf32>
    %c0_3 = arith.constant 0 : index
    %c0_4 = arith.constant 0 : index
    %3 = vector.load %arg3[%c0_3, %c0_4] : memref<1x128xf32, #tpu.memory_space<vmem>>, vector<1x128xf32>
    %4 = vector.broadcast %3 : vector<1x128xf32> to vector<256x128xf32>
    %5 = arith.addf %2, %4 : vector<256x128xf32>
    %cst_5 = arith.constant 0.000000e+00 : f32
    %6 = vector.broadcast %cst_5 : f32 to vector<256x128xf32>
    %7 = arith.maximumf %5, %6 : vector<256x128xf32>
    %8 = arith.truncf %7 : vector<256x128xf32> to vector<256x128xbf16>
    %c0_6 = arith.constant 0 : index
    %c0_7 = arith.constant 0 : index
    %9 = vector.load %arg4[%c0_6, %c0_7] : memref<256x128xbf16, #tpu.memory_space<vmem>>, vector<256x128xbf16>
    tpu.vector_store %arg4[%c0_6, %c0_7], %8 {strides = array<i32>} : memref<256x128xbf16, #tpu.memory_space<vmem>>, vector<256x128xbf16>,
    return
  }
  func.func @transform_0(%arg0: i32) -> (i32, i32) {
    %c0_i32 = arith.constant 0 : i32
    %c0_i32_0 = arith.constant 0 : i32
    return %arg0, %c0_i32 : i32, i32
  }
  func.func @transform_1(%arg0: i32) -> (i32, i32) {
    %c0_i32 = arith.constant 0 : i32
    %c0_i32_0 = arith.constant 0 : i32
    %c0_i32_1 = arith.constant 0 : i32
    return %c0_i32, %c0_i32_0 : i32, i32
  }
  func.func @transform_2(%arg0: i32) -> (i32, i32) {
    %c0_i32 = arith.constant 0 : i32
    %c0_i32_0 = arith.constant 0 : i32
    %c0_i32_1 = arith.constant 0 : i32
    return %c0_i32, %c0_i32_0 : i32, i32
  }
  func.func @transform_3(%arg0: i32) -> (i32, i32) {
    %c0_i32 = arith.constant 0 : i32
    %c0_i32_0 = arith.constant 0 : i32
    return %arg0, %c0_i32 : i32, i32
  }
}

module attributes {stable_mosaic.version = 11 : i64} {
  func.func @_mm_shift_relu_kernel(%arg0: i32, %arg1: memref<256x288xbf16, #tpu.memory_space<vmem>>, %arg2: memref<288x128xbf16, #tpu.memory_space<vmem>>, %arg3: memref<1x128xf32, #tpu.memory_space<vmem>>, %arg4: memref<256x128xbf16, #tpu.memory_space<vmem>>) attributes {dimension_semantics = [#tpu.dimension_semantics<parallel>], iteration_bounds = array<i64: 2>, scalar_prefetch = 0 : i64, scratch_operands = 0 : i64, tpu.core_type = #tpu.core_type<tc>, window_params = [{transform_indices = @transform_0, window_bounds = array<i64: 256, 288>}, {pipeline_mode = #tpu.pipeline_mode<synchronous>, transform_indices = @transform_1, window_bounds = array<i64: 288, 128>}, {pipeline_mode = #tpu.pipeline_mode<synchronous>, transform_indices = @transform_2, window_bounds = array<i64: 1, 128>}, {transform_indices = @transform_3, window_bounds = array<i64: 256, 128>}]} {
    %c0 = arith.constant 0 : index
    %c0_0 = arith.constant 0 : index
    %0 = vector.load %arg1[%c0, %c0_0] : memref<256x288xbf16, #tpu.memory_space<vmem>>, vector<256x288xbf16>
    %c0_1 = arith.constant 0 : index
    %c0_2 = arith.constant 0 : index
    %1 = vector.load %arg2[%c0_1, %c0_2] : memref<288x128xbf16, #tpu.memory_space<vmem>>, vector<288x128xbf16>
    %cst = arith.constant dense<0.000000e+00> : vector<256x128xf32>
    %2 = tpu.matmul %0, %1, %cst {dimension_numbers = #tpu.dot_dimension_numbers<[1], [0], [0], [1], [0, 0, 1, 1], [], []>} : vector<256x288xbf16>, vector<288x128xbf16>, vector<256x128xf32> -> vector<256x128xf32>
    %c0_3 = arith.constant 0 : index
    %c0_4 = arith.constant 0 : index
    %3 = vector.load %arg3[%c0_3, %c0_4] : memref<1x128xf32, #tpu.memory_space<vmem>>, vector<1x128xf32>
    %4 = vector.broadcast %3 : vector<1x128xf32> to vector<256x128xf32>
    %5 = arith.addf %2, %4 : vector<256x128xf32>
    %cst_5 = arith.constant 0.000000e+00 : f32
    %6 = vector.broadcast %cst_5 : f32 to vector<256x128xf32>
    %7 = arith.maximumf %5, %6 : vector<256x128xf32>
    %8 = arith.truncf %7 : vector<256x128xf32> to vector<256x128xbf16>
    %c0_6 = arith.constant 0 : index
    %c0_7 = arith.constant 0 : index
    %9 = vector.load %arg4[%c0_6, %c0_7] : memref<256x128xbf16, #tpu.memory_space<vmem>>, vector<256x128xbf16>
    tpu.vector_store %arg4[%c0_6, %c0_7], %8 {strides = array<i32>} : memref<256x128xbf16, #tpu.memory_space<vmem>>, vector<256x128xbf16>,
    return
  }
  func.func @transform_0(%arg0: i32) -> (i32, i32) {
    %c0_i32 = arith.constant 0 : i32
    %c0_i32_0 = arith.constant 0 : i32
    return %arg0, %c0_i32 : i32, i32
  }
  func.func @transform_1(%arg0: i32) -> (i32, i32) {
    %c0_i32 = arith.constant 0 : i32
    %c0_i32_0 = arith.constant 0 : i32
    %c0_i32_1 = arith.constant 0 : i32
    return %c0_i32, %c0_i32_0 : i32, i32
  }
  func.func @transform_2(%arg0: i32) -> (i32, i32) {
    %c0_i32 = arith.constant 0 : i32
    %c0_i32_0 = arith.constant 0 : i32
    %c0_i32_1 = arith.constant 0 : i32
    return %c0_i32, %c0_i32_0 : i32, i32
  }
  func.func @transform_3(%arg0: i32) -> (i32, i32) {
    %c0_i32 = arith.constant 0 : i32
    %c0_i32_0 = arith.constant 0 : i32
    return %arg0, %c0_i32 : i32, i32
  }
}

module attributes {stable_mosaic.version = 11 : i64} {
  func.func @_mm_shift_colrelu_kernel(%arg0: i32, %arg1: memref<128x288xbf16, #tpu.memory_space<vmem>>, %arg2: memref<288x128xbf16, #tpu.memory_space<vmem>>, %arg3: memref<1x128xf32, #tpu.memory_space<vmem>>, %arg4: memref<1x128xf32, #tpu.memory_space<vmem>>, %arg5: memref<128x128xbf16, #tpu.memory_space<vmem>>) attributes {dimension_semantics = [#tpu.dimension_semantics<parallel>], iteration_bounds = array<i64: 1>, scalar_prefetch = 0 : i64, scratch_operands = 0 : i64, tpu.core_type = #tpu.core_type<tc>, window_params = [{transform_indices = @transform_0, window_bounds = array<i64: 128, 288>}, {pipeline_mode = #tpu.pipeline_mode<synchronous>, transform_indices = @transform_1, window_bounds = array<i64: 288, 128>}, {pipeline_mode = #tpu.pipeline_mode<synchronous>, transform_indices = @transform_2, window_bounds = array<i64: 1, 128>}, {pipeline_mode = #tpu.pipeline_mode<synchronous>, transform_indices = @transform_3, window_bounds = array<i64: 1, 128>}, {transform_indices = @transform_4, window_bounds = array<i64: 128, 128>}]} {
    %c0 = arith.constant 0 : index
    %c0_0 = arith.constant 0 : index
    %0 = vector.load %arg1[%c0, %c0_0] : memref<128x288xbf16, #tpu.memory_space<vmem>>, vector<128x288xbf16>
    %c0_1 = arith.constant 0 : index
    %c0_2 = arith.constant 0 : index
    %1 = vector.load %arg2[%c0_1, %c0_2] : memref<288x128xbf16, #tpu.memory_space<vmem>>, vector<288x128xbf16>
    %cst = arith.constant dense<0.000000e+00> : vector<128x128xf32>
    %2 = tpu.matmul %0, %1, %cst {dimension_numbers = #tpu.dot_dimension_numbers<[1], [0], [0], [1], [0, 0, 1, 1], [], []>} : vector<128x288xbf16>, vector<288x128xbf16>, vector<128x128xf32> -> vector<128x128xf32>
    %c0_3 = arith.constant 0 : index
    %c0_4 = arith.constant 0 : index
    %3 = vector.load %arg3[%c0_3, %c0_4] : memref<1x128xf32, #tpu.memory_space<vmem>>, vector<1x128xf32>
    %4 = vector.broadcast %3 : vector<1x128xf32> to vector<128x128xf32>
    %5 = arith.addf %2, %4 : vector<128x128xf32>
    %c0_5 = arith.constant 0 : index
    %c0_6 = arith.constant 0 : index
    %6 = vector.load %arg4[%c0_5, %c0_6] : memref<1x128xf32, #tpu.memory_space<vmem>>, vector<1x128xf32>
    %cst_7 = arith.constant 0.000000e+00 : f32
    %7 = vector.broadcast %cst_7 : f32 to vector<128x128xf32>
    %8 = arith.maximumf %5, %7 : vector<128x128xf32>
    %9 = vector.broadcast %6 : vector<1x128xf32> to vector<128x128xf32>
    %10 = arith.mulf %9, %8 : vector<128x128xf32>
    %cst_8 = arith.constant 1.000000e+00 : f32
    %11 = vector.broadcast %cst_8 : f32 to vector<1x128xf32>
    %12 = arith.subf %11, %6 : vector<1x128xf32>
    %13 = vector.broadcast %12 : vector<1x128xf32> to vector<128x128xf32>
    %14 = arith.mulf %13, %5 : vector<128x128xf32>
    %15 = arith.addf %10, %14 : vector<128x128xf32>
    %16 = arith.truncf %15 : vector<128x128xf32> to vector<128x128xbf16>
    %c0_9 = arith.constant 0 : index
    %c0_10 = arith.constant 0 : index
    %17 = vector.load %arg5[%c0_9, %c0_10] : memref<128x128xbf16, #tpu.memory_space<vmem>>, vector<128x128xbf16>
    tpu.vector_store %arg5[%c0_9, %c0_10], %16 {strides = array<i32>} : memref<128x128xbf16, #tpu.memory_space<vmem>>, vector<128x128xbf16>,
    return
  }
  func.func @transform_0(%arg0: i32) -> (i32, i32) {
    %c0_i32 = arith.constant 0 : i32
    %c0_i32_0 = arith.constant 0 : i32
    return %arg0, %c0_i32 : i32, i32
  }
  func.func @transform_1(%arg0: i32) -> (i32, i32) {
    %c0_i32 = arith.constant 0 : i32
    %c0_i32_0 = arith.constant 0 : i32
    %c0_i32_1 = arith.constant 0 : i32
    return %c0_i32, %c0_i32_0 : i32, i32
  }
  func.func @transform_2(%arg0: i32) -> (i32, i32) {
    %c0_i32 = arith.constant 0 : i32
    %c0_i32_0 = arith.constant 0 : i32
    %c0_i32_1 = arith.constant 0 : i32
    return %c0_i32, %c0_i32_0 : i32, i32
  }
  func.func @transform_3(%arg0: i32) -> (i32, i32) {
    %c0_i32 = arith.constant 0 : i32
    %c0_i32_0 = arith.constant 0 : i32
    %c0_i32_1 = arith.constant 0 : i32
    return %c0_i32, %c0_i32_0 : i32, i32
  }
  func.func @transform_4(%arg0: i32) -> (i32, i32) {
    %c0_i32 = arith.constant 0 : i32
    %c0_i32_0 = arith.constant 0 : i32
    return %arg0, %c0_i32 : i32, i32
  }
}

module attributes {stable_mosaic.version = 11 : i64} {
  func.func @_mm_shift_skip_relu_kernel(%arg0: i32, %arg1: memref<128x576xbf16, #tpu.memory_space<vmem>>, %arg2: memref<576x128xbf16, #tpu.memory_space<vmem>>, %arg3: memref<1x128xf32, #tpu.memory_space<vmem>>, %arg4: memref<128x128xbf16, #tpu.memory_space<vmem>>, %arg5: memref<128x128xbf16, #tpu.memory_space<vmem>>) attributes {dimension_semantics = [#tpu.dimension_semantics<parallel>], iteration_bounds = array<i64: 1>, scalar_prefetch = 0 : i64, scratch_operands = 0 : i64, tpu.core_type = #tpu.core_type<tc>, window_params = [{transform_indices = @transform_0, window_bounds = array<i64: 128, 576>}, {pipeline_mode = #tpu.pipeline_mode<synchronous>, transform_indices = @transform_1, window_bounds = array<i64: 576, 128>}, {pipeline_mode = #tpu.pipeline_mode<synchronous>, transform_indices = @transform_2, window_bounds = array<i64: 1, 128>}, {transform_indices = @transform_3, window_bounds = array<i64: 128, 128>}, {transform_indices = @transform_4, window_bounds = array<i64: 128, 128>}]} {
    %c0 = arith.constant 0 : index
    %c0_0 = arith.constant 0 : index
    %0 = vector.load %arg1[%c0, %c0_0] : memref<128x576xbf16, #tpu.memory_space<vmem>>, vector<128x576xbf16>
    %c0_1 = arith.constant 0 : index
    %c0_2 = arith.constant 0 : index
    %1 = vector.load %arg2[%c0_1, %c0_2] : memref<576x128xbf16, #tpu.memory_space<vmem>>, vector<576x128xbf16>
    %cst = arith.constant dense<0.000000e+00> : vector<128x128xf32>
    %2 = tpu.matmul %0, %1, %cst {dimension_numbers = #tpu.dot_dimension_numbers<[1], [0], [0], [1], [0, 0, 1, 1], [], []>} : vector<128x576xbf16>, vector<576x128xbf16>, vector<128x128xf32> -> vector<128x128xf32>
    %c0_3 = arith.constant 0 : index
    %c0_4 = arith.constant 0 : index
    %3 = vector.load %arg3[%c0_3, %c0_4] : memref<1x128xf32, #tpu.memory_space<vmem>>, vector<1x128xf32>
    %4 = vector.broadcast %3 : vector<1x128xf32> to vector<128x128xf32>
    %5 = arith.addf %2, %4 : vector<128x128xf32>
    %c0_5 = arith.constant 0 : index
    %c0_6 = arith.constant 0 : index
    %6 = vector.load %arg4[%c0_5, %c0_6] : memref<128x128xbf16, #tpu.memory_space<vmem>>, vector<128x128xbf16>
    %7 = arith.extf %6 : vector<128x128xbf16> to vector<128x128xf32>
    %8 = arith.addf %5, %7 : vector<128x128xf32>
    %cst_7 = arith.constant 0.000000e+00 : f32
    %9 = vector.broadcast %cst_7 : f32 to vector<128x128xf32>
    %10 = arith.maximumf %8, %9 : vector<128x128xf32>
    %11 = arith.truncf %10 : vector<128x128xf32> to vector<128x128xbf16>
    %c0_8 = arith.constant 0 : index
    %c0_9 = arith.constant 0 : index
    %12 = vector.load %arg5[%c0_8, %c0_9] : memref<128x128xbf16, #tpu.memory_space<vmem>>, vector<128x128xbf16>
    tpu.vector_store %arg5[%c0_8, %c0_9], %11 {strides = array<i32>} : memref<128x128xbf16, #tpu.memory_space<vmem>>, vector<128x128xbf16>,
    return
  }
  func.func @transform_0(%arg0: i32) -> (i32, i32) {
    %c0_i32 = arith.constant 0 : i32
    %c0_i32_0 = arith.constant 0 : i32
    return %arg0, %c0_i32 : i32, i32
  }
  func.func @transform_1(%arg0: i32) -> (i32, i32) {
    %c0_i32 = arith.constant 0 : i32
    %c0_i32_0 = arith.constant 0 : i32
    %c0_i32_1 = arith.constant 0 : i32
    return %c0_i32, %c0_i32_0 : i32, i32
  }
  func.func @transform_2(%arg0: i32) -> (i32, i32) {
    %c0_i32 = arith.constant 0 : i32
    %c0_i32_0 = arith.constant 0 : i32
    %c0_i32_1 = arith.constant 0 : i32
    return %c0_i32, %c0_i32_0 : i32, i32
  }
  func.func @transform_3(%arg0: i32) -> (i32, i32) {
    %c0_i32 = arith.constant 0 : i32
    %c0_i32_0 = arith.constant 0 : i32
    return %arg0, %c0_i32 : i32, i32
  }
  func.func @transform_4(%arg0: i32) -> (i32, i32) {
    %c0_i32 = arith.constant 0 : i32
    %c0_i32_0 = arith.constant 0 : i32
    return %arg0, %c0_i32 : i32, i32
  }
}

module attributes {stable_mosaic.version = 11 : i64} {
  func.func @_mm_shift_colrelu_kernel(%arg0: i32, %arg1: memref<32x576xbf16, #tpu.memory_space<vmem>>, %arg2: memref<576x256xbf16, #tpu.memory_space<vmem>>, %arg3: memref<1x256xf32, #tpu.memory_space<vmem>>, %arg4: memref<1x256xf32, #tpu.memory_space<vmem>>, %arg5: memref<32x256xbf16, #tpu.memory_space<vmem>>) attributes {dimension_semantics = [#tpu.dimension_semantics<parallel>], iteration_bounds = array<i64: 1>, scalar_prefetch = 0 : i64, scratch_operands = 0 : i64, tpu.core_type = #tpu.core_type<tc>, window_params = [{transform_indices = @transform_0, window_bounds = array<i64: 32, 576>}, {pipeline_mode = #tpu.pipeline_mode<synchronous>, transform_indices = @transform_1, window_bounds = array<i64: 576, 256>}, {pipeline_mode = #tpu.pipeline_mode<synchronous>, transform_indices = @transform_2, window_bounds = array<i64: 1, 256>}, {pipeline_mode = #tpu.pipeline_mode<synchronous>, transform_indices = @transform_3, window_bounds = array<i64: 1, 256>}, {transform_indices = @transform_4, window_bounds = array<i64: 32, 256>}]} {
    %c0 = arith.constant 0 : index
    %c0_0 = arith.constant 0 : index
    %0 = vector.load %arg1[%c0, %c0_0] : memref<32x576xbf16, #tpu.memory_space<vmem>>, vector<32x576xbf16>
    %c0_1 = arith.constant 0 : index
    %c0_2 = arith.constant 0 : index
    %1 = vector.load %arg2[%c0_1, %c0_2] : memref<576x256xbf16, #tpu.memory_space<vmem>>, vector<576x256xbf16>
    %cst = arith.constant dense<0.000000e+00> : vector<32x256xf32>
    %2 = tpu.matmul %0, %1, %cst {dimension_numbers = #tpu.dot_dimension_numbers<[1], [0], [0], [1], [0, 0, 1, 1], [], []>} : vector<32x576xbf16>, vector<576x256xbf16>, vector<32x256xf32> -> vector<32x256xf32>
    %c0_3 = arith.constant 0 : index
    %c0_4 = arith.constant 0 : index
    %3 = vector.load %arg3[%c0_3, %c0_4] : memref<1x256xf32, #tpu.memory_space<vmem>>, vector<1x256xf32>
    %4 = vector.broadcast %3 : vector<1x256xf32> to vector<32x256xf32>
    %5 = arith.addf %2, %4 : vector<32x256xf32>
    %c0_5 = arith.constant 0 : index
    %c0_6 = arith.constant 0 : index
    %6 = vector.load %arg4[%c0_5, %c0_6] : memref<1x256xf32, #tpu.memory_space<vmem>>, vector<1x256xf32>
    %cst_7 = arith.constant 0.000000e+00 : f32
    %7 = vector.broadcast %cst_7 : f32 to vector<32x256xf32>
    %8 = arith.maximumf %5, %7 : vector<32x256xf32>
    %9 = vector.broadcast %6 : vector<1x256xf32> to vector<32x256xf32>
    %10 = arith.mulf %9, %8 : vector<32x256xf32>
    %cst_8 = arith.constant 1.000000e+00 : f32
    %11 = vector.broadcast %cst_8 : f32 to vector<1x256xf32>
    %12 = arith.subf %11, %6 : vector<1x256xf32>
    %13 = vector.broadcast %12 : vector<1x256xf32> to vector<32x256xf32>
    %14 = arith.mulf %13, %5 : vector<32x256xf32>
    %15 = arith.addf %10, %14 : vector<32x256xf32>
    %16 = arith.truncf %15 : vector<32x256xf32> to vector<32x256xbf16>
    %c0_9 = arith.constant 0 : index
    %c0_10 = arith.constant 0 : index
    %17 = vector.load %arg5[%c0_9, %c0_10] : memref<32x256xbf16, #tpu.memory_space<vmem>>, vector<32x256xbf16>
    tpu.vector_store %arg5[%c0_9, %c0_10], %16 {strides = array<i32>} : memref<32x256xbf16, #tpu.memory_space<vmem>>, vector<32x256xbf16>,
    return
  }
  func.func @transform_0(%arg0: i32) -> (i32, i32) {
    %c0_i32 = arith.constant 0 : i32
    %c0_i32_0 = arith.constant 0 : i32
    return %arg0, %c0_i32 : i32, i32
  }
  func.func @transform_1(%arg0: i32) -> (i32, i32) {
    %c0_i32 = arith.constant 0 : i32
    %c0_i32_0 = arith.constant 0 : i32
    %c0_i32_1 = arith.constant 0 : i32
    return %c0_i32, %c0_i32_0 : i32, i32
  }
  func.func @transform_2(%arg0: i32) -> (i32, i32) {
    %c0_i32 = arith.constant 0 : i32
    %c0_i32_0 = arith.constant 0 : i32
    %c0_i32_1 = arith.constant 0 : i32
    return %c0_i32, %c0_i32_0 : i32, i32
  }
  func.func @transform_3(%arg0: i32) -> (i32, i32) {
    %c0_i32 = arith.constant 0 : i32
    %c0_i32_0 = arith.constant 0 : i32
    %c0_i32_1 = arith.constant 0 : i32
    return %c0_i32, %c0_i32_0 : i32, i32
  }
  func.func @transform_4(%arg0: i32) -> (i32, i32) {
    %c0_i32 = arith.constant 0 : i32
    %c0_i32_0 = arith.constant 0 : i32
    return %arg0, %c0_i32 : i32, i32
  }
}

module attributes {stable_mosaic.version = 11 : i64} {
  func.func @_mm_shift_skip_relu_kernel(%arg0: i32, %arg1: memref<32x1152xbf16, #tpu.memory_space<vmem>>, %arg2: memref<1152x128xbf16, #tpu.memory_space<vmem>>, %arg3: memref<1x128xf32, #tpu.memory_space<vmem>>, %arg4: memref<32x128xbf16, #tpu.memory_space<vmem>>, %arg5: memref<32x128xbf16, #tpu.memory_space<vmem>>) attributes {dimension_semantics = [#tpu.dimension_semantics<parallel>], iteration_bounds = array<i64: 1>, scalar_prefetch = 0 : i64, scratch_operands = 0 : i64, tpu.core_type = #tpu.core_type<tc>, window_params = [{transform_indices = @transform_0, window_bounds = array<i64: 32, 1152>}, {pipeline_mode = #tpu.pipeline_mode<synchronous>, transform_indices = @transform_1, window_bounds = array<i64: 1152, 128>}, {pipeline_mode = #tpu.pipeline_mode<synchronous>, transform_indices = @transform_2, window_bounds = array<i64: 1, 128>}, {transform_indices = @transform_3, window_bounds = array<i64: 32, 128>}, {transform_indices = @transform_4, window_bounds = array<i64: 32, 128>}]} {
    %c0 = arith.constant 0 : index
    %c0_0 = arith.constant 0 : index
    %0 = vector.load %arg1[%c0, %c0_0] : memref<32x1152xbf16, #tpu.memory_space<vmem>>, vector<32x1152xbf16>
    %c0_1 = arith.constant 0 : index
    %c0_2 = arith.constant 0 : index
    %1 = vector.load %arg2[%c0_1, %c0_2] : memref<1152x128xbf16, #tpu.memory_space<vmem>>, vector<1152x128xbf16>
    %cst = arith.constant dense<0.000000e+00> : vector<32x128xf32>
    %2 = tpu.matmul %0, %1, %cst {dimension_numbers = #tpu.dot_dimension_numbers<[1], [0], [0], [1], [0, 0, 1, 1], [], []>} : vector<32x1152xbf16>, vector<1152x128xbf16>, vector<32x128xf32> -> vector<32x128xf32>
    %c0_3 = arith.constant 0 : index
    %c0_4 = arith.constant 0 : index
    %3 = vector.load %arg3[%c0_3, %c0_4] : memref<1x128xf32, #tpu.memory_space<vmem>>, vector<1x128xf32>
    %4 = vector.broadcast %3 : vector<1x128xf32> to vector<32x128xf32>
    %5 = arith.addf %2, %4 : vector<32x128xf32>
    %c0_5 = arith.constant 0 : index
    %c0_6 = arith.constant 0 : index
    %6 = vector.load %arg4[%c0_5, %c0_6] : memref<32x128xbf16, #tpu.memory_space<vmem>>, vector<32x128xbf16>
    %7 = arith.extf %6 : vector<32x128xbf16> to vector<32x128xf32>
    %8 = arith.addf %5, %7 : vector<32x128xf32>
    %cst_7 = arith.constant 0.000000e+00 : f32
    %9 = vector.broadcast %cst_7 : f32 to vector<32x128xf32>
    %10 = arith.maximumf %8, %9 : vector<32x128xf32>
    %11 = arith.truncf %10 : vector<32x128xf32> to vector<32x128xbf16>
    %c0_8 = arith.constant 0 : index
    %c0_9 = arith.constant 0 : index
    %12 = vector.load %arg5[%c0_8, %c0_9] : memref<32x128xbf16, #tpu.memory_space<vmem>>, vector<32x128xbf16>
    tpu.vector_store %arg5[%c0_8, %c0_9], %11 {strides = array<i32>} : memref<32x128xbf16, #tpu.memory_space<vmem>>, vector<32x128xbf16>,
    return
  }
  func.func @transform_0(%arg0: i32) -> (i32, i32) {
    %c0_i32 = arith.constant 0 : i32
    %c0_i32_0 = arith.constant 0 : i32
    return %arg0, %c0_i32 : i32, i32
  }
  func.func @transform_1(%arg0: i32) -> (i32, i32) {
    %c0_i32 = arith.constant 0 : i32
    %c0_i32_0 = arith.constant 0 : i32
    %c0_i32_1 = arith.constant 0 : i32
    return %c0_i32, %c0_i32_0 : i32, i32
  }
  func.func @transform_2(%arg0: i32) -> (i32, i32) {
    %c0_i32 = arith.constant 0 : i32
    %c0_i32_0 = arith.constant 0 : i32
    %c0_i32_1 = arith.constant 0 : i32
    return %c0_i32, %c0_i32_0 : i32, i32
  }
  func.func @transform_3(%arg0: i32) -> (i32, i32) {
    %c0_i32 = arith.constant 0 : i32
    %c0_i32_0 = arith.constant 0 : i32
    return %arg0, %c0_i32 : i32, i32
  }
  func.func @transform_4(%arg0: i32) -> (i32, i32) {
    %c0_i32 = arith.constant 0 : i32
    %c0_i32_0 = arith.constant 0 : i32
    return %arg0, %c0_i32 : i32, i32
  }
}

</mosaic_0001>

<bundles_post_ra>
// kernel: forward.6
= control target key start
LH: loop header
LB: loop body
LE: loop exit
PB: predicated region body
PF: predicated region fallthrough
CT: control target
= control target key end

     0   :  { %s1093_s12 = smov 0   ;;  %s1212_s0 = inlined_call_operand.vmem [shape: bf16[512,27], index: 0, kind: input, shape index: {}]   ;;  %s1213_s1 = inlined_call_operand.vmem [shape: bf16[27,128], index: 1, kind: input, shape index: {}]   ;;  %s1214_s2 = inlined_call_operand.vmem [shape: f32[1,128], index: 2, kind: input, shape index: {}]   ;;  %s1215_s3 = inlined_call_operand.vmem [shape: bf16[512,128], index: 3, kind: output, shape index: {}]  }
   0x1 LB: > { %s774_s13 = sadd.s32 4294967295, %s1070_s12   ;;  %p778_p0 = scmp.ge.s32.totalorder %s1070_s12, 1  ;;  %s1070_s12 = sphi %s1093_s12, %s13_s12  }
   0x2   : > { %p138_p1 = scmp.lt.s32.totalorder %s1070_s12, 3 }
   0x4   : > { %p139_p2 = pnand %p778_p0, %p138_p1 }
   0x5   : > { %v1046_v0 = vld [vmem:[%s1213_s1] sm:$0xff] (!%p139_p2)   ;;  %vm358_vm0 = vcmask (!%p139_p2), 1044480   ;;  %v1047_v1 = vld [vmem:[%s1213_s1 + $0x8] sm:$0x3f] (!%p139_p2)   ;;  %vm359_vm1 = vcmask (!%p139_p2), 1045504   ;;  %s779_s18 = sshll.u32 (!%p139_p2), %s774_s13, 5 }
   0x6   : > { %142 = sbr.rel (%p139_p2) target bundleno = 265 (0x109), region = 32  ;;  %997 = vmatprep.subr.bf16.mxu0 (!%p139_p2), %v1046_v0  ;;  %1033 = vmatprep.subr.bf16.mxu1 (!%p139_p2), %v1046_v0  ;;  %v1072_v2 = vmov (!%p139_p2), 65535   ;;  %p163_p3 = scmp.lt.s32.totalorder (!%p139_p2), %s779_s18, 63  ;;  %vm309_vm2 = vcmask (!%p139_p2), 220160   ;;  %v1152_v22 = vld [vmem:[%s1214_s2] ss:$0 sm:$0xff] (!%p139_p2) }
   0x7   : > { %998 = vmatpush3.bf16.msra.mxu0 (!%p139_p2), %v1046_v0  ;;  %1035 = vmatpush3.bf16.msra.mxu1 (!%p139_p2), %v1046_v0  ;;  %v360_v3 = vsel (!%p139_p2), %vm358_vm0, 4294967295, %v1072_v2 }
   0x8   : > { %v361_v4 = vsel (!%p139_p2), %vm359_vm1, %v360_v3, 0 }
   0x9   : > { %v363_v5 = vand.u32 (!%p139_p2), %v1047_v1, %v361_v4 }
   0xb   : > { %999 = vmatprep.subr.bf16.mxu0 (!%p139_p2), %v363_v5  ;;  %1034 = vmatprep.subr.bf16.mxu1 (!%p139_p2), %v363_v5 }
   0xc   : > { %1000 = vmatpush3.bf16.msra.mxu0 (!%p139_p2), %v363_v5  ;;  %1036 = vmatpush3.bf16.msra.mxu1 (!%p139_p2), %v363_v5 }
   0xd   : > { %s1217_s18 = smov (!%p163_p3, %s779_s18), 63 }
   0xe   : > { %s780_s19 = sshll.u32 %s1217_s18, 2 }
   0xf   : > { %s1115_s22 = scalar_lea.vmem %s1212_s0, %s780_s19  ;;  %s1167_s27 = scalar_lea.vmem %s1215_s3, %s780_s19 }
  0x10   : > { %v1048_v6 = vld [vmem:[%s1115_s22] sm:$0xff]   ;;  %v1050_v8 = vld [vmem:[%s1115_s22 + $0x8] sm:$0xff]   ;;  %v1052_v10 = vld [vmem:[%s1115_s22 + $0x10] sm:$0xff]  }
  0x11   : > { %v1049_v7 = vld [vmem:[%s1115_s22 + $0x40] sm:$0xff]   ;;  %1001 = vmatprep.mubr.msk.bf16.mxu0 %vm309_vm2, %v1048_v6  ;;  %v1051_v9 = vld [vmem:[%s1115_s22 + $0x48] sm:$0xff]   ;;  %v1053_v11 = vld [vmem:[%s1115_s22 + $0x50] sm:$0xff]  }
  0x12   : > { %1017 = vmatprep.mubr.msk.bf16.mxu1 %vm309_vm2, %v1049_v7  ;;  %1002 = vmatmul.mubr.msk.bf16.vlgmr.msra.gmra.mrb[0].mxu0 %vm309_vm2, %v1050_v8  ;;  %v1054_v12 = vld [vmem:[%s1115_s22 + $0x18] sm:$0xff]   ;;  %v1056_v14 = vld [vmem:[%s1115_s22 + $0x20] sm:$0xff]   ;;  %v1058_v16 = vld [vmem:[%s1115_s22 + $0x28] sm:$0xff]  }
  0x13   : > { %1018 = vmatmul.mubr.msk.bf16.vlgmr.msra.gmra.mrb[0].mxu1 %vm309_vm2, %v1051_v9  ;;  %1005 = vmatprep.mubr.msk.bf16.mxu0 %vm309_vm2, %v1052_v10  ;;  %v1055_v13 = vld [vmem:[%s1115_s22 + $0x58] sm:$0xff]   ;;  %v1057_v15 = vld [vmem:[%s1115_s22 + $0x60] sm:$0xff]   ;;  %v1059_v17 = vld [vmem:[%s1115_s22 + $0x68] sm:$0xff]  }
  0x14   : > { %1021 = vmatprep.mubr.msk.bf16.mxu1 %vm309_vm2, %v1053_v11  ;;  %v1060_v18 = vld [vmem:[%s1115_s22 + $0x30] sm:$0xff]   ;;  %v1062_v20 = vld [vmem:[%s1115_s22 + $0x38] sm:$0xff]  }
  0x15   : > { %v1061_v19 = vld [vmem:[%s1115_s22 + $0x70] sm:$0xff]   ;;  %v1063_v21 = vld [vmem:[%s1115_s22 + $0x78] sm:$0xff]  }
  0x1a   : > { %1006 = vmatmul.mubr.msk.bf16.gmra.mrb[4].mxu0 %vm309_vm2, %v1054_v12 }
  0x1b   : > { %1022 = vmatmul.mubr.msk.bf16.gmra.mrb[4].mxu1 %vm309_vm2, %v1055_v13  ;;  %1009 = vmatprep.mubr.msk.bf16.mxu0 %vm309_vm2, %v1056_v14 }
  0x1c   : > { %1025 = vmatprep.mubr.msk.bf16.mxu1 %vm309_vm2, %v1057_v15 }
  0x22   : > { %1010 = vmatmul.mubr.msk.bf16.gmra.mrb[8].mxu0 %vm309_vm2, %v1058_v16 }
  0x23   : > { %1026 = vmatmul.mubr.msk.bf16.gmra.mrb[8].mxu1 %vm309_vm2, %v1059_v17  ;;  %1013 = vmatprep.mubr.msk.bf16.mxu0 %vm309_vm2, %v1060_v18 }
  0x24   : > { %1029 = vmatprep.mubr.msk.bf16.mxu1 %vm309_vm2, %v1061_v19 }
  0x2a   : > { %1014 = vmatmul.mubr.msk.bf16.gmra.mrb[12].mxu0 %vm309_vm2, %v1062_v20 }
  0x2b   : > { %1030 = vmatmul.mubr.msk.bf16.gmra.mrb[12].mxu1 %vm309_vm2, %v1063_v21 }
  0xe5   : > { %v1003_v23 = vpop.f32.mrb[0].mxu0 }
  0xe6   : > { %v408_v24 = vadd.f32 %v1003_v23, %v1152_v22  ;;  %v1019_v25 = vpop.f32.mrb[0].mxu1  ;;  %v399_v26 = vpop.f32.mrb[1].mxu0 }
  0xe7   : > { %v472_v27 = vadd.f32 %v1019_v25, %v1152_v22  ;;  %v400_v28 = vadd.f32 %v1152_v22, %v399_v26  ;;  %v463_v29 = vpop.f32.mrb[1].mxu1  ;;  %v1004_v30 = vpop.f32.mrb[2].mxu0 }
  0xe8   : > { %v464_v31 = vadd.f32 %v1152_v22, %v463_v29  ;;  %v411_v32 = vadd.f32 %v1004_v30, %v1152_v22  ;;  %v1020_v33 = vpop.f32.mrb[2].mxu1  ;;  %v402_v34 = vpop.f32.mrb[3].mxu0  ;;  %v528_v38 = vmax.f32 %v408_v24, 0.0 }
  0xe9   : > { %v475_v35 = vadd.f32 %v1020_v33, %v1152_v22  ;;  %v403_v36 = vadd.f32 %v1152_v22, %v402_v34  ;;  %v466_v37 = vpop.f32.mrb[3].mxu1  ;;  %v544_v41 = vmax.f32 %v472_v27, 0.0  ;;  %v526_v42 = vmax.f32 %v400_v28, 0.0 }
  0xea   : > { %v529_v39 = vmax.f32 %v411_v32, 0.0  ;;  %v467_v40 = vadd.f32 %v1152_v22, %v466_v37  ;;  %v542_v45 = vmax.f32 %v464_v31, 0.0 }
  0xeb   : > { %v545_v43 = vmax.f32 %v475_v35, 0.0  ;;  %v527_v44 = vmax.f32 %v403_v36, 0.0 }
  0xec   : > { %v892_v46 = vpack.c.bf16 %v529_v39, %v528_v38  ;;  %v543_v47 = vmax.f32 %v467_v40, 0.0 }
  0xed   : > { %v932_v48 = vpack.c.bf16 %v545_v43, %v544_v41  ;;  %v887_v49 = vpack.c.bf16 %v527_v44, %v526_v42  ;;  %v1007_v50 = vpop.f32.mrb[4].mxu0 }
  0xee   : > { %964 = vst [vmem:[%s1167_s27 + $0x8] sm:$0xff] %v892_v46   ;;  %v927_v51 = vpack.c.bf16 %v543_v47, %v542_v45  ;;  %v424_v52 = vadd.f32 %v1007_v50, %v1152_v22  ;;  %v1023_v53 = vpop.f32.mrb[4].mxu1  ;;  %v415_v54 = vpop.f32.mrb[5].mxu0 }
  0xef   : > { %972 = vst [vmem:[%s1167_s27 + $0x48] sm:$0xff] %v932_v48   ;;  %888 = vst [vmem:[%s1167_s27] sm:$0xff] %v887_v49   ;;  %v488_v55 = vadd.f32 %v1023_v53, %v1152_v22  ;;  %v416_v56 = vadd.f32 %v1152_v22, %v415_v54  ;;  %v479_v57 = vpop.f32.mrb[5].mxu1  ;;  %v1008_v58 = vpop.f32.mrb[6].mxu0 }
  0xf0   : > { %971 = vst [vmem:[%s1167_s27 + $0x40] sm:$0xff] %v927_v51   ;;  %v480_v59 = vadd.f32 %v1152_v22, %v479_v57  ;;  %v427_v60 = vadd.f32 %v1008_v58, %v1152_v22  ;;  %v1024_v61 = vpop.f32.mrb[6].mxu1  ;;  %v418_v62 = vpop.f32.mrb[7].mxu0  ;;  %v532_v2 = vmax.f32 %v424_v52, 0.0 }
  0xf1   : > { %v491_v63 = vadd.f32 %v1024_v61, %v1152_v22  ;;  %v419_v0 = vadd.f32 %v1152_v22, %v418_v62  ;;  %v482_v1 = vpop.f32.mrb[7].mxu1  ;;  %v548_v5 = vmax.f32 %v488_v55, 0.0  ;;  %v530_v6 = vmax.f32 %v416_v56, 0.0 }
  0xf2   : > { %v533_v3 = vmax.f32 %v427_v60, 0.0  ;;  %v483_v4 = vadd.f32 %v1152_v22, %v482_v1  ;;  %v546_v9 = vmax.f32 %v480_v59, 0.0 }
  0xf3   : > { %v549_v7 = vmax.f32 %v491_v63, 0.0  ;;  %v531_v8 = vmax.f32 %v419_v0, 0.0 }
  0xf4   : > { %v902_v10 = vpack.c.bf16 %v533_v3, %v532_v2  ;;  %v547_v11 = vmax.f32 %v483_v4, 0.0 }
  0xf5   : > { %v942_v12 = vpack.c.bf16 %v549_v7, %v548_v5  ;;  %v897_v13 = vpack.c.bf16 %v531_v8, %v530_v6  ;;  %v1011_v14 = vpop.f32.mrb[8].mxu0 }
  0xf6   : > { %966 = vst [vmem:[%s1167_s27 + $0x18] sm:$0xff] %v902_v10   ;;  %v937_v15 = vpack.c.bf16 %v547_v11, %v546_v9  ;;  %v440_v16 = vadd.f32 %v1011_v14, %v1152_v22  ;;  %v1027_v17 = vpop.f32.mrb[8].mxu1  ;;  %v431_v18 = vpop.f32.mrb[9].mxu0 }
  0xf7   : > { %974 = vst [vmem:[%s1167_s27 + $0x58] sm:$0xff] %v942_v12   ;;  %965 = vst [vmem:[%s1167_s27 + $0x10] sm:$0xff] %v897_v13   ;;  %v504_v19 = vadd.f32 %v1027_v17, %v1152_v22  ;;  %v432_v20 = vadd.f32 %v1152_v22, %v431_v18  ;;  %v495_v21 = vpop.f32.mrb[9].mxu1  ;;  %v1012_v23 = vpop.f32.mrb[10].mxu0 }
  0xf8   : > { %973 = vst [vmem:[%s1167_s27 + $0x50] sm:$0xff] %v937_v15   ;;  %v496_v24 = vadd.f32 %v1152_v22, %v495_v21  ;;  %v443_v25 = vadd.f32 %v1012_v23, %v1152_v22  ;;  %v1028_v26 = vpop.f32.mrb[10].mxu1  ;;  %v434_v27 = vpop.f32.mrb[11].mxu0  ;;  %v536_v31 = vmax.f32 %v440_v16, 0.0 }
  0xf9   : > { %v507_v28 = vadd.f32 %v1028_v26, %v1152_v22  ;;  %v435_v29 = vadd.f32 %v1152_v22, %v434_v27  ;;  %v498_v30 = vpop.f32.mrb[11].mxu1  ;;  %v552_v34 = vmax.f32 %v504_v19, 0.0  ;;  %v534_v35 = vmax.f32 %v432_v20, 0.0 }
  0xfa   : > { %v537_v32 = vmax.f32 %v443_v25, 0.0  ;;  %v499_v33 = vadd.f32 %v1152_v22, %v498_v30  ;;  %v550_v38 = vmax.f32 %v496_v24, 0.0 }
  0xfb   : > { %v553_v36 = vmax.f32 %v507_v28, 0.0  ;;  %v535_v37 = vmax.f32 %v435_v29, 0.0 }
  0xfc   : > { %v912_v39 = vpack.c.bf16 %v537_v32, %v536_v31  ;;  %v551_v40 = vmax.f32 %v499_v33, 0.0 }
  0xfd   : > { %v952_v41 = vpack.c.bf16 %v553_v36, %v552_v34  ;;  %v907_v42 = vpack.c.bf16 %v535_v37, %v534_v35  ;;  %v1015_v43 = vpop.f32.mrb[12].mxu0 }
  0xfe   : > { %968 = vst [vmem:[%s1167_s27 + $0x28] sm:$0xff] %v912_v39   ;;  %v947_v44 = vpack.c.bf16 %v551_v40, %v550_v38  ;;  %v456_v45 = vadd.f32 %v1015_v43, %v1152_v22  ;;  %v1031_v46 = vpop.f32.mrb[12].mxu1  ;;  %v447_v47 = vpop.f32.mrb[13].mxu0 }
  0xff   : > { %976 = vst [vmem:[%s1167_s27 + $0x68] sm:$0xff] %v952_v41   ;;  %967 = vst [vmem:[%s1167_s27 + $0x20] sm:$0xff] %v907_v42   ;;  %v520_v48 = vadd.f32 %v1031_v46, %v1152_v22  ;;  %v448_v49 = vadd.f32 %v1152_v22, %v447_v47  ;;  %v511_v50 = vpop.f32.mrb[13].mxu1  ;;  %v1016_v51 = vpop.f32.mrb[14].mxu0 }
 0x100   : > { %975 = vst [vmem:[%s1167_s27 + $0x60] sm:$0xff] %v947_v44   ;;  %v512_v52 = vadd.f32 %v1152_v22, %v511_v50  ;;  %v459_v53 = vadd.f32 %v1016_v51, %v1152_v22  ;;  %v1032_v54 = vpop.f32.mrb[14].mxu1  ;;  %v450_v55 = vpop.f32.mrb[15].mxu0  ;;  %v540_v59 = vmax.f32 %v456_v45, 0.0 }
 0x101   : > { %v523_v56 = vadd.f32 %v1032_v54, %v1152_v22  ;;  %v451_v57 = vadd.f32 %v1152_v22, %v450_v55  ;;  %v514_v58 = vpop.f32.mrb[15].mxu1  ;;  %v556_v62 = vmax.f32 %v520_v48, 0.0  ;;  %v538_v63 = vmax.f32 %v448_v49, 0.0 }
 0x102   : > { %v541_v60 = vmax.f32 %v459_v53, 0.0  ;;  %v515_v61 = vadd.f32 %v1152_v22, %v514_v58  ;;  %v554_v2 = vmax.f32 %v512_v52, 0.0 }
 0x103   : > { %v557_v0 = vmax.f32 %v523_v56, 0.0  ;;  %v539_v1 = vmax.f32 %v451_v57, 0.0 }
 0x104   : > { %v922_v3 = vpack.c.bf16 %v541_v60, %v540_v59  ;;  %v555_v4 = vmax.f32 %v515_v61, 0.0 }
 0x105   : > { %v962_v5 = vpack.c.bf16 %v557_v0, %v556_v62  ;;  %v917_v6 = vpack.c.bf16 %v539_v1, %v538_v63 }
 0x106   : > { %970 = vst [vmem:[%s1167_s27 + $0x38] sm:$0xff] %v922_v3   ;;  %v957_v7 = vpack.c.bf16 %v555_v4, %v554_v2 }
 0x107   : > { %978 = vst [vmem:[%s1167_s27 + $0x78] sm:$0xff] %v962_v5   ;;  %969 = vst [vmem:[%s1167_s27 + $0x30] sm:$0xff] %v917_v6  }
 0x108   : > { %977 = vst [vmem:[%s1167_s27 + $0x70] sm:$0xff] %v957_v7  }
 0x109 PF: > { %s13_s12 = sadd.s32 1, %s1070_s12  }
 0x10a   : > { %p10_p4 = scmp.ge.s32.totalorder %s13_s12, 4  }
 0x10c   :  { %12 = sbr.rel (!%p10_p4) target bundleno = 1 (0x1), region = 62 }

// kernel: forward.7
= control target key start
LH: loop header
LB: loop body
LE: loop exit
PB: predicated region body
PF: predicated region fallthrough
CT: control target
= control target key end

     0   :  { %s1806_s12 = smov 0   ;;  %s2032_s0 = inlined_call_operand.vmem [shape: bf16[512,288], index: 0, kind: input, shape index: {}]   ;;  %s2033_s1 = inlined_call_operand.vmem [shape: bf16[288,128], index: 1, kind: input, shape index: {}]   ;;  %s2034_s2 = inlined_call_operand.vmem [shape: f32[1,128], index: 2, kind: input, shape index: {}]   ;;  %s2035_s3 = inlined_call_operand.vmem [shape: bf16[512,128], index: 3, kind: output, shape index: {}]  }
   0x1 LB: > { %s1252_s13 = sadd.s32 4294967295, %s1784_s12   ;;  %p1256_p0 = scmp.ge.s32.totalorder %s1784_s12, 1  ;;  %s1784_s12 = sphi %s1806_s12, %s13_s12  }
   0x2   : > { %p139_p1 = scmp.lt.s32.totalorder %s1784_s12, 3 }
   0x4   : > { %p140_p2 = pnand %p1256_p0, %p139_p1 }
   0x5   : > { %v1696_v0 = vld [vmem:[%s2033_s1 + $0x40] sm:$0xff] (!%p140_p2)   ;;  %s1257_s16 = sshll.u32 (!%p140_p2), %s1252_s13, 5  ;;  %v1698_v2 = vld [vmem:[%s2033_s1 + $0x48] sm:$0xff] (!%p140_p2)   ;;  %v1700_v4 = vld [vmem:[%s2033_s1 + $0x50] sm:$0xff] (!%p140_p2)   ;;  %vm633_vm0 = vcmask (!%p140_p2), 261120  }
   0x6   : > { %143 = sbr.rel (%p140_p2) target bundleno = 352 (0x160), region = 32  ;;  %v1697_v1 = vld [vmem:[%s2033_s1] sm:$0xff] (!%p140_p2)   ;;  %1505 = vmatprep.subr.bf16.mxu0 (!%p140_p2), %v1696_v0  ;;  %1671 = vmatprep.subr.bf16.mxu1 (!%p140_p2), %v1696_v0  ;;  %p165_p3 = scmp.lt.s32.totalorder (!%p140_p2), %s1257_s16, 63  ;;  %v1699_v3 = vld [vmem:[%s2033_s1 + $0x8] sm:$0xff] (!%p140_p2)   ;;  %v1701_v5 = vld [vmem:[%s2033_s1 + $0x10] sm:$0xff] (!%p140_p2)  }
   0x7   : > { %1506 = vmatpush3.bf16.msra.mxu0 (!%p140_p2), %v1697_v1  ;;  %1679 = vmatpush3.bf16.msra.mxu1 (!%p140_p2), %v1697_v1  ;;  %v1702_v6 = vld [vmem:[%s2033_s1 + $0x58] sm:$0xff] (!%p140_p2)   ;;  %v1704_v8 = vld [vmem:[%s2033_s1 + $0x60] sm:$0xff] (!%p140_p2)   ;;  %v1706_v10 = vld [vmem:[%s2033_s1 + $0x68] sm:$0xff] (!%p140_p2)  }
   0x8   : > { %1507 = vmatprep.subr.bf16.mxu0 (!%p140_p2), %v1698_v2  ;;  %1672 = vmatprep.subr.bf16.mxu1 (!%p140_p2), %v1698_v2  ;;  %v1703_v7 = vld [vmem:[%s2033_s1 + $0x18] sm:$0xff] (!%p140_p2)   ;;  %v1705_v9 = vld [vmem:[%s2033_s1 + $0x20] sm:$0xff] (!%p140_p2)   ;;  %v1707_v13 = vld [vmem:[%s2033_s1 + $0x28] sm:$0xff] (!%p140_p2)  }
   0x9   : > { %v1708_v14 = vld [vmem:[%s2033_s1 + $0x70] sm:$0xff] (!%p140_p2)   ;;  %v1710_v16 = vld [vmem:[%s2033_s1 + $0x78] sm:$0xff] (!%p140_p2)   ;;  %v1718_v18 = vld [vmem:[%s2033_s1 + $0x80] sm:$0xff] (!%p140_p2)  }
   0xa   : > { %v1709_v15 = vld [vmem:[%s2033_s1 + $0x30] sm:$0xff] (!%p140_p2)   ;;  %v1711_v17 = vld [vmem:[%s2033_s1 + $0x38] sm:$0xff] (!%p140_p2)   ;;  %v1731_v23 = vld [vmem:[%s2033_s1 + $0x88] sm:$0xff] (!%p140_p2)  }
   0xb   : > { %1508 = vmatpush3.bf16.msra.mxu0 (!%p140_p2), %v1699_v3  ;;  %1680 = vmatpush3.bf16.msra.mxu1 (!%p140_p2), %v1699_v3 }
   0xc   : > { %1509 = vmatprep.subr.bf16.mxu0 (!%p140_p2), %v1700_v4  ;;  %1673 = vmatprep.subr.bf16.mxu1 (!%p140_p2), %v1700_v4 }
   0xd   : > { %s2037_s16 = smov (!%p165_p3, %s1257_s16), 63 }
   0xe   : > { %s1687_s29 = smul.u32 12, %s2037_s16  ;;  %s1260_s5 = sshll.u32 %s2037_s16, 2 }
   0xf   : > { %1510 = vmatpush3.bf16.msra.mxu0 %v1701_v5  ;;  %1681 = vmatpush3.bf16.msra.mxu1 %v1701_v5  ;;  %s1969_s8 = scalar_lea.vmem %s2035_s3, %s1260_s5 }
  0x10   : > { %1511 = vmatprep.subr.bf16.mxu0 %v1702_v6  ;;  %1674 = vmatprep.subr.bf16.mxu1 %v1702_v6  ;;  %s1847_s9 = scalar_lea.vmem %s2032_s0, %s1687_s29 }
  0x11   : > { %v1714_v11 = vld [vmem:[%s1847_s9 + $0x4] ss:$12 sps:$4 sm:$0xff]   ;;  %v1712_v19 = vld [vmem:[%s1847_s9] ss:$12 sps:$4 sm:$0xff]   ;;  %v1719_v21 = vld [vmem:[%s1847_s9 + $0x1c] ss:$12 sps:$4 sm:$0xff]  }
  0x12   : > { %v1717_v12 = vld [vmem:[%s1847_s9 + $0x124] ss:$12 sps:$4 sm:$0xff]   ;;  %714 = vmatprep.mubr.bf16.mxu0 %v1714_v11  ;;  %v1715_v20 = vld [vmem:[%s1847_s9 + $0x120] ss:$12 sps:$4 sm:$0xff]   ;;  %v1721_v22 = vld [vmem:[%s1847_s9 + $0x13c] ss:$12 sps:$4 sm:$0xff]  }
  0x13   : > { %1512 = vmatpush3.bf16.msra.mxu0 %v1703_v7  ;;  %1682 = vmatpush3.bf16.msra.mxu1 %v1703_v7  ;;  %v1723_v24 = vld [vmem:[%s1847_s9 + $0x18] ss:$12 sps:$4 sm:$0xff]   ;;  %v1725_v26 = vld [vmem:[%s1847_s9 + $0x34] ss:$12 sps:$4 sm:$0xff]   ;;  %v1729_v28 = vld [vmem:[%s1847_s9 + $0x30] ss:$12 sps:$4 sm:$0xff]  }
  0x14   : > { %1513 = vmatprep.subr.bf16.mxu0 %v1704_v8  ;;  %1675 = vmatprep.subr.bf16.mxu1 %v1704_v8  ;;  %v1724_v25 = vld [vmem:[%s1847_s9 + $0x138] ss:$12 sps:$4 sm:$0xff]   ;;  %v1727_v27 = vld [vmem:[%s1847_s9 + $0x154] ss:$12 sps:$4 sm:$0xff]   ;;  %v1730_v29 = vld [vmem:[%s1847_s9 + $0x150] ss:$12 sps:$4 sm:$0xff]  }
  0x15   : > { %810 = vmatprep.mubr.bf16.mxu1 %v1717_v12  ;;  %v1732_v30 = vld [vmem:[%s1847_s9 + $0x4c] ss:$12 sps:$4 sm:$0xff]   ;;  %v1736_v32 = vld [vmem:[%s1847_s9 + $0x48] ss:$12 sps:$4 sm:$0xff]   ;;  %v1738_v34 = vld [vmem:[%s1847_s9 + $0x64] ss:$12 sps:$4 sm:$0xff]  }
  0x16   : > { %v1734_v31 = vld [vmem:[%s1847_s9 + $0x16c] ss:$12 sps:$4 sm:$0xff]   ;;  %v1737_v33 = vld [vmem:[%s1847_s9 + $0x168] ss:$12 sps:$4 sm:$0xff]   ;;  %v1747_v41 = vld [vmem:[%s1847_s9 + $0x50] ss:$12 sps:$4 sm:$0xff]  }
  0x17   : > { %1514 = vmatpush3.bf16.msra.mxu0 %v1705_v9  ;;  %1683 = vmatpush3.bf16.msra.mxu1 %v1705_v9  ;;  %v1740_v35 = vld [vmem:[%s1847_s9 + $0x8] ss:$12 sps:$4 sm:$0xff]   ;;  %v1741_v36 = vld [vmem:[%s1847_s9 + $0x60] ss:$12 sps:$4 sm:$0xff]   ;;  %v1745_v39 = vld [vmem:[%s1847_s9 + $0x38] ss:$12 sps:$4 sm:$0xff]  }
  0x18   : > { %1515 = vmatprep.subr.bf16.mxu0 %v1706_v10  ;;  %1676 = vmatprep.subr.bf16.mxu1 %v1706_v10  ;;  %v1742_v37 = vld [vmem:[%s1847_s9 + $0x20] ss:$12 sps:$4 sm:$0xff]   ;;  %v1743_v38 = vld [vmem:[%s1847_s9 + $0x7c] ss:$12 sps:$4 sm:$0xff]   ;;  %v1746_v40 = vld [vmem:[%s1847_s9 + $0x78] ss:$12 sps:$4 sm:$0xff]  }
  0x19   : > { %v1748_v42 = vld [vmem:[%s1847_s9 + $0x94] ss:$12 sps:$4 sm:$0xff]   ;;  %v1751_v44 = vld [vmem:[%s1847_s9 + $0x90] ss:$12 sps:$4 sm:$0xff]   ;;  %v1753_v46 = vld [vmem:[%s1847_s9 + $0xac] ss:$12 sps:$4 sm:$0xff]  }
  0x1a   : > { %v1750_v43 = vld [vmem:[%s1847_s9 + $0x68] ss:$12 sps:$4 sm:$0xff]   ;;  %v1752_v45 = vld [vmem:[%s1847_s9 + $0x80] ss:$12 sps:$4 sm:$0xff]   ;;  %v1755_v47 = vld [vmem:[%s1847_s9 + $0x98] ss:$12 sps:$4 sm:$0xff]  }
  0x1b   : > { %1516 = vmatpush3.bf16.msra.mxu0 %v1707_v13  ;;  %1684 = vmatpush3.bf16.msra.mxu1 %v1707_v13  ;;  %v1756_v48 = vld [vmem:[%s1847_s9 + $0xa8] ss:$12 sps:$4 sm:$0xff]   ;;  %v1757_v49 = vld [vmem:[%s1847_s9 + $0xb0] ss:$12 sps:$4 sm:$0xff]   ;;  %v1761_v52 = vld [vmem:[%s1847_s9 + $0xc0] ss:$12 sps:$4 sm:$0xff]  }
  0x1c   : > { %1517 = vmatprep.subr.bf16.mxu0 %v1708_v14  ;;  %1677 = vmatprep.subr.bf16.mxu1 %v1708_v14  ;;  %v1758_v50 = vld [vmem:[%s1847_s9 + $0xc4] ss:$12 sps:$4 sm:$0xff]   ;;  %v1760_v51 = vld [vmem:[%s1847_s9 + $0xc8] ss:$12 sps:$4 sm:$0xff]   ;;  %v1762_v53 = vld [vmem:[%s1847_s9 + $0xe0] ss:$12 sps:$4 sm:$0xff]  }
  0x1d   : > { %v1763_v54 = vld [vmem:[%s1847_s9 + $0xdc] ss:$12 sps:$4 sm:$0xff]   ;;  %v1765_v55 = vld [vmem:[%s1847_s9 + $0xf8] ss:$12 sps:$4 sm:$0xff]   ;;  %v1768_v58 = vld [vmem:[%s1847_s9 + $0xf4] ss:$12 sps:$4 sm:$0xff]  }
  0x1e   : > { %v1766_v56 = vld [vmem:[%s1847_s9 + $0xd8] ss:$12 sps:$4 sm:$0xff]   ;;  %v1767_v57 = vld [vmem:[%s1847_s9 + $0x110] ss:$12 sps:$4 sm:$0xff]   ;;  %v1770_v59 = vld [vmem:[%s1847_s9 + $0x128] ss:$12 sps:$4 sm:$0xff]  }
  0x1f   : > { %1518 = vmatpush3.bf16.msra.mxu0 %v1709_v15  ;;  %1685 = vmatpush3.bf16.msra.mxu1 %v1709_v15  ;;  %v1771_v60 = vld [vmem:[%s1847_s9 + $0xf0] ss:$12 sps:$4 sm:$0xff]   ;;  %v1772_v61 = vld [vmem:[%s1847_s9 + $0x140] ss:$12 sps:$4 sm:$0xff]   ;;  %v1775_v63 = vld [vmem:[%s1847_s9 + $0x158] ss:$12 sps:$4 sm:$0xff]  }
  0x20   : > { %1519 = vmatprep.subr.bf16.mxu0 %v1710_v16  ;;  %1678 = vmatprep.subr.bf16.mxu1 %v1710_v16  ;;  %v1773_v62 = vld [vmem:[%s1847_s9 + $0x10c] ss:$12 sps:$4 sm:$0xff]   ;;  %v1776_v0 = vld [vmem:[%s1847_s9 + $0x108] ss:$12 sps:$4 sm:$0xff]   ;;  %v1777_v1 = vld [vmem:[%s1847_s9 + $0x170] ss:$12 sps:$4 sm:$0xff]  }
  0x23   : > { %1520 = vmatpush3.bf16.msra.mxu0 %v1711_v17  ;;  %1686 = vmatpush3.bf16.msra.mxu1 %v1711_v17 }
  0x24   : > { %1635 = vmatprep.subr.bf16.mxu1 %v1718_v18 }
  0x26   : > { %715 = vmatmul.mubr.bf16.vlgmr.msra.gmra.mrb[0].mxu0 %v1712_v19  ;;  %811 = vmatmul.mubr.bf16.vlgmr.msra.gmra.mrb[0].mxu1 %v1715_v20 }
  0x27   : > { %1636 = vmatpush3.bf16.msra.mxu1 %v1718_v18  ;;  %722 = vmatprep.mubr.bf16.mxu0 %v1719_v21 }
  0x28   : > { %818 = vmatprep.mubr.bf16.mxu1 %v1721_v22  ;;  %1637 = vmatprep.subr.bf16.mxu1 %v1731_v23 }
  0x2b   : > { %1638 = vmatpush3.bf16.msra.mxu1 %v1731_v23 }
  0x2e   : > { %723 = vmatmul.mubr.bf16.gmra.mrb[4].mxu0 %v1723_v24  ;;  %819 = vmatmul.mubr.bf16.gmra.mrb[4].mxu1 %v1724_v25 }
  0x2f   : > { %730 = vmatprep.mubr.bf16.mxu0 %v1725_v26  ;;  %826 = vmatprep.mubr.bf16.mxu1 %v1727_v27 }
  0x36   : > { %731 = vmatmul.mubr.bf16.gmra.mrb[8].mxu0 %v1729_v28  ;;  %827 = vmatmul.mubr.bf16.gmra.mrb[8].mxu1 %v1730_v29 }
  0x37   : > { %738 = vmatprep.mubr.bf16.mxu0 %v1732_v30  ;;  %834 = vmatprep.mubr.bf16.mxu1 %v1734_v31 }
  0x3e   : > { %739 = vmatmul.mubr.bf16.gmra.mrb[12].mxu0 %v1736_v32  ;;  %835 = vmatmul.mubr.bf16.gmra.mrb[12].mxu1 %v1737_v33 }
  0x3f   : > { %746 = vmatprep.mubr.bf16.mxu0 %v1738_v34  ;;  %1639 = vmatprep.mubr.msk.bf16.mxu1 %vm633_vm0, %v1740_v35 }
  0x46   : > { %747 = vmatmul.mubr.bf16.gmra.mrb[16].mxu0 %v1741_v36  ;;  %1640 = vmatmul.mubr.msk.bf16.vlgmr.msra.gmra.mrb[16].mxu1 %vm633_vm0, %v1742_v37 }
  0x47   : > { %754 = vmatprep.mubr.bf16.mxu0 %v1743_v38  ;;  %1643 = vmatprep.mubr.msk.bf16.mxu1 %vm633_vm0, %v1745_v39 }
  0x4e   : > { %755 = vmatmul.mubr.bf16.gmra.mrb[20].mxu0 %v1746_v40  ;;  %1644 = vmatmul.mubr.msk.bf16.gmra.mrb[20].mxu1 %vm633_vm0, %v1747_v41 }
  0x4f   : > { %762 = vmatprep.mubr.bf16.mxu0 %v1748_v42  ;;  %1647 = vmatprep.mubr.msk.bf16.mxu1 %vm633_vm0, %v1750_v43 }
  0x56   : > { %763 = vmatmul.mubr.bf16.gmra.mrb[24].mxu0 %v1751_v44  ;;  %1648 = vmatmul.mubr.msk.bf16.gmra.mrb[24].mxu1 %vm633_vm0, %v1752_v45 }
  0x57   : > { %770 = vmatprep.mubr.bf16.mxu0 %v1753_v46  ;;  %1651 = vmatprep.mubr.msk.bf16.mxu1 %vm633_vm0, %v1755_v47 }
  0x5e   : > { %771 = vmatmul.mubr.bf16.gmra.mrb[28].mxu0 %v1756_v48  ;;  %1652 = vmatmul.mubr.msk.bf16.gmra.mrb[28].mxu1 %vm633_vm0, %v1757_v49 }
  0x5f   : > { %778 = vmatprep.mubr.bf16.mxu0 %v1758_v50  ;;  %1655 = vmatprep.mubr.msk.bf16.mxu1 %vm633_vm0, %v1760_v51  ;;  %v1959_v50 = vld [vmem:[%s2034_s2] ss:$0 sm:$0xff] }
  0x66   : > { %779 = vmatmul.mubr.bf16.gmra.mrb[32].mxu0 %v1761_v52  ;;  %1656 = vmatmul.mubr.msk.bf16.gmra.mrb[32].mxu1 %vm633_vm0, %v1762_v53 }
  0x67   : > { %786 = vmatprep.mubr.bf16.mxu0 %v1763_v54  ;;  %1659 = vmatprep.mubr.msk.bf16.mxu1 %vm633_vm0, %v1765_v55 }
  0x6e   : > { %787 = vmatmul.mubr.bf16.gmra.mrb[36].mxu0 %v1766_v56  ;;  %1660 = vmatmul.mubr.msk.bf16.gmra.mrb[36].mxu1 %vm633_vm0, %v1767_v57 }
  0x6f   : > { %794 = vmatprep.mubr.bf16.mxu0 %v1768_v58  ;;  %1663 = vmatprep.mubr.msk.bf16.mxu1 %vm633_vm0, %v1770_v59 }
  0x76   : > { %795 = vmatmul.mubr.bf16.gmra.mrb[40].mxu0 %v1771_v60  ;;  %1664 = vmatmul.mubr.msk.bf16.gmra.mrb[40].mxu1 %vm633_vm0, %v1772_v61 }
  0x77   : > { %802 = vmatprep.mubr.bf16.mxu0 %v1773_v62  ;;  %1667 = vmatprep.mubr.msk.bf16.mxu1 %vm633_vm0, %v1775_v63 }
  0x7e   : > { %803 = vmatmul.mubr.bf16.gmra.mrb[44].mxu0 %v1776_v0  ;;  %1668 = vmatmul.mubr.msk.bf16.gmra.mrb[44].mxu1 %vm633_vm0, %v1777_v1 }
  0xf9   : > { %v1521_v2 = vpop.f32.mrb[0].mxu0  ;;  %v1593_v3 = vpop.f32.mrb[0].mxu1 }
  0xfa   : > { %v1522_v4 = vpop.f32.mrb[1].mxu0  ;;  %v1594_v5 = vpop.f32.mrb[1].mxu1 }
  0xfb   : > { %v1523_v6 = vadd.f32 %v1522_v4, %v1521_v2  ;;  %v1524_v7 = vpop.f32.mrb[2].mxu0  ;;  %v1940_v8 = vadd.f32 %v1594_v5, %v1593_v3  ;;  %v1596_v9 = vpop.f32.mrb[2].mxu1 }
  0xfc   : > { %v1525_v10 = vpop.f32.mrb[3].mxu0  ;;  %v1597_v11 = vpop.f32.mrb[3].mxu1 }
  0xfd   : > { %v1526_v12 = vadd.f32 %v1525_v10, %v1524_v7  ;;  %v1942_v13 = vadd.f32 %v1597_v11, %v1596_v9  ;;  %v717_v54 = vadd.f32 %v1523_v6, %v1959_v50 }
  0xff   : > { %v720_v63 = vadd.f32 %v1526_v12, %v1959_v50 }
 0x101   : > { %v1527_v14 = vpop.f32.mrb[4].mxu0  ;;  %v1599_v15 = vpop.f32.mrb[4].mxu1 }
 0x102   : > { %v1528_v16 = vpop.f32.mrb[5].mxu0  ;;  %v1600_v17 = vpop.f32.mrb[5].mxu1 }
 0x103   : > { %v1529_v18 = vadd.f32 %v1528_v16, %v1527_v14  ;;  %v1530_v19 = vpop.f32.mrb[6].mxu0  ;;  %v1944_v20 = vadd.f32 %v1600_v17, %v1599_v15  ;;  %v1602_v21 = vpop.f32.mrb[6].mxu1 }
 0x104   : > { %v1531_v22 = vpop.f32.mrb[7].mxu0  ;;  %v1603_v23 = vpop.f32.mrb[7].mxu1 }
 0x105   : > { %v1532_v24 = vadd.f32 %v1531_v22, %v1530_v19  ;;  %v1946_v25 = vadd.f32 %v1603_v23, %v1602_v21  ;;  %v725_v51 = vadd.f32 %v1529_v18, %v1959_v50 }
 0x107   : > { %v728_v58 = vadd.f32 %v1532_v24, %v1959_v50 }
 0x109   : > { %v1533_v26 = vpop.f32.mrb[8].mxu0  ;;  %v1605_v27 = vpop.f32.mrb[8].mxu1 }
 0x10a   : > { %v1534_v28 = vpop.f32.mrb[9].mxu0  ;;  %v1606_v29 = vpop.f32.mrb[9].mxu1 }
 0x10b   : > { %v1535_v30 = vadd.f32 %v1534_v28, %v1533_v26  ;;  %v1536_v31 = vpop.f32.mrb[10].mxu0  ;;  %v1948_v32 = vadd.f32 %v1606_v29, %v1605_v27  ;;  %v1608_v33 = vpop.f32.mrb[10].mxu1 }
 0x10c   : > { %v1537_v34 = vpop.f32.mrb[11].mxu0  ;;  %v1609_v35 = vpop.f32.mrb[11].mxu1 }
 0x10d   : > { %v1538_v36 = vadd.f32 %v1537_v34, %v1536_v31  ;;  %v1950_v37 = vadd.f32 %v1609_v35, %v1608_v33  ;;  %v733_v16 = vadd.f32 %v1535_v30, %v1959_v50 }
 0x10f   : > { %v736_v27 = vadd.f32 %v1538_v36, %v1959_v50 }
 0x111   : > { %v1539_v38 = vpop.f32.mrb[12].mxu0  ;;  %v1611_v39 = vpop.f32.mrb[12].mxu1 }
 0x112   : > { %v1540_v40 = vpop.f32.mrb[13].mxu0  ;;  %v1612_v41 = vpop.f32.mrb[13].mxu1 }
 0x113   : > { %v1541_v42 = vadd.f32 %v1540_v40, %v1539_v38  ;;  %v1542_v43 = vpop.f32.mrb[14].mxu0  ;;  %v1952_v44 = vadd.f32 %v1612_v41, %v1611_v39  ;;  %v1614_v45 = vpop.f32.mrb[14].mxu1 }
 0x114   : > { %v1543_v46 = vpop.f32.mrb[15].mxu0  ;;  %v1615_v47 = vpop.f32.mrb[15].mxu1 }
 0x115   : > { %v1544_v48 = vadd.f32 %v1543_v46, %v1542_v43  ;;  %v1954_v49 = vadd.f32 %v1615_v47, %v1614_v45  ;;  %v741_v11 = vadd.f32 %v1541_v42, %v1959_v50 }
 0x117   : > { %v744_v21 = vadd.f32 %v1544_v48, %v1959_v50 }
 0x119   : > { %v1545_v52 = vpop.f32.mrb[16].mxu0  ;;  %v1641_v53 = vpop.f32.mrb[16].mxu1 }
 0x11a   : > { %v886_v55 = vadd.f32 %v1641_v53, %v725_v51  ;;  %v1546_v56 = vpop.f32.mrb[17].mxu0  ;;  %v877_v57 = vpop.f32.mrb[17].mxu1 }
 0x11b   : > { %v1547_v59 = vadd.f32 %v1546_v56, %v1545_v52  ;;  %v878_v60 = vadd.f32 %v877_v57, %v717_v54  ;;  %v1548_v61 = vpop.f32.mrb[18].mxu0  ;;  %v1642_v62 = vpop.f32.mrb[18].mxu1 }
 0x11c   : > { %v889_v0 = vadd.f32 %v1642_v62, %v728_v58  ;;  %v1549_v1 = vpop.f32.mrb[19].mxu0  ;;  %v880_v2 = vpop.f32.mrb[19].mxu1  ;;  %v1006_v5 = vmax.f32 %v886_v55, 0.0 }
 0x11d   : > { %v1550_v3 = vadd.f32 %v1549_v1, %v1548_v61  ;;  %v881_v4 = vadd.f32 %v880_v2, %v720_v63  ;;  %v1004_v6 = vmax.f32 %v878_v60, 0.0  ;;  %v749_v46 = vadd.f32 %v1547_v59, %v1959_v50 }
 0x11e   : > { %v1007_v7 = vmax.f32 %v889_v0, 0.0 }
 0x11f   : > { %v1005_v9 = vmax.f32 %v881_v4, 0.0  ;;  %v752_v56 = vadd.f32 %v1550_v3, %v1959_v50 }
 0x120   : > { %v1418_v10 = vpack.c.bf16 %v1007_v7, %v1006_v5 }
 0x121   : > { %v1413_v12 = vpack.c.bf16 %v1005_v9, %v1004_v6  ;;  %v1551_v14 = vpop.f32.mrb[20].mxu0  ;;  %v1645_v15 = vpop.f32.mrb[20].mxu1 }
 0x122   : > { %1490 = vst [vmem:[%s1969_s8 + $0x8] sm:$0xff] %v1418_v10   ;;  %v902_v17 = vadd.f32 %v1645_v15, %v741_v11  ;;  %v1552_v18 = vpop.f32.mrb[21].mxu0  ;;  %v893_v19 = vpop.f32.mrb[21].mxu1 }
 0x123   : > { %1414 = vst [vmem:[%s1969_s8] sm:$0xff] %v1413_v12   ;;  %v1553_v22 = vadd.f32 %v1552_v18, %v1551_v14  ;;  %v894_v23 = vadd.f32 %v893_v19, %v733_v16  ;;  %v1554_v24 = vpop.f32.mrb[22].mxu0  ;;  %v1646_v26 = vpop.f32.mrb[22].mxu1 }
 0x124   : > { %v905_v28 = vadd.f32 %v1646_v26, %v744_v21  ;;  %v1555_v29 = vpop.f32.mrb[23].mxu0  ;;  %v896_v31 = vpop.f32.mrb[23].mxu1  ;;  %v1010_v30 = vmax.f32 %v902_v17, 0.0 }
 0x125   : > { %v1556_v33 = vadd.f32 %v1555_v29, %v1554_v24  ;;  %v897_v34 = vadd.f32 %v896_v31, %v736_v27  ;;  %v1008_v38 = vmax.f32 %v894_v23, 0.0  ;;  %v757_v41 = vadd.f32 %v1553_v22, %v1959_v50 }
 0x126   : > { %v1011_v35 = vmax.f32 %v905_v28, 0.0 }
 0x127   : > { %v1009_v39 = vmax.f32 %v897_v34, 0.0  ;;  %v760_v51 = vadd.f32 %v1556_v33, %v1959_v50 }
 0x128   : > { %v1428_v40 = vpack.c.bf16 %v1011_v35, %v1010_v30 }
 0x129   : > { %v1423_v42 = vpack.c.bf16 %v1009_v39, %v1008_v38  ;;  %v1557_v43 = vpop.f32.mrb[24].mxu0  ;;  %v1649_v45 = vpop.f32.mrb[24].mxu1 }
 0x12a   : > { %1492 = vst [vmem:[%s1969_s8 + $0x18] sm:$0xff] %v1428_v40   ;;  %v918_v36 = vadd.f32 %v1649_v45, %v757_v41  ;;  %v1558_v47 = vpop.f32.mrb[25].mxu0  ;;  %v909_v48 = vpop.f32.mrb[25].mxu1 }
 0x12b   : > { %1491 = vst [vmem:[%s1969_s8 + $0x10] sm:$0xff] %v1423_v42   ;;  %v1559_v52 = vadd.f32 %v1558_v47, %v1557_v43  ;;  %v910_v53 = vadd.f32 %v909_v48, %v749_v46  ;;  %v1560_v54 = vpop.f32.mrb[26].mxu0  ;;  %v1650_v55 = vpop.f32.mrb[26].mxu1 }
 0x12c   : > { %v921_v57 = vadd.f32 %v1650_v55, %v760_v51  ;;  %v1561_v58 = vpop.f32.mrb[27].mxu0  ;;  %v912_v60 = vpop.f32.mrb[27].mxu1  ;;  %v1014_v62 = vmax.f32 %v918_v36, 0.0 }
 0x12d   : > { %v1562_v61 = vadd.f32 %v1561_v58, %v1560_v54  ;;  %v913_v59 = vadd.f32 %v912_v60, %v752_v56  ;;  %v1012_v0 = vmax.f32 %v910_v53, 0.0  ;;  %v765_v6 = vadd.f32 %v1559_v52, %v1959_v50 }
 0x12e   : > { %v1015_v63 = vmax.f32 %v921_v57, 0.0 }
 0x12f   : > { %v1013_v1 = vmax.f32 %v913_v59, 0.0  ;;  %v768_v15 = vadd.f32 %v1562_v61, %v1959_v50 }
 0x130   : > { %v1438_v2 = vpack.c.bf16 %v1015_v63, %v1014_v62 }
 0x131   : > { %v1433_v4 = vpack.c.bf16 %v1013_v1, %v1012_v0  ;;  %v1563_v5 = vpop.f32.mrb[28].mxu0  ;;  %v1653_v7 = vpop.f32.mrb[28].mxu1 }
 0x132   : > { %1494 = vst [vmem:[%s1969_s8 + $0x28] sm:$0xff] %v1438_v2   ;;  %v1564_v9 = vpop.f32.mrb[29].mxu0  ;;  %v925_v10 = vpop.f32.mrb[29].mxu1 }
 0x133   : > { %1493 = vst [vmem:[%s1969_s8 + $0x20] sm:$0xff] %v1433_v4   ;;  %v1565_v3 = vadd.f32 %v1564_v9, %v1563_v5  ;;  %v926_v11 = vadd.f32 %v925_v10, %v765_v6  ;;  %v1566_v12 = vpop.f32.mrb[30].mxu0  ;;  %v1654_v14 = vpop.f32.mrb[30].mxu1  ;;  %v821_v4 = vadd.f32 %v1944_v20, %v1959_v50  ;;  %v813_v9 = vadd.f32 %v1940_v8, %v1959_v50 }
 0x134   : > { %v1567_v16 = vpop.f32.mrb[31].mxu0  ;;  %v928_v17 = vpop.f32.mrb[31].mxu1 }
 0x135   : > { %v773_v18 = vadd.f32 %v1565_v3, %v1959_v50  ;;  %v1568_v19 = vadd.f32 %v1567_v16, %v1566_v12  ;;  %v929_v21 = vadd.f32 %v928_v17, %v768_v15  ;;  %v1016_v23 = vmax.f32 %v926_v11, 0.0 }
 0x136   : > { %v824_v12 = vadd.f32 %v1946_v25, %v1959_v50 }
 0x137   : > { %v934_v22 = vadd.f32 %v1653_v7, %v773_v18  ;;  %v776_v24 = vadd.f32 %v1568_v19, %v1959_v50  ;;  %v1017_v26 = vmax.f32 %v929_v21, 0.0 }
 0x139   : > { %v937_v27 = vadd.f32 %v1654_v14, %v776_v24  ;;  %v1443_v28 = vpack.c.bf16 %v1017_v26, %v1016_v23  ;;  %v1569_v29 = vpop.f32.mrb[32].mxu0  ;;  %v1657_v31 = vpop.f32.mrb[32].mxu1  ;;  %v1018_v30 = vmax.f32 %v934_v22, 0.0  ;;  %v816_v22 = vadd.f32 %v1942_v13, %v1959_v50 }
 0x13a   : > { %v1570_v33 = vpop.f32.mrb[33].mxu0  ;;  %v941_v34 = vpop.f32.mrb[33].mxu1 }
 0x13b   : > { %v1019_v35 = vmax.f32 %v937_v27, 0.0  ;;  %1495 = vst [vmem:[%s1969_s8 + $0x30] sm:$0xff] %v1443_v28   ;;  %v1571_v38 = vadd.f32 %v1570_v33, %v1569_v29  ;;  %v1572_v39 = vpop.f32.mrb[34].mxu0  ;;  %v1658_v40 = vpop.f32.mrb[34].mxu1 }
 0x13c   : > { %v1573_v41 = vpop.f32.mrb[35].mxu0  ;;  %v944_v42 = vpop.f32.mrb[35].mxu1 }
 0x13d   : > { %v1448_v43 = vpack.c.bf16 %v1019_v35, %v1018_v30  ;;  %v781_v45 = vadd.f32 %v1571_v38, %v1959_v50  ;;  %v1574_v46 = vadd.f32 %v1573_v41, %v1572_v39  ;;  %v837_v35 = vadd.f32 %v1952_v44, %v1959_v50 }
 0x13f   : > { %1496 = vst [vmem:[%s1969_s8 + $0x38] sm:$0xff] %v1448_v43   ;;  %v942_v36 = vadd.f32 %v941_v34, %v781_v45  ;;  %v784_v47 = vadd.f32 %v1574_v46, %v1959_v50  ;;  %v840_v46 = vadd.f32 %v1954_v49, %v1959_v50 }
 0x141   : > { %v945_v48 = vadd.f32 %v944_v42, %v784_v47  ;;  %v1575_v51 = vpop.f32.mrb[36].mxu0  ;;  %v1993_v52 = vpop.f32.mrb[36].mxu1  ;;  %v1020_v55 = vmax.f32 %v942_v36, 0.0 }
 0x142   : > { %v1576_v53 = vpop.f32.mrb[37].mxu0  ;;  %v957_v54 = vpop.f32.mrb[37].mxu1 }
 0x143   : > { %v1021_v56 = vmax.f32 %v945_v48, 0.0  ;;  %v1577_v57 = vadd.f32 %v1576_v53, %v1575_v51  ;;  %v1578_v58 = vpop.f32.mrb[38].mxu0  ;;  %v1995_v60 = vpop.f32.mrb[38].mxu1 }
 0x144   : > { %v1579_v61 = vpop.f32.mrb[39].mxu0  ;;  %v960_v59 = vpop.f32.mrb[39].mxu1 }
 0x145   : > { %v1453_v62 = vpack.c.bf16 %v1021_v56, %v1020_v55  ;;  %v789_v63 = vadd.f32 %v1577_v57, %v1959_v50  ;;  %v1580_v0 = vadd.f32 %v1579_v61, %v1578_v58 }
 0x147   : > { %1497 = vst [vmem:[%s1969_s8 + $0x40] sm:$0xff] %v1453_v62   ;;  %v950_v1 = vadd.f32 %v1657_v31, %v789_v63  ;;  %v792_v2 = vadd.f32 %v1580_v0, %v1959_v50 }
 0x149   : > { %v953_v5 = vadd.f32 %v1658_v40, %v792_v2  ;;  %v1581_v7 = vpop.f32.mrb[40].mxu0  ;;  %v1665_v6 = vpop.f32.mrb[40].mxu1  ;;  %v1022_v14 = vmax.f32 %v950_v1, 0.0  ;;  %v829_v40 = vadd.f32 %v1948_v32, %v1959_v50  ;;  %v832_v32 = vadd.f32 %v1950_v37, %v1959_v50 }
 0x14a   : > { %v982_v10 = vadd.f32 %v1665_v6, %v821_v4  ;;  %v1582_v3 = vpop.f32.mrb[41].mxu0  ;;  %v973_v11 = vpop.f32.mrb[41].mxu1 }
 0x14b   : > { %v1023_v15 = vmax.f32 %v953_v5, 0.0  ;;  %v1583_v16 = vadd.f32 %v1582_v3, %v1581_v7  ;;  %v974_v17 = vadd.f32 %v973_v11, %v813_v9  ;;  %v1584_v18 = vpop.f32.mrb[42].mxu0  ;;  %v1666_v19 = vpop.f32.mrb[42].mxu1 }
 0x14c   : > { %v985_v20 = vadd.f32 %v1666_v19, %v824_v12  ;;  %v1585_v21 = vpop.f32.mrb[43].mxu0  ;;  %v976_v23 = vpop.f32.mrb[43].mxu1  ;;  %v1030_v27 = vmax.f32 %v982_v10, 0.0 }
 0x14d   : > { %v1458_v8 = vpack.c.bf16 %v1023_v15, %v1022_v14  ;;  %v797_v24 = vadd.f32 %v1583_v16, %v1959_v50  ;;  %v1586_v26 = vadd.f32 %v1585_v21, %v1584_v18  ;;  %v977_v28 = vadd.f32 %v976_v23, %v816_v22 }
 0x14e   : > { %v1031_v25 = vmax.f32 %v985_v20, 0.0  ;;  %v1028_v33 = vmax.f32 %v974_v17, 0.0 }
 0x14f   : > { %1498 = vst [vmem:[%s1969_s8 + $0x48] sm:$0xff] %v1458_v8   ;;  %v958_v29 = vadd.f32 %v957_v54, %v797_v24  ;;  %v800_v31 = vadd.f32 %v1586_v26, %v1959_v50  ;;  %v1029_v30 = vmax.f32 %v977_v28, 0.0 }
 0x150   : > { %v1478_v34 = vpack.c.bf16 %v1031_v25, %v1030_v27 }
 0x151   : > { %v961_v13 = vadd.f32 %v960_v59, %v800_v31  ;;  %v1587_v38 = vpop.f32.mrb[44].mxu0  ;;  %v1669_v39 = vpop.f32.mrb[44].mxu1  ;;  %v1473_v41 = vpack.c.bf16 %v1029_v30, %v1028_v33  ;;  %v1024_v36 = vmax.f32 %v958_v29, 0.0 }
 0x152   : > { %1502 = vst [vmem:[%s1969_s8 + $0x68] sm:$0xff] %v1478_v34   ;;  %v998_v42 = vadd.f32 %v1669_v39, %v837_v35  ;;  %v1588_v43 = vpop.f32.mrb[45].mxu0  ;;  %v989_v45 = vpop.f32.mrb[45].mxu1 }
 0x153   : > { %v1025_v47 = vmax.f32 %v961_v13, 0.0  ;;  %v1589_v48 = vadd.f32 %v1588_v43, %v1587_v38  ;;  %v990_v44 = vadd.f32 %v989_v45, %v829_v40  ;;  %v1590_v51 = vpop.f32.mrb[46].mxu0  ;;  %v1670_v53 = vpop.f32.mrb[46].mxu1  ;;  %1501 = vst [vmem:[%s1969_s8 + $0x60] sm:$0xff] %v1473_v41  }
 0x154   : > { %v1001_v54 = vadd.f32 %v1670_v53, %v840_v46  ;;  %v1591_v55 = vpop.f32.mrb[47].mxu0  ;;  %v992_v56 = vpop.f32.mrb[47].mxu1  ;;  %v1034_v61 = vmax.f32 %v998_v42, 0.0 }
 0x155   : > { %v1463_v57 = vpack.c.bf16 %v1025_v47, %v1024_v36  ;;  %v805_v58 = vadd.f32 %v1589_v48, %v1959_v50  ;;  %v1592_v49 = vadd.f32 %v1591_v55, %v1590_v51  ;;  %v993_v62 = vadd.f32 %v992_v56, %v832_v32 }
 0x156   : > { %v1035_v59 = vmax.f32 %v1001_v54, 0.0  ;;  %v1032_v1 = vmax.f32 %v990_v44, 0.0 }
 0x157   : > { %1499 = vst [vmem:[%s1969_s8 + $0x50] sm:$0xff] %v1463_v57   ;;  %v966_v63 = vadd.f32 %v1993_v52, %v805_v58  ;;  %v808_v0 = vadd.f32 %v1592_v49, %v1959_v50  ;;  %v1033_v4 = vmax.f32 %v993_v62, 0.0 }
 0x158   : > { %v1488_v2 = vpack.c.bf16 %v1035_v59, %v1034_v61 }
 0x159   : > { %v969_v37 = vadd.f32 %v1995_v60, %v808_v0  ;;  %v1483_v5 = vpack.c.bf16 %v1033_v4, %v1032_v1  ;;  %v1026_v7 = vmax.f32 %v966_v63, 0.0 }
 0x15a   : > { %1504 = vst [vmem:[%s1969_s8 + $0x78] sm:$0xff] %v1488_v2  }
 0x15b   : > { %v1027_v6 = vmax.f32 %v969_v37, 0.0  ;;  %1503 = vst [vmem:[%s1969_s8 + $0x70] sm:$0xff] %v1483_v5  }
 0x15d   : > { %v1468_v9 = vpack.c.bf16 %v1027_v6, %v1026_v7 }
 0x15f   : > { %1500 = vst [vmem:[%s1969_s8 + $0x58] sm:$0xff] %v1468_v9  }
 0x160 PF: > { %s13_s12 = sadd.s32 1, %s1784_s12  }
 0x161   : > { %p10_p4 = scmp.ge.s32.totalorder %s13_s12, 4  }
 0x163   :  { %12 = sbr.rel (!%p10_p4) target bundleno = 1 (0x1), region = 62 }

// kernel: forward.8
= control target key start
LH: loop header
LB: loop body
LE: loop exit
PB: predicated region body
PF: predicated region fallthrough
CT: control target
= control target key end

     0   :  { %vm321_vm0 = vcmask 261120   ;;  %v558_v54 = vlaneseq  ;;  %s1247_s1 = inlined_call_operand.vmem [shape: bf16[288,128], index: 1, kind: input, shape index: {}]   ;;  %s1248_s0 = inlined_call_operand.vmem [shape: bf16[128,288], index: 0, kind: input, shape index: {}]   ;;  %s1249_s3 = inlined_call_operand.vmem [shape: f32[1,128], index: 3, kind: input, shape index: {}]   ;;  %s1250_s2 = inlined_call_operand.vmem [shape: f32[1,128], index: 2, kind: input, shape index: {}]   ;;  %s1251_s4 = inlined_call_operand.vmem [shape: bf16[128,128], index: 4, kind: output, shape index: {}]  }
   0x1   :  { %v942_v0 = vld [vmem:[%s1247_s1 + $0x40] sm:$0xff]   ;;  %v944_v2 = vld [vmem:[%s1247_s1 + $0x48] sm:$0xff]   ;;  %v946_v4 = vld [vmem:[%s1247_s1 + $0x50] sm:$0xff]  }
   0x2   :  { %v943_v1 = vld [vmem:[%s1247_s1] sm:$0xff]   ;;  %832 = vmatprep.subr.bf16.mxu0 %v942_v0  ;;  %926 = vmatprep.subr.bf16.mxu1 %v942_v0  ;;  %v945_v3 = vld [vmem:[%s1247_s1 + $0x8] sm:$0xff]   ;;  %v947_v5 = vld [vmem:[%s1247_s1 + $0x10] sm:$0xff]  }
   0x3   :  { %833 = vmatpush3.bf16.msra.mxu0 %v943_v1  ;;  %934 = vmatpush3.bf16.msra.mxu1 %v943_v1  ;;  %v948_v6 = vld [vmem:[%s1247_s1 + $0x58] sm:$0xff]   ;;  %v950_v8 = vld [vmem:[%s1247_s1 + $0x60] sm:$0xff]   ;;  %v952_v10 = vld [vmem:[%s1247_s1 + $0x68] sm:$0xff]   ;;  %v559_v1 = vshrl.u32 %v558_v54, 7 }
   0x4   :  { %834 = vmatprep.subr.bf16.mxu0 %v944_v2  ;;  %927 = vmatprep.subr.bf16.mxu1 %v944_v2  ;;  %v949_v7 = vld [vmem:[%s1247_s1 + $0x18] sm:$0xff]   ;;  %v951_v9 = vld [vmem:[%s1247_s1 + $0x20] sm:$0xff]   ;;  %v953_v13 = vld [vmem:[%s1247_s1 + $0x28] sm:$0xff]  }
   0x5   :  { %v960_v11 = vld [vmem:[%s1248_s0 + $0x4] ss:$12 sps:$4 sm:$0xff]   ;;  %v963_v12 = vld [vmem:[%s1248_s0 + $0x94] ss:$12 sps:$4 sm:$0xff]   ;;  %v956_v16 = vld [vmem:[%s1247_s1 + $0x78] sm:$0xff]  }
   0x6   :  { %v954_v14 = vld [vmem:[%s1247_s1 + $0x70] sm:$0xff]   ;;  %378 = vmatprep.mubr.bf16.mxu0 %v960_v11  ;;  %426 = vmatprep.mubr.bf16.mxu1 %v963_v12  ;;  %v957_v17 = vld [vmem:[%s1247_s1 + $0x38] sm:$0xff]   ;;  %v958_v18 = vld [vmem:[%s1248_s0] ss:$12 sps:$4 sm:$0xff]  }
   0x7   :  { %835 = vmatpush3.bf16.msra.mxu0 %v945_v3  ;;  %935 = vmatpush3.bf16.msra.mxu1 %v945_v3  ;;  %v955_v15 = vld [vmem:[%s1247_s1 + $0x30] sm:$0xff]   ;;  %v964_v19 = vld [vmem:[%s1247_s1 + $0x80] sm:$0xff]   ;;  %v965_v21 = vld [vmem:[%s1248_s0 + $0x1c] ss:$12 sps:$4 sm:$0xff]  }
   0x8   :  { %836 = vmatprep.subr.bf16.mxu0 %v946_v4  ;;  %928 = vmatprep.subr.bf16.mxu1 %v946_v4  ;;  %v961_v20 = vld [vmem:[%s1248_s0 + $0x90] ss:$12 sps:$4 sm:$0xff]   ;;  %v967_v22 = vld [vmem:[%s1248_s0 + $0xac] ss:$12 sps:$4 sm:$0xff]   ;;  %v970_v25 = vld [vmem:[%s1248_s0 + $0xa8] ss:$12 sps:$4 sm:$0xff]  }
   0x9   :  { %v971_v23 = vld [vmem:[%s1247_s1 + $0x88] sm:$0xff]   ;;  %v969_v24 = vld [vmem:[%s1248_s0 + $0x18] ss:$12 sps:$4 sm:$0xff]   ;;  %v972_v26 = vld [vmem:[%s1248_s0 + $0x34] ss:$12 sps:$4 sm:$0xff]  }
   0xa   :  { %v974_v27 = vld [vmem:[%s1248_s0 + $0x8] ss:$12 sps:$4 sm:$0xff]   ;;  %v975_v28 = vld [vmem:[%s1248_s0 + $0x30] ss:$12 sps:$4 sm:$0xff]   ;;  %v976_v29 = vld [vmem:[%s1248_s0 + $0x20] ss:$12 sps:$4 sm:$0xff]  }
   0xb   :  { %837 = vmatpush3.bf16.msra.mxu0 %v947_v5  ;;  %936 = vmatpush3.bf16.msra.mxu1 %v947_v5  ;;  %v977_v30 = vld [vmem:[%s1248_s0 + $0x4c] ss:$12 sps:$4 sm:$0xff]   ;;  %v980_v32 = vld [vmem:[%s1248_s0 + $0x48] ss:$12 sps:$4 sm:$0xff]   ;;  %v981_v33 = vld [vmem:[%s1248_s0 + $0x50] ss:$12 sps:$4 sm:$0xff]  }
   0xc   :  { %838 = vmatprep.subr.bf16.mxu0 %v948_v6  ;;  %929 = vmatprep.subr.bf16.mxu1 %v948_v6  ;;  %v979_v31 = vld [vmem:[%s1248_s0 + $0x38] ss:$12 sps:$4 sm:$0xff]   ;;  %v984_v35 = vld [vmem:[%s1248_s0 + $0x68] ss:$12 sps:$4 sm:$0xff]   ;;  %v985_v36 = vld [vmem:[%s1248_s0 + $0x60] ss:$12 sps:$4 sm:$0xff]  }
   0xd   :  { %v982_v34 = vld [vmem:[%s1248_s0 + $0x64] ss:$12 sps:$4 sm:$0xff]   ;;  %v986_v37 = vld [vmem:[%s1248_s0 + $0x80] ss:$12 sps:$4 sm:$0xff]   ;;  %v987_v38 = vld [vmem:[%s1248_s0 + $0x7c] ss:$12 sps:$4 sm:$0xff]  }
   0xe   :  { %v989_v39 = vld [vmem:[%s1248_s0 + $0x98] ss:$12 sps:$4 sm:$0xff]   ;;  %v991_v41 = vld [vmem:[%s1248_s0 + $0xb0] ss:$12 sps:$4 sm:$0xff]   ;;  %v540_v4 = vld [vmem:[%s1249_s3] sm:$0x1] }
   0xf   :  { %839 = vmatpush3.bf16.msra.mxu0 %v949_v7  ;;  %937 = vmatpush3.bf16.msra.mxu1 %v949_v7  ;;  %v990_v40 = vld [vmem:[%s1248_s0 + $0x78] ss:$12 sps:$4 sm:$0xff]   ;;  %v1165_v5 = vld [vmem:[%s1250_s2] ss:$0 sm:$0xff]  ;;  %v560_v7 = vsub.s32 0, %v559_v1 }
  0x10   :  { %840 = vmatprep.subr.bf16.mxu0 %v950_v8  ;;  %930 = vmatprep.subr.bf16.mxu1 %v950_v8  ;;  %v579_v8 = vsub.f32 1.0, %v540_v4 }
  0x13   :  { %841 = vmatpush3.bf16.msra.mxu0 %v951_v9  ;;  %938 = vmatpush3.bf16.msra.mxu1 %v951_v9 }
  0x14   :  { %842 = vmatprep.subr.bf16.mxu0 %v952_v10  ;;  %931 = vmatprep.subr.bf16.mxu1 %v952_v10 }
  0x17   :  { %843 = vmatpush3.bf16.msra.mxu0 %v953_v13  ;;  %939 = vmatpush3.bf16.msra.mxu1 %v953_v13  ;;  %v1169_v13 = vrot.slane %v540_v4, %v560_v7 }
  0x18   :  { %844 = vmatprep.subr.bf16.mxu0 %v954_v14  ;;  %932 = vmatprep.subr.bf16.mxu1 %v954_v14 }
  0x1b   :  { %845 = vmatpush3.bf16.msra.mxu0 %v955_v15  ;;  %940 = vmatpush3.bf16.msra.mxu1 %v955_v15 }
  0x1c   :  { %846 = vmatprep.subr.bf16.mxu0 %v956_v16  ;;  %933 = vmatprep.subr.bf16.mxu1 %v956_v16 }
  0x1f   :  { %847 = vmatpush3.bf16.msra.mxu0 %v957_v17  ;;  %941 = vmatpush3.bf16.msra.mxu1 %v957_v17 }
  0x20   :  { %906 = vmatprep.subr.bf16.mxu1 %v964_v19 }
  0x22   :  { %379 = vmatmul.mubr.bf16.vlgmr.msra.gmra.mrb[0].mxu0 %v958_v18  ;;  %427 = vmatmul.mubr.bf16.vlgmr.msra.gmra.mrb[0].mxu1 %v961_v20 }
  0x23   :  { %907 = vmatpush3.bf16.msra.mxu1 %v964_v19  ;;  %386 = vmatprep.mubr.bf16.mxu0 %v965_v21 }
  0x24   :  { %434 = vmatprep.mubr.bf16.mxu1 %v967_v22  ;;  %908 = vmatprep.subr.bf16.mxu1 %v971_v23 }
  0x27   :  { %909 = vmatpush3.bf16.msra.mxu1 %v971_v23  ;;  %v1173_v23 = vrot.slane %v579_v8, %v560_v7 }
  0x2a   :  { %387 = vmatmul.mubr.bf16.gmra.mrb[4].mxu0 %v969_v24  ;;  %435 = vmatmul.mubr.bf16.gmra.mrb[4].mxu1 %v970_v25 }
  0x2b   :  { %394 = vmatprep.mubr.bf16.mxu0 %v972_v26  ;;  %910 = vmatprep.mubr.msk.bf16.mxu1 %vm321_vm0, %v974_v27 }
  0x32   :  { %395 = vmatmul.mubr.bf16.gmra.mrb[8].mxu0 %v975_v28  ;;  %911 = vmatmul.mubr.msk.bf16.vlgmr.msra.gmra.mrb[8].mxu1 %vm321_vm0, %v976_v29 }
  0x33   :  { %402 = vmatprep.mubr.bf16.mxu0 %v977_v30  ;;  %914 = vmatprep.mubr.msk.bf16.mxu1 %vm321_vm0, %v979_v31 }
  0x3a   :  { %403 = vmatmul.mubr.bf16.gmra.mrb[12].mxu0 %v980_v32  ;;  %915 = vmatmul.mubr.msk.bf16.gmra.mrb[12].mxu1 %vm321_vm0, %v981_v33 }
  0x3b   :  { %410 = vmatprep.mubr.bf16.mxu0 %v982_v34  ;;  %918 = vmatprep.mubr.msk.bf16.mxu1 %vm321_vm0, %v984_v35 }
  0x42   :  { %411 = vmatmul.mubr.bf16.gmra.mrb[16].mxu0 %v985_v36  ;;  %919 = vmatmul.mubr.msk.bf16.gmra.mrb[16].mxu1 %vm321_vm0, %v986_v37 }
  0x43   :  { %418 = vmatprep.mubr.bf16.mxu0 %v987_v38  ;;  %922 = vmatprep.mubr.msk.bf16.mxu1 %vm321_vm0, %v989_v39 }
  0x4a   :  { %419 = vmatmul.mubr.bf16.gmra.mrb[20].mxu0 %v990_v40  ;;  %923 = vmatmul.mubr.msk.bf16.gmra.mrb[20].mxu1 %vm321_vm0, %v991_v41 }
  0xf5   :  { %v848_v42 = vpop.f32.mrb[0].mxu0  ;;  %v884_v43 = vpop.f32.mrb[0].mxu1 }
  0xf6   :  { %v849_v44 = vpop.f32.mrb[1].mxu0  ;;  %v885_v45 = vpop.f32.mrb[1].mxu1 }
  0xf7   :  { %v850_v46 = vadd.f32 %v849_v44, %v848_v42  ;;  %v851_v47 = vpop.f32.mrb[2].mxu0  ;;  %v1151_v48 = vadd.f32 %v885_v45, %v884_v43  ;;  %v887_v49 = vpop.f32.mrb[2].mxu1 }
  0xf8   :  { %v852_v50 = vpop.f32.mrb[3].mxu0  ;;  %v888_v51 = vpop.f32.mrb[3].mxu1 }
  0xf9   :  { %v853_v52 = vadd.f32 %v852_v50, %v851_v47  ;;  %v1153_v53 = vadd.f32 %v888_v51, %v887_v49  ;;  %v381_v11 = vadd.f32 %v850_v46, %v1165_v5 }
  0xfb   :  { %v384_v21 = vadd.f32 %v853_v52, %v1165_v5 }
  0xfd   :  { %v854_v55 = vpop.f32.mrb[4].mxu0  ;;  %v890_v56 = vpop.f32.mrb[4].mxu1 }
  0xfe   :  { %v855_v57 = vpop.f32.mrb[5].mxu0  ;;  %v891_v58 = vpop.f32.mrb[5].mxu1 }
  0xff   :  { %v856_v59 = vadd.f32 %v855_v57, %v854_v55  ;;  %v857_v60 = vpop.f32.mrb[6].mxu0  ;;  %v1155_v61 = vadd.f32 %v891_v58, %v890_v56  ;;  %v893_v62 = vpop.f32.mrb[6].mxu1 }
 0x100   :  { %v858_v63 = vpop.f32.mrb[7].mxu0  ;;  %v894_v0 = vpop.f32.mrb[7].mxu1 }
 0x101   :  { %v859_v2 = vadd.f32 %v858_v63, %v857_v60  ;;  %v1157_v3 = vadd.f32 %v894_v0, %v893_v62  ;;  %v389_v6 = vadd.f32 %v856_v59, %v1165_v5 }
 0x103   :  { %v392_v16 = vadd.f32 %v859_v2, %v1165_v5 }
 0x105   :  { %v860_v9 = vpop.f32.mrb[8].mxu0  ;;  %v912_v10 = vpop.f32.mrb[8].mxu1 }
 0x106   :  { %v486_v12 = vadd.f32 %v912_v10, %v389_v6  ;;  %v861_v14 = vpop.f32.mrb[9].mxu0  ;;  %v477_v15 = vpop.f32.mrb[9].mxu1 }
 0x107   :  { %v862_v17 = vadd.f32 %v861_v14, %v860_v9  ;;  %v478_v18 = vadd.f32 %v477_v15, %v381_v11  ;;  %v863_v19 = vpop.f32.mrb[10].mxu0  ;;  %v913_v20 = vpop.f32.mrb[10].mxu1 }
 0x108   :  { %v543_v22 = vmax.f32 %v486_v12, 0.0  ;;  %v489_v24 = vadd.f32 %v913_v20, %v392_v16  ;;  %v864_v25 = vpop.f32.mrb[11].mxu0  ;;  %v480_v26 = vpop.f32.mrb[11].mxu1  ;;  %v588_v34 = vmul.f32 %v1173_v23, %v486_v12 }
 0x109   :  { %v541_v27 = vmax.f32 %v478_v18, 0.0  ;;  %v865_v28 = vadd.f32 %v864_v25, %v863_v19  ;;  %v481_v29 = vadd.f32 %v480_v26, %v384_v21  ;;  %v586_v37 = vmul.f32 %v1173_v23, %v478_v18 }
 0x10a   :  { %v565_v30 = vmul.f32 %v1169_v13, %v543_v22  ;;  %v544_v31 = vmax.f32 %v489_v24, 0.0  ;;  %v589_v36 = vmul.f32 %v1173_v23, %v489_v24  ;;  %v397_v42 = vadd.f32 %v862_v17, %v1165_v5 }
 0x10b   :  { %v563_v32 = vmul.f32 %v1169_v13, %v541_v27  ;;  %v542_v33 = vmax.f32 %v481_v29, 0.0  ;;  %v587_v39 = vmul.f32 %v1173_v23, %v481_v29  ;;  %v400_v57 = vadd.f32 %v865_v28, %v1165_v5 }
 0x10c   :  { %v566_v35 = vmul.f32 %v1169_v13, %v544_v31  ;;  %v604_v43 = vadd.f32 %v588_v34, %v565_v30 }
 0x10d   :  { %v564_v38 = vmul.f32 %v1169_v13, %v542_v33  ;;  %v866_v40 = vpop.f32.mrb[12].mxu0  ;;  %v916_v41 = vpop.f32.mrb[12].mxu1  ;;  %v602_v47 = vadd.f32 %v586_v37, %v563_v32  ;;  %v437_v37 = vadd.f32 %v1155_v61, %v1165_v5 }
 0x10e   :  { %v605_v44 = vadd.f32 %v589_v36, %v566_v35  ;;  %v867_v45 = vpop.f32.mrb[13].mxu0  ;;  %v493_v46 = vpop.f32.mrb[13].mxu1 }
 0x10f   :  { %v603_v49 = vadd.f32 %v587_v39, %v564_v38  ;;  %v868_v50 = vadd.f32 %v867_v45, %v866_v40  ;;  %v494_v51 = vadd.f32 %v493_v46, %v397_v42  ;;  %v869_v52 = vpop.f32.mrb[14].mxu0  ;;  %v917_v54 = vpop.f32.mrb[14].mxu1  ;;  %v429_v45 = vadd.f32 %v1151_v48, %v1165_v5 }
 0x110   :  { %v793_v55 = vpack.c.bf16 %v605_v44, %v604_v43  ;;  %v870_v56 = vpop.f32.mrb[15].mxu0  ;;  %v496_v58 = vpop.f32.mrb[15].mxu1 }
 0x111   :  { %v788_v59 = vpack.c.bf16 %v603_v49, %v602_v47  ;;  %v405_v60 = vadd.f32 %v868_v50, %v1165_v5  ;;  %v545_v62 = vmax.f32 %v494_v51, 0.0  ;;  %v871_v63 = vadd.f32 %v870_v56, %v869_v52 }
 0x112   :  { %825 = vst [vmem:[%s1251_s4 + $0x8] sm:$0xff] %v793_v55   ;;  %v497_v0 = vadd.f32 %v496_v58, %v400_v57  ;;  %v590_v10 = vmul.f32 %v1173_v23, %v494_v51  ;;  %v440_v47 = vadd.f32 %v1157_v3, %v1165_v5 }
 0x113   :  { %789 = vst [vmem:[%s1251_s4] sm:$0xff] %v788_v59   ;;  %v502_v1 = vadd.f32 %v916_v41, %v405_v60  ;;  %v567_v2 = vmul.f32 %v1169_v13, %v545_v62  ;;  %v408_v4 = vadd.f32 %v871_v63, %v1165_v5 }
 0x114   :  { %v546_v6 = vmax.f32 %v497_v0, 0.0  ;;  %v591_v14 = vmul.f32 %v1173_v23, %v497_v0 }
 0x115   :  { %v547_v7 = vmax.f32 %v502_v1, 0.0  ;;  %v872_v8 = vpop.f32.mrb[16].mxu0  ;;  %v920_v9 = vpop.f32.mrb[16].mxu1  ;;  %v505_v11 = vadd.f32 %v917_v54, %v408_v4  ;;  %v606_v21 = vadd.f32 %v590_v10, %v567_v2  ;;  %v592_v29 = vmul.f32 %v1173_v23, %v502_v1 }
 0x116   :  { %v568_v12 = vmul.f32 %v1169_v13, %v546_v6  ;;  %v873_v15 = vpop.f32.mrb[17].mxu0  ;;  %v509_v16 = vpop.f32.mrb[17].mxu1  ;;  %v432_v2 = vadd.f32 %v1153_v53, %v1165_v5 }
 0x117   :  { %v874_v17 = vadd.f32 %v873_v15, %v872_v8  ;;  %v875_v18 = vpop.f32.mrb[18].mxu0  ;;  %v921_v19 = vpop.f32.mrb[18].mxu1  ;;  %v569_v20 = vmul.f32 %v1169_v13, %v547_v7  ;;  %v548_v22 = vmax.f32 %v505_v11, 0.0  ;;  %v593_v31 = vmul.f32 %v1173_v23, %v505_v11 }
 0x118   :  { %v607_v24 = vadd.f32 %v591_v14, %v568_v12  ;;  %v876_v25 = vpop.f32.mrb[19].mxu0  ;;  %v512_v26 = vpop.f32.mrb[19].mxu1 }
 0x119   :  { %v413_v27 = vadd.f32 %v874_v17, %v1165_v5  ;;  %v877_v28 = vadd.f32 %v876_v25, %v875_v18  ;;  %v570_v30 = vmul.f32 %v1169_v13, %v548_v22  ;;  %v608_v35 = vadd.f32 %v592_v29, %v569_v20 }
 0x11a   :  { %v798_v32 = vpack.c.bf16 %v607_v24, %v606_v21 }
 0x11b   :  { %v510_v33 = vadd.f32 %v509_v16, %v413_v27  ;;  %v416_v34 = vadd.f32 %v877_v28, %v1165_v5  ;;  %v609_v36 = vadd.f32 %v593_v31, %v570_v30 }
 0x11c   :  { %826 = vst [vmem:[%s1251_s4 + $0x10] sm:$0xff] %v798_v32  }
 0x11d   :  { %v549_v38 = vmax.f32 %v510_v33, 0.0  ;;  %v513_v39 = vadd.f32 %v512_v26, %v416_v34  ;;  %v878_v40 = vpop.f32.mrb[20].mxu0  ;;  %v924_v41 = vpop.f32.mrb[20].mxu1  ;;  %v803_v42 = vpack.c.bf16 %v609_v36, %v608_v35  ;;  %v594_v54 = vmul.f32 %v1173_v23, %v510_v33 }
 0x11e   :  { %v534_v43 = vadd.f32 %v924_v41, %v437_v37  ;;  %v879_v44 = vpop.f32.mrb[21].mxu0  ;;  %v525_v46 = vpop.f32.mrb[21].mxu1 }
 0x11f   :  { %v571_v49 = vmul.f32 %v1169_v13, %v549_v38  ;;  %v550_v50 = vmax.f32 %v513_v39, 0.0  ;;  %v880_v51 = vadd.f32 %v879_v44, %v878_v40  ;;  %v881_v52 = vpop.f32.mrb[22].mxu0  ;;  %v925_v61 = vpop.f32.mrb[22].mxu1  ;;  %827 = vst [vmem:[%s1251_s4 + $0x18] sm:$0xff] %v803_v42   ;;  %v526_v56 = vadd.f32 %v525_v46, %v429_v45 }
 0x120   :  { %v555_v55 = vmax.f32 %v534_v43, 0.0  ;;  %v537_v57 = vadd.f32 %v925_v61, %v440_v47  ;;  %v882_v48 = vpop.f32.mrb[23].mxu0  ;;  %v528_v58 = vpop.f32.mrb[23].mxu1  ;;  %v595_v3 = vmul.f32 %v1173_v23, %v513_v39  ;;  %v600_v10 = vmul.f32 %v1173_v23, %v534_v43 }
 0x121   :  { %v572_v59 = vmul.f32 %v1169_v13, %v550_v50  ;;  %v421_v60 = vadd.f32 %v880_v51, %v1165_v5  ;;  %v883_v62 = vadd.f32 %v882_v48, %v881_v52  ;;  %v553_v0 = vmax.f32 %v526_v56, 0.0 }
 0x122   :  { %v577_v63 = vmul.f32 %v1169_v13, %v555_v55  ;;  %v556_v1 = vmax.f32 %v537_v57, 0.0  ;;  %v610_v4 = vadd.f32 %v594_v54, %v571_v49  ;;  %v601_v12 = vmul.f32 %v1173_v23, %v537_v57 }
 0x123   :  { %v611_v6 = vadd.f32 %v595_v3, %v572_v59  ;;  %v518_v7 = vadd.f32 %v920_v9, %v421_v60  ;;  %v424_v8 = vadd.f32 %v883_v62, %v1165_v5  ;;  %v529_v14 = vadd.f32 %v528_v58, %v432_v2 }
 0x124   :  { %v578_v11 = vmul.f32 %v1169_v13, %v556_v1  ;;  %v616_v18 = vadd.f32 %v600_v10, %v577_v63  ;;  %v575_v20 = vmul.f32 %v1169_v13, %v553_v0  ;;  %v598_v22 = vmul.f32 %v1173_v23, %v526_v56 }
 0x125   :  { %v808_v15 = vpack.c.bf16 %v611_v6, %v610_v4  ;;  %v551_v16 = vmax.f32 %v518_v7, 0.0  ;;  %v521_v17 = vadd.f32 %v921_v19, %v424_v8  ;;  %v554_v53 = vmax.f32 %v529_v14, 0.0 }
 0x126   :  { %v617_v21 = vadd.f32 %v601_v12, %v578_v11  ;;  %v599_v26 = vmul.f32 %v1173_v23, %v529_v14  ;;  %v596_v19 = vmul.f32 %v1173_v23, %v518_v7  ;;  %v614_v29 = vadd.f32 %v598_v22, %v575_v20 }
 0x127   :  { %828 = vst [vmem:[%s1251_s4 + $0x20] sm:$0xff] %v808_v15   ;;  %v573_v5 = vmul.f32 %v1169_v13, %v551_v16  ;;  %v552_v9 = vmax.f32 %v521_v17, 0.0  ;;  %v576_v25 = vmul.f32 %v1169_v13, %v554_v53  ;;  %v597_v28 = vmul.f32 %v1173_v23, %v521_v17 }
 0x128   :  { %v823_v24 = vpack.c.bf16 %v617_v21, %v616_v18 }
 0x129   :  { %v574_v27 = vmul.f32 %v1169_v13, %v552_v9  ;;  %v615_v30 = vadd.f32 %v599_v26, %v576_v25  ;;  %v612_v31 = vadd.f32 %v596_v19, %v573_v5 }
 0x12a   :  { %831 = vst [vmem:[%s1251_s4 + $0x38] sm:$0xff] %v823_v24  }
 0x12b   :  { %v613_v32 = vadd.f32 %v597_v28, %v574_v27  ;;  %v818_v33 = vpack.c.bf16 %v615_v30, %v614_v29 }
 0x12d   :  { %v813_v34 = vpack.c.bf16 %v613_v32, %v612_v31  ;;  %830 = vst [vmem:[%s1251_s4 + $0x30] sm:$0xff] %v818_v33  }
 0x12f   :  { %829 = vst [vmem:[%s1251_s4 + $0x28] sm:$0xff] %v813_v34  }

// kernel: forward.9
= control target key start
LH: loop header
LB: loop body
LE: loop exit
PB: predicated region body
PF: predicated region fallthrough
CT: control target
= control target key end

     0   :  { %vm561_vm0 = vcmask 523264   ;;  %s1880_s1 = inlined_call_operand.vmem [shape: bf16[576,128], index: 1, kind: input, shape index: {}]   ;;  %s1881_s0 = inlined_call_operand.vmem [shape: bf16[128,576], index: 0, kind: input, shape index: {}]   ;;  %s1882_s2 = inlined_call_operand.vmem [shape: f32[1,128], index: 2, kind: input, shape index: {}]   ;;  %s1883_s3 = inlined_call_operand.vmem [shape: bf16[128,128], index: 3, kind: input, shape index: {}]   ;;  %s1884_s4 = inlined_call_operand.vmem [shape: bf16[128,128], index: 4, kind: output, shape index: {}]  }
   0x1   :  { %v1400_v0 = vld [vmem:[%s1880_s1 + $0x40] sm:$0xff]   ;;  %v1404_v4 = vld [vmem:[%s1880_s1 + $0x48] sm:$0xff]   ;;  %v1408_v8 = vld [vmem:[%s1880_s1 + $0x50] sm:$0xff]  }
   0x2   :  { %v1401_v1 = vld [vmem:[%s1880_s1 + $0xc0] sm:$0xff]   ;;  %1228 = vmatprep.subr.bf16.mxu0 %v1400_v0  ;;  %v1405_v5 = vld [vmem:[%s1880_s1 + $0xc8] sm:$0xff]   ;;  %v1409_v9 = vld [vmem:[%s1880_s1 + $0xd0] sm:$0xff]  }
   0x3   :  { %v1402_v2 = vld [vmem:[%s1880_s1] sm:$0xff]   ;;  %1292 = vmatprep.subr.bf16.mxu1 %v1401_v1  ;;  %v1406_v6 = vld [vmem:[%s1880_s1 + $0x8] sm:$0xff]   ;;  %v1410_v10 = vld [vmem:[%s1880_s1 + $0x10] sm:$0xff]  }
   0x4   :  { %v1403_v3 = vld [vmem:[%s1880_s1 + $0x80] sm:$0xff]   ;;  %1229 = vmatpush3.bf16.msra.mxu0 %v1402_v2  ;;  %v1407_v7 = vld [vmem:[%s1880_s1 + $0x88] sm:$0xff]   ;;  %v1411_v11 = vld [vmem:[%s1880_s1 + $0x90] sm:$0xff]  }
   0x5   :  { %1293 = vmatpush3.bf16.msra.mxu1 %v1403_v3  ;;  %1230 = vmatprep.subr.bf16.mxu0 %v1404_v4  ;;  %v1412_v12 = vld [vmem:[%s1880_s1 + $0x58] sm:$0xff]   ;;  %v1416_v16 = vld [vmem:[%s1880_s1 + $0x60] sm:$0xff]   ;;  %v1420_v20 = vld [vmem:[%s1880_s1 + $0x68] sm:$0xff]  }
   0x6   :  { %1294 = vmatprep.subr.bf16.mxu1 %v1405_v5  ;;  %v1413_v13 = vld [vmem:[%s1880_s1 + $0xd8] sm:$0xff]   ;;  %v1417_v17 = vld [vmem:[%s1880_s1 + $0xe0] sm:$0xff]   ;;  %v1421_v21 = vld [vmem:[%s1880_s1 + $0xe8] sm:$0xff]  }
   0x7   :  { %v1414_v14 = vld [vmem:[%s1880_s1 + $0x18] sm:$0xff]   ;;  %v1418_v18 = vld [vmem:[%s1880_s1 + $0x20] sm:$0xff]   ;;  %v1422_v22 = vld [vmem:[%s1880_s1 + $0x28] sm:$0xff]  }
   0x8   :  { %1231 = vmatpush3.bf16.msra.mxu0 %v1406_v6  ;;  %v1415_v15 = vld [vmem:[%s1880_s1 + $0x98] sm:$0xff]   ;;  %v1419_v19 = vld [vmem:[%s1880_s1 + $0xa0] sm:$0xff]   ;;  %v1423_v23 = vld [vmem:[%s1880_s1 + $0xa8] sm:$0xff]  }
   0x9   :  { %1295 = vmatpush3.bf16.msra.mxu1 %v1407_v7  ;;  %1232 = vmatprep.subr.bf16.mxu0 %v1408_v8  ;;  %v1424_v24 = vld [vmem:[%s1880_s1 + $0x70] sm:$0xff]   ;;  %v1428_v28 = vld [vmem:[%s1880_s1 + $0x78] sm:$0xff]   ;;  %v1437_v35 = vld [vmem:[%s1881_s0 + $0xc] ss:$20 sps:$4 sm:$0xff]  }
   0xa   :  { %1296 = vmatprep.subr.bf16.mxu1 %v1409_v9  ;;  %v1425_v25 = vld [vmem:[%s1880_s1 + $0xf0] sm:$0xff]   ;;  %v1429_v29 = vld [vmem:[%s1880_s1 + $0xf8] sm:$0xff]   ;;  %v1438_v36 = vld [vmem:[%s1880_s1 + $0x100] sm:$0xff]   ;;  %715 = vmatprep.mubr.bf16.mxu1 %v1437_v35 }
   0xb   :  { %v1426_v26 = vld [vmem:[%s1880_s1 + $0x30] sm:$0xff]   ;;  %v1430_v30 = vld [vmem:[%s1880_s1 + $0x38] sm:$0xff]   ;;  %v1439_v37 = vld [vmem:[%s1881_s0 + $0x2c] ss:$20 sps:$4 sm:$0xff]  }
   0xc   :  { %1233 = vmatpush3.bf16.msra.mxu0 %v1410_v10  ;;  %v1427_v27 = vld [vmem:[%s1880_s1 + $0xb0] sm:$0xff]   ;;  %v1431_v31 = vld [vmem:[%s1880_s1 + $0xb8] sm:$0xff]   ;;  %v1451_v42 = vld [vmem:[%s1880_s1 + $0x108] sm:$0xff]  }
   0xd   :  { %1297 = vmatpush3.bf16.msra.mxu1 %v1411_v11  ;;  %1234 = vmatprep.subr.bf16.mxu0 %v1412_v12  ;;  %v1432_v32 = vld [vmem:[%s1881_s0] ss:$20 sps:$4 sm:$0xff]   ;;  %v1434_v33 = vld [vmem:[%s1881_s0 + $0x4] ss:$20 sps:$4 sm:$0xff]   ;;  %v1435_v34 = vld [vmem:[%s1881_s0 + $0x8] ss:$20 sps:$4 sm:$0xff]  }
   0xe   :  { %1298 = vmatprep.subr.bf16.mxu1 %v1413_v13  ;;  %618 = vmatprep.mubr.bf16.mxu0 %v1434_v33  ;;  %v1441_v38 = vld [vmem:[%s1881_s0 + $0x34] ss:$20 sps:$4 sm:$0xff]   ;;  %v1444_v40 = vld [vmem:[%s1881_s0 + $0x30] ss:$20 sps:$4 sm:$0xff]   ;;  %v1450_v45 = vld [vmem:[%s1881_s0 + $0x58] ss:$20 sps:$4 sm:$0xff]  }
   0xf   :  { %v1443_v39 = vld [vmem:[%s1881_s0 + $0x28] ss:$20 sps:$4 sm:$0xff]   ;;  %v1449_v44 = vld [vmem:[%s1881_s0 + $0x50] ss:$20 sps:$4 sm:$0xff]   ;;  %v1456_v50 = vld [vmem:[%s1881_s0 + $0x78] ss:$20 sps:$4 sm:$0xff]  }
  0x10   :  { %1235 = vmatpush3.bf16.msra.mxu0 %v1414_v14  ;;  %v1445_v41 = vld [vmem:[%s1881_s0 + $0x54] ss:$20 sps:$4 sm:$0xff]   ;;  %v1447_v43 = vld [vmem:[%s1881_s0 + $0x5c] ss:$20 sps:$4 sm:$0xff]   ;;  %v1454_v48 = vld [vmem:[%s1881_s0 + $0x84] ss:$20 sps:$4 sm:$0xff]  }
  0x11   :  { %1299 = vmatpush3.bf16.msra.mxu1 %v1415_v15  ;;  %1236 = vmatprep.subr.bf16.mxu0 %v1416_v16  ;;  %v1464_v46 = vld [vmem:[%s1880_s1 + $0x110] sm:$0xff]   ;;  %v1477_v49 = vld [vmem:[%s1880_s1 + $0x118] sm:$0xff]   ;;  %v1460_v53 = vld [vmem:[%s1881_s0 + $0xac] ss:$20 sps:$4 sm:$0xff]  }
  0x12   :  { %1300 = vmatprep.subr.bf16.mxu1 %v1417_v17  ;;  %v1452_v47 = vld [vmem:[%s1881_s0 + $0x7c] ss:$20 sps:$4 sm:$0xff]   ;;  %v1457_v51 = vld [vmem:[%s1881_s0 + $0x80] ss:$20 sps:$4 sm:$0xff]   ;;  %v1458_v52 = vld [vmem:[%s1881_s0 + $0xa4] ss:$20 sps:$4 sm:$0xff]  }
  0x13   :  { %v1462_v54 = vld [vmem:[%s1881_s0 + $0xa0] ss:$20 sps:$4 sm:$0xff]   ;;  %v1463_v55 = vld [vmem:[%s1881_s0 + $0xa8] ss:$20 sps:$4 sm:$0xff]   ;;  %v1470_v59 = vld [vmem:[%s1881_s0 + $0xd0] ss:$20 sps:$4 sm:$0xff]  }
  0x14   :  { %1237 = vmatpush3.bf16.msra.mxu0 %v1418_v18  ;;  %v1465_v56 = vld [vmem:[%s1881_s0 + $0xcc] ss:$20 sps:$4 sm:$0xff]   ;;  %v1467_v57 = vld [vmem:[%s1881_s0 + $0xd4] ss:$20 sps:$4 sm:$0xff]   ;;  %v1473_v61 = vld [vmem:[%s1881_s0 + $0xfc] ss:$20 sps:$4 sm:$0xff]  }
  0x15   :  { %1301 = vmatpush3.bf16.msra.mxu1 %v1419_v19  ;;  %1238 = vmatprep.subr.bf16.mxu0 %v1420_v20  ;;  %v1469_v58 = vld [vmem:[%s1881_s0 + $0xc8] ss:$20 sps:$4 sm:$0xff]   ;;  %v1475_v62 = vld [vmem:[%s1881_s0 + $0xf0] ss:$20 sps:$4 sm:$0xff]   ;;  %v1476_v63 = vld [vmem:[%s1881_s0 + $0xf8] ss:$20 sps:$4 sm:$0xff]  }
  0x16   :  { %1302 = vmatprep.subr.bf16.mxu1 %v1421_v21  ;;  %v1471_v60 = vld [vmem:[%s1881_s0 + $0xf4] ss:$20 sps:$4 sm:$0xff]   ;;  %v1478_v0 = vld [vmem:[%s1881_s0 + $0x11c] ss:$20 sps:$4 sm:$0xff]   ;;  %v1480_v1 = vld [vmem:[%s1881_s0 + $0x124] ss:$20 sps:$4 sm:$0xff]  }
  0x17   :  { %v1482_v2 = vld [vmem:[%s1881_s0 + $0x118] ss:$20 sps:$4 sm:$0xff]   ;;  %v1483_v3 = vld [vmem:[%s1881_s0 + $0x120] ss:$20 sps:$4 sm:$0xff]   ;;  %v1484_v4 = vld [vmem:[%s1881_s0 + $0x10] ss:$20 sps:$4 sm:$0xff]  }
  0x18   :  { %1239 = vmatpush3.bf16.msra.mxu0 %v1422_v22  ;;  %v1485_v5 = vld [vmem:[%s1881_s0 + $0xb0] ss:$20 sps:$4 sm:$0xff]   ;;  %v1486_v6 = vld [vmem:[%s1881_s0 + $0x38] ss:$20 sps:$4 sm:$0xff]   ;;  %v1488_v8 = vld [vmem:[%s1881_s0 + $0x60] ss:$20 sps:$4 sm:$0xff]  }
  0x19   :  { %1303 = vmatpush3.bf16.msra.mxu1 %v1423_v23  ;;  %1240 = vmatprep.subr.bf16.mxu0 %v1424_v24  ;;  %v1487_v7 = vld [vmem:[%s1881_s0 + $0xd8] ss:$20 sps:$4 sm:$0xff]   ;;  %v1489_v9 = vld [vmem:[%s1881_s0 + $0x100] ss:$20 sps:$4 sm:$0xff]   ;;  %v1490_v10 = vld [vmem:[%s1881_s0 + $0x88] ss:$20 sps:$4 sm:$0xff]  }
  0x1a   :  { %1304 = vmatprep.subr.bf16.mxu1 %v1425_v25  ;;  %v1491_v11 = vld [vmem:[%s1881_s0 + $0x128] ss:$20 sps:$4 sm:$0xff]   ;;  %v1756_v14 = vld [vmem:[%s1882_s2] ss:$0 sm:$0xff] }
  0x1c   :  { %1241 = vmatpush3.bf16.msra.mxu0 %v1426_v26 }
  0x1d   :  { %1305 = vmatpush3.bf16.msra.mxu1 %v1427_v27  ;;  %1242 = vmatprep.subr.bf16.mxu0 %v1428_v28 }
  0x1e   :  { %1306 = vmatprep.subr.bf16.mxu1 %v1429_v29 }
  0x20   :  { %1243 = vmatpush3.bf16.msra.mxu0 %v1430_v30 }
  0x21   :  { %1307 = vmatpush3.bf16.msra.mxu1 %v1431_v31  ;;  %1368 = vmatprep.subr.bf16.mxu0 %v1438_v36 }
  0x22   :  { %1392 = vmatprep.subr.bf16.mxu1 %v1438_v36 }
  0x23   :  { %619 = vmatmul.mubr.bf16.vlgmr.msra.gmra.mrb[0].mxu0 %v1432_v32 }
  0x24   :  { %716 = vmatmul.mubr.bf16.vlgmr.msra.gmra.mrb[0].mxu1 %v1435_v34  ;;  %1369 = vmatpush3.bf16.msra.mxu0 %v1438_v36 }
  0x25   :  { %1396 = vmatpush3.bf16.msra.mxu1 %v1438_v36  ;;  %626 = vmatprep.mubr.bf16.mxu0 %v1439_v37 }
  0x26   :  { %723 = vmatprep.mubr.bf16.mxu1 %v1441_v38  ;;  %1370 = vmatprep.subr.bf16.mxu0 %v1451_v42 }
  0x27   :  { %1393 = vmatprep.subr.bf16.mxu1 %v1451_v42 }
  0x28   :  { %1371 = vmatpush3.bf16.msra.mxu0 %v1451_v42 }
  0x29   :  { %1397 = vmatpush3.bf16.msra.mxu1 %v1451_v42  ;;  %1372 = vmatprep.subr.bf16.mxu0 %v1464_v46 }
  0x2a   :  { %1394 = vmatprep.subr.bf16.mxu1 %v1464_v46 }
  0x2b   :  { %627 = vmatmul.mubr.bf16.gmra.mrb[4].mxu0 %v1443_v39 }
  0x2c   :  { %724 = vmatmul.mubr.bf16.gmra.mrb[4].mxu1 %v1444_v40  ;;  %634 = vmatprep.mubr.bf16.mxu0 %v1445_v41 }
  0x2d   :  { %731 = vmatprep.mubr.bf16.mxu1 %v1447_v43  ;;  %1373 = vmatpush3.bf16.msra.mxu0 %v1464_v46 }
  0x2e   :  { %1398 = vmatpush3.bf16.msra.mxu1 %v1464_v46  ;;  %1374 = vmatprep.subr.bf16.mxu0 %v1477_v49 }
  0x2f   :  { %1395 = vmatprep.subr.bf16.mxu1 %v1477_v49 }
  0x31   :  { %1375 = vmatpush3.bf16.msra.mxu0 %v1477_v49 }
  0x32   :  { %1399 = vmatpush3.bf16.msra.mxu1 %v1477_v49 }
  0x33   :  { %635 = vmatmul.mubr.bf16.gmra.mrb[8].mxu0 %v1449_v44 }
  0x34   :  { %732 = vmatmul.mubr.bf16.gmra.mrb[8].mxu1 %v1450_v45  ;;  %642 = vmatprep.mubr.bf16.mxu0 %v1452_v47 }
  0x35   :  { %739 = vmatprep.mubr.bf16.mxu1 %v1454_v48 }
  0x3b   :  { %643 = vmatmul.mubr.bf16.gmra.mrb[12].mxu0 %v1456_v50 }
  0x3c   :  { %740 = vmatmul.mubr.bf16.gmra.mrb[12].mxu1 %v1457_v51  ;;  %650 = vmatprep.mubr.bf16.mxu0 %v1458_v52 }
  0x3d   :  { %747 = vmatprep.mubr.bf16.mxu1 %v1460_v53 }
  0x43   :  { %651 = vmatmul.mubr.bf16.gmra.mrb[16].mxu0 %v1462_v54 }
  0x44   :  { %748 = vmatmul.mubr.bf16.gmra.mrb[16].mxu1 %v1463_v55  ;;  %658 = vmatprep.mubr.bf16.mxu0 %v1465_v56 }
  0x45   :  { %755 = vmatprep.mubr.bf16.mxu1 %v1467_v57 }
  0x4b   :  { %659 = vmatmul.mubr.bf16.gmra.mrb[20].mxu0 %v1469_v58 }
  0x4c   :  { %756 = vmatmul.mubr.bf16.gmra.mrb[20].mxu1 %v1470_v59  ;;  %666 = vmatprep.mubr.bf16.mxu0 %v1471_v60 }
  0x4d   :  { %763 = vmatprep.mubr.bf16.mxu1 %v1473_v61 }
  0x53   :  { %667 = vmatmul.mubr.bf16.gmra.mrb[24].mxu0 %v1475_v62 }
  0x54   :  { %764 = vmatmul.mubr.bf16.gmra.mrb[24].mxu1 %v1476_v63  ;;  %674 = vmatprep.mubr.bf16.mxu0 %v1478_v0 }
  0x55   :  { %771 = vmatprep.mubr.bf16.mxu1 %v1480_v1 }
  0x5b   :  { %675 = vmatmul.mubr.bf16.gmra.mrb[28].mxu0 %v1482_v2 }
  0x5c   :  { %772 = vmatmul.mubr.bf16.gmra.mrb[28].mxu1 %v1483_v3  ;;  %1376 = vmatprep.mubr.msk.bf16.mxu0 %vm561_vm0, %v1484_v4 }
  0x5d   :  { %1384 = vmatprep.mubr.msk.bf16.mxu1 %vm561_vm0, %v1485_v5 }
  0x63   :  { %1377 = vmatmul.mubr.msk.bf16.vlgmr.msra.gmra.mrb[32].mxu0 %vm561_vm0, %v1486_v6 }
  0x64   :  { %1385 = vmatmul.mubr.msk.bf16.vlgmr.msra.gmra.mrb[32].mxu1 %vm561_vm0, %v1487_v7  ;;  %1380 = vmatprep.mubr.msk.bf16.mxu0 %vm561_vm0, %v1488_v8 }
  0x65   :  { %1388 = vmatprep.mubr.msk.bf16.mxu1 %vm561_vm0, %v1489_v9 }
  0x6b   :  { %1381 = vmatmul.mubr.msk.bf16.gmra.mrb[36].mxu0 %vm561_vm0, %v1490_v10 }
  0x6c   :  { %1389 = vmatmul.mubr.msk.bf16.gmra.mrb[36].mxu1 %vm561_vm0, %v1491_v11 }
  0xf6   :  { %v1244_v12 = vpop.f32.mrb[0].mxu0 }
  0xf7   :  { %v1308_v13 = vpop.f32.mrb[0].mxu1  ;;  %v1245_v15 = vpop.f32.mrb[1].mxu0 }
  0xf8   :  { %v1246_v16 = vadd.f32 %v1245_v15, %v1244_v12  ;;  %v1309_v17 = vpop.f32.mrb[1].mxu1  ;;  %v1247_v18 = vpop.f32.mrb[2].mxu0 }
  0xf9   :  { %v1310_v19 = vadd.f32 %v1309_v17, %v1308_v13  ;;  %v1311_v20 = vpop.f32.mrb[2].mxu1  ;;  %v1248_v21 = vpop.f32.mrb[3].mxu0 }
  0xfa   :  { %v621_v22 = vadd.f32 %v1246_v16, %v1756_v14  ;;  %v1249_v23 = vadd.f32 %v1248_v21, %v1247_v18  ;;  %v1312_v24 = vpop.f32.mrb[3].mxu1 }
  0xfb   :  { %v1313_v25 = vadd.f32 %v1312_v24, %v1311_v20 }
  0xfc   :  { %v624_v26 = vadd.f32 %v1249_v23, %v1756_v14  ;;  %v1760_v27 = vadd.f32 %v1310_v19, %v621_v22 }
  0xfe   :  { %v1250_v28 = vpop.f32.mrb[4].mxu0  ;;  %v1762_v29 = vadd.f32 %v1313_v25, %v624_v26 }
  0xff   :  { %v1314_v30 = vpop.f32.mrb[4].mxu1  ;;  %v1251_v31 = vpop.f32.mrb[5].mxu0 }
 0x100   :  { %v1252_v32 = vadd.f32 %v1251_v31, %v1250_v28  ;;  %v1315_v33 = vpop.f32.mrb[5].mxu1  ;;  %v1253_v34 = vpop.f32.mrb[6].mxu0 }
 0x101   :  { %v1316_v35 = vadd.f32 %v1315_v33, %v1314_v30  ;;  %v1317_v36 = vpop.f32.mrb[6].mxu1  ;;  %v1254_v37 = vpop.f32.mrb[7].mxu0 }
 0x102   :  { %v629_v38 = vadd.f32 %v1252_v32, %v1756_v14  ;;  %v1255_v39 = vadd.f32 %v1254_v37, %v1253_v34  ;;  %v1318_v40 = vpop.f32.mrb[7].mxu1 }
 0x103   :  { %v1319_v41 = vadd.f32 %v1318_v40, %v1317_v36 }
 0x104   :  { %v632_v42 = vadd.f32 %v1255_v39, %v1756_v14  ;;  %v1766_v43 = vadd.f32 %v1316_v35, %v629_v38 }
 0x106   :  { %v1256_v44 = vpop.f32.mrb[8].mxu0  ;;  %v1768_v45 = vadd.f32 %v1319_v41, %v632_v42 }
 0x107   :  { %v1320_v46 = vpop.f32.mrb[8].mxu1  ;;  %v1257_v47 = vpop.f32.mrb[9].mxu0 }
 0x108   :  { %v1258_v48 = vadd.f32 %v1257_v47, %v1256_v44  ;;  %v1321_v49 = vpop.f32.mrb[9].mxu1  ;;  %v1259_v50 = vpop.f32.mrb[10].mxu0 }
 0x109   :  { %v1322_v51 = vadd.f32 %v1321_v49, %v1320_v46  ;;  %v1323_v52 = vpop.f32.mrb[10].mxu1  ;;  %v1260_v53 = vpop.f32.mrb[11].mxu0 }
 0x10a   :  { %v637_v54 = vadd.f32 %v1258_v48, %v1756_v14  ;;  %v1261_v55 = vadd.f32 %v1260_v53, %v1259_v50  ;;  %v1324_v56 = vpop.f32.mrb[11].mxu1 }
 0x10b   :  { %v1325_v57 = vadd.f32 %v1324_v56, %v1323_v52 }
 0x10c   :  { %v640_v58 = vadd.f32 %v1261_v55, %v1756_v14  ;;  %v1772_v59 = vadd.f32 %v1322_v51, %v637_v54 }
 0x10e   :  { %v1262_v60 = vpop.f32.mrb[12].mxu0  ;;  %v1774_v61 = vadd.f32 %v1325_v57, %v640_v58 }
 0x10f   :  { %v1326_v62 = vpop.f32.mrb[12].mxu1  ;;  %v1263_v63 = vpop.f32.mrb[13].mxu0 }
 0x110   :  { %v1264_v0 = vadd.f32 %v1263_v63, %v1262_v60  ;;  %v1327_v1 = vpop.f32.mrb[13].mxu1  ;;  %v1265_v2 = vpop.f32.mrb[14].mxu0 }
 0x111   :  { %v1328_v3 = vadd.f32 %v1327_v1, %v1326_v62  ;;  %v1329_v4 = vpop.f32.mrb[14].mxu1  ;;  %v1266_v5 = vpop.f32.mrb[15].mxu0 }
 0x112   :  { %v645_v6 = vadd.f32 %v1264_v0, %v1756_v14  ;;  %v1267_v7 = vadd.f32 %v1266_v5, %v1265_v2  ;;  %v1330_v8 = vpop.f32.mrb[15].mxu1 }
 0x113   :  { %v1331_v9 = vadd.f32 %v1330_v8, %v1329_v4 }
 0x114   :  { %v648_v10 = vadd.f32 %v1267_v7, %v1756_v14  ;;  %v1778_v11 = vadd.f32 %v1328_v3, %v645_v6 }
 0x116   :  { %v1268_v12 = vpop.f32.mrb[16].mxu0  ;;  %v1780_v13 = vadd.f32 %v1331_v9, %v648_v10 }
 0x117   :  { %v1332_v15 = vpop.f32.mrb[16].mxu1  ;;  %v1269_v16 = vpop.f32.mrb[17].mxu0 }
 0x118   :  { %v1270_v17 = vadd.f32 %v1269_v16, %v1268_v12  ;;  %v1333_v18 = vpop.f32.mrb[17].mxu1  ;;  %v1271_v19 = vpop.f32.mrb[18].mxu0 }
 0x119   :  { %v1334_v20 = vadd.f32 %v1333_v18, %v1332_v15  ;;  %v1335_v21 = vpop.f32.mrb[18].mxu1  ;;  %v1272_v22 = vpop.f32.mrb[19].mxu0 }
 0x11a   :  { %v653_v23 = vadd.f32 %v1270_v17, %v1756_v14  ;;  %v1273_v24 = vadd.f32 %v1272_v22, %v1271_v19  ;;  %v1336_v25 = vpop.f32.mrb[19].mxu1  ;;  %v1214_v19 = vld [vmem:[%s1883_s3 + $0x8] sm:$0xff]  }
 0x11b   :  { %v1337_v26 = vadd.f32 %v1336_v25, %v1335_v21  ;;  %v1143_v21 = vld [vmem:[%s1883_s3] sm:$0xff]   ;;  %v1815_v25 = vld [vmem:[%s1883_s3 + $0x18] sm:$0xff]  }
 0x11c   :  { %v656_v28 = vadd.f32 %v1273_v24, %v1756_v14  ;;  %v1784_v30 = vadd.f32 %v1334_v20, %v653_v23  ;;  %v1218_v20 = vld [vmem:[%s1883_s3 + $0x28] sm:$0xff]   ;;  %v1217_v23 = vld [vmem:[%s1883_s3 + $0x20] sm:$0xff]  }
 0x11e   :  { %v1274_v31 = vpop.f32.mrb[20].mxu0  ;;  %v1786_v32 = vadd.f32 %v1337_v26, %v656_v28  ;;  %v1148_v28 = vunpack.c.l.bf16 %v1214_v19 }
 0x11f   :  { %v1338_v33 = vpop.f32.mrb[20].mxu1  ;;  %v1275_v34 = vpop.f32.mrb[21].mxu0 }
 0x120   :  { %v1276_v35 = vadd.f32 %v1275_v34, %v1274_v31  ;;  %v1339_v36 = vpop.f32.mrb[21].mxu1  ;;  %v1277_v37 = vpop.f32.mrb[22].mxu0  ;;  %v1164_v31 = vunpack.c.l.bf16 %v1218_v20  ;;  %v1820_v34 = vld [vmem:[%s1883_s3 + $0x38] sm:$0xff]  }
 0x121   :  { %v1340_v38 = vadd.f32 %v1339_v36, %v1338_v33  ;;  %v1341_v39 = vpop.f32.mrb[22].mxu1  ;;  %v1278_v40 = vpop.f32.mrb[23].mxu0  ;;  %v1144_v33 = vunpack.c.l.bf16 %v1143_v21  ;;  %v1160_v36 = vunpack.c.l.bf16 %v1217_v23 }
 0x122   :  { %v661_v41 = vadd.f32 %v1276_v35, %v1756_v14  ;;  %v1279_v42 = vadd.f32 %v1278_v40, %v1277_v37  ;;  %v1342_v44 = vpop.f32.mrb[23].mxu1  ;;  %v1825_v35 = vld [vmem:[%s1883_s3 + $0x10] sm:$0xff]   ;;  %v1149_v37 = vunpack.c.h.bf16 %v1214_v19 }
 0x123   :  { %v1343_v46 = vadd.f32 %v1342_v44, %v1341_v39  ;;  %v1830_v39 = vld [vmem:[%s1883_s3 + $0x30] sm:$0xff]  }
 0x124   :  { %v664_v47 = vadd.f32 %v1279_v42, %v1756_v14  ;;  %v758_v48 = vadd.f32 %v1340_v38, %v661_v41  ;;  %v1165_v38 = vunpack.c.h.bf16 %v1218_v20 }
 0x126   :  { %v1280_v49 = vpop.f32.mrb[24].mxu0  ;;  %v1790_v50 = vadd.f32 %v1343_v46, %v664_v47  ;;  %v1145_v46 = vunpack.c.h.bf16 %v1143_v21  ;;  %v1161_v47 = vunpack.c.h.bf16 %v1217_v23 }
 0x127   :  { %v1344_v51 = vpop.f32.mrb[24].mxu1  ;;  %v1281_v52 = vpop.f32.mrb[25].mxu0 }
 0x128   :  { %v1282_v53 = vadd.f32 %v1281_v52, %v1280_v49  ;;  %v1345_v54 = vpop.f32.mrb[25].mxu1  ;;  %v1283_v55 = vpop.f32.mrb[26].mxu0  ;;  %v1156_v49 = vunpack.c.l.bf16 %v1815_v25 }
 0x129   :  { %v1346_v56 = vadd.f32 %v1345_v54, %v1344_v51  ;;  %v1347_v57 = vpop.f32.mrb[26].mxu1  ;;  %v1284_v58 = vpop.f32.mrb[27].mxu0 }
 0x12a   :  { %v669_v60 = vadd.f32 %v1282_v53, %v1756_v14  ;;  %v1285_v62 = vadd.f32 %v1284_v58, %v1283_v55  ;;  %v1348_v63 = vpop.f32.mrb[27].mxu1  ;;  %v1172_v55 = vunpack.c.l.bf16 %v1820_v34 }
 0x12b   :  { %v1349_v0 = vadd.f32 %v1348_v63, %v1347_v57  ;;  %v1168_v63 = vunpack.c.l.bf16 %v1830_v39 }
 0x12c   :  { %v672_v1 = vadd.f32 %v1285_v62, %v1756_v14  ;;  %v1794_v2 = vadd.f32 %v1346_v56, %v669_v60  ;;  %v1152_v56 = vunpack.c.l.bf16 %v1825_v35 }
 0x12e   :  { %v1286_v3 = vpop.f32.mrb[28].mxu0  ;;  %v1796_v4 = vadd.f32 %v1349_v0, %v672_v1 }
 0x12f   :  { %v1350_v5 = vpop.f32.mrb[28].mxu1  ;;  %v1287_v6 = vpop.f32.mrb[29].mxu0 }
 0x130   :  { %v1288_v7 = vadd.f32 %v1287_v6, %v1286_v3  ;;  %v1351_v8 = vpop.f32.mrb[29].mxu1  ;;  %v1289_v9 = vpop.f32.mrb[30].mxu0 }
 0x131   :  { %v1352_v10 = vadd.f32 %v1351_v8, %v1350_v5  ;;  %v1353_v12 = vpop.f32.mrb[30].mxu1  ;;  %v1290_v15 = vpop.f32.mrb[31].mxu0  ;;  %v1157_v8 = vunpack.c.h.bf16 %v1815_v25 }
 0x132   :  { %v677_v16 = vadd.f32 %v1288_v7, %v1756_v14  ;;  %v1291_v17 = vadd.f32 %v1290_v15, %v1289_v9  ;;  %v1354_v18 = vpop.f32.mrb[31].mxu1 }
 0x133   :  { %v1355_v22 = vadd.f32 %v1354_v18, %v1353_v12 }
 0x134   :  { %v680_v24 = vadd.f32 %v1291_v17, %v1756_v14  ;;  %v774_v26 = vadd.f32 %v1352_v10, %v677_v16  ;;  %v1153_v10 = vunpack.c.h.bf16 %v1825_v35 }
 0x136   :  { %v1378_v14 = vpop.f32.mrb[32].mxu0  ;;  %v1832_v40 = vadd.f32 %v1355_v22, %v680_v24 }
 0x137   :  { %v823_v41 = vadd.f32 %v1378_v14, %v1766_v43  ;;  %v1386_v42 = vpop.f32.mrb[32].mxu1  ;;  %v814_v44 = vpop.f32.mrb[33].mxu0 }
 0x138   :  { %v855_v51 = vadd.f32 %v1386_v42, %v758_v48  ;;  %v815_v52 = vadd.f32 %v814_v44, %v1760_v27  ;;  %v846_v53 = vpop.f32.mrb[33].mxu1  ;;  %v1379_v54 = vpop.f32.mrb[34].mxu0 }
 0x139   :  { %v911_v57 = vadd.f32 %v1148_v28, %v823_v41  ;;  %v847_v58 = vadd.f32 %v846_v53, %v1784_v30  ;;  %v826_v43 = vadd.f32 %v1379_v54, %v1768_v45  ;;  %v1387_v60 = vpop.f32.mrb[34].mxu1  ;;  %v817_v62 = vpop.f32.mrb[35].mxu0  ;;  %v1173_v45 = vunpack.c.h.bf16 %v1820_v34 }
 0x13a   :  { %v919_v0 = vadd.f32 %v1164_v31, %v855_v51  ;;  %v909_v1 = vadd.f32 %v1144_v33, %v815_v52  ;;  %v858_v48 = vadd.f32 %v1387_v60, %v1790_v50  ;;  %v818_v27 = vadd.f32 %v817_v62, %v1762_v29  ;;  %v849_v3 = vpop.f32.mrb[35].mxu1 }
 0x13b   :  { %v917_v5 = vadd.f32 %v1160_v36, %v847_v58  ;;  %v912_v6 = vadd.f32 %v1149_v37, %v826_v43  ;;  %v850_v7 = vadd.f32 %v849_v3, %v1786_v32  ;;  %v927_v12 = vmax.f32 %v911_v57, 0.0 }
 0x13c   :  { %v920_v30 = vadd.f32 %v1165_v38, %v858_v48  ;;  %v910_v9 = vadd.f32 %v1145_v46, %v818_v27  ;;  %v1169_v50 = vunpack.c.h.bf16 %v1830_v39  ;;  %v935_v17 = vmax.f32 %v919_v0, 0.0 }
 0x13d   :  { %v928_v15 = vmax.f32 %v912_v6, 0.0  ;;  %v918_v16 = vadd.f32 %v1161_v47, %v850_v7  ;;  %v925_v29 = vmax.f32 %v909_v1, 0.0  ;;  %v933_v21 = vmax.f32 %v917_v5, 0.0 }
 0x13e   :  { %v936_v18 = vmax.f32 %v920_v30, 0.0  ;;  %v926_v19 = vmax.f32 %v910_v9, 0.0  ;;  %v1382_v20 = vpop.f32.mrb[36].mxu0 }
 0x13f   :  { %v1182_v32 = vpack.c.bf16 %v928_v15, %v927_v12  ;;  %v934_v22 = vmax.f32 %v918_v16, 0.0  ;;  %v839_v23 = vadd.f32 %v1382_v20, %v1778_v11  ;;  %v1390_v24 = vpop.f32.mrb[36].mxu1  ;;  %v830_v25 = vpop.f32.mrb[37].mxu0 }
 0x140   :  { %v1202_v28 = vpack.c.bf16 %v936_v18, %v935_v17  ;;  %v1177_v31 = vpack.c.bf16 %v926_v19, %v925_v29  ;;  %v871_v33 = vadd.f32 %v1390_v24, %v774_v26  ;;  %v831_v34 = vadd.f32 %v830_v25, %v1772_v59  ;;  %v862_v35 = vpop.f32.mrb[37].mxu1  ;;  %v1383_v14 = vpop.f32.mrb[38].mxu0 }
 0x141   :  { %1221 = vst [vmem:[%s1884_s4 + $0x8] sm:$0xff] %v1182_v32   ;;  %v1197_v36 = vpack.c.bf16 %v934_v22, %v933_v21  ;;  %v915_v37 = vadd.f32 %v1156_v49, %v839_v23  ;;  %v863_v38 = vadd.f32 %v862_v35, %v1794_v2  ;;  %v842_v39 = vadd.f32 %v1383_v14, %v1780_v13  ;;  %v1391_v11 = vpop.f32.mrb[38].mxu1  ;;  %v833_v41 = vpop.f32.mrb[39].mxu0 }
 0x142   :  { %1225 = vst [vmem:[%s1884_s4 + $0x28] sm:$0xff] %v1202_v28   ;;  %1178 = vst [vmem:[%s1884_s4] sm:$0xff] %v1177_v31   ;;  %v923_v59 = vadd.f32 %v1172_v55, %v871_v33  ;;  %v913_v26 = vadd.f32 %v1152_v56, %v831_v34  ;;  %v874_v42 = vadd.f32 %v1391_v11, %v1832_v40  ;;  %v865_v46 = vpop.f32.mrb[39].mxu1 }
 0x143   :  { %v834_v44 = vadd.f32 %v833_v41, %v1774_v61  ;;  %1224 = vst [vmem:[%s1884_s4 + $0x20] sm:$0xff] %v1197_v36   ;;  %v921_v13 = vadd.f32 %v1168_v63, %v863_v38  ;;  %v916_v2 = vadd.f32 %v1157_v8, %v842_v39  ;;  %v866_v47 = vadd.f32 %v865_v46, %v1796_v4 }
 0x144   :  { %v924_v49 = vadd.f32 %v1173_v45, %v874_v42  ;;  %v931_v52 = vmax.f32 %v915_v37, 0.0  ;;  %v939_v55 = vmax.f32 %v923_v59, 0.0  ;;  %v929_v56 = vmax.f32 %v913_v26, 0.0 }
 0x145   :  { %v914_v51 = vadd.f32 %v1153_v10, %v834_v44  ;;  %v932_v53 = vmax.f32 %v916_v2, 0.0  ;;  %v922_v54 = vadd.f32 %v1169_v50, %v866_v47  ;;  %v937_v58 = vmax.f32 %v921_v13, 0.0 }
 0x146   :  { %v940_v57 = vmax.f32 %v924_v49, 0.0 }
 0x147   :  { %v930_v40 = vmax.f32 %v914_v51, 0.0  ;;  %v1192_v61 = vpack.c.bf16 %v932_v53, %v931_v52  ;;  %v938_v43 = vmax.f32 %v922_v54, 0.0 }
 0x148   :  { %v1212_v60 = vpack.c.bf16 %v940_v57, %v939_v55 }
 0x149   :  { %v1187_v62 = vpack.c.bf16 %v930_v40, %v929_v56  ;;  %1223 = vst [vmem:[%s1884_s4 + $0x18] sm:$0xff] %v1192_v61   ;;  %v1207_v63 = vpack.c.bf16 %v938_v43, %v937_v58 }
 0x14a   :  { %1227 = vst [vmem:[%s1884_s4 + $0x38] sm:$0xff] %v1212_v60  }
 0x14b   :  { %1222 = vst [vmem:[%s1884_s4 + $0x10] sm:$0xff] %v1187_v62   ;;  %1226 = vst [vmem:[%s1884_s4 + $0x30] sm:$0xff] %v1207_v63  }

// kernel: forward.10
= control target key start
LH: loop header
LB: loop body
LE: loop exit
PB: predicated region body
PF: predicated region fallthrough
CT: control target
= control target key end

     0   :  { %vm524_vm0 = vcmask 523264   ;;  %s1315_s1 = inlined_call_operand.vmem [shape: bf16[576,256], index: 1, kind: input, shape index: {}]   ;;  %s1316_s0 = inlined_call_operand.vmem [shape: bf16[32,576], index: 0, kind: input, shape index: {}]   ;;  %s1317_s2 = inlined_call_operand.vmem [shape: f32[1,256], index: 2, kind: input, shape index: {}]   ;;  %s1318_s3 = inlined_call_operand.vmem [shape: f32[1,256], index: 3, kind: input, shape index: {}]   ;;  %s1319_s4 = inlined_call_operand.vmem [shape: bf16[32,256], index: 4, kind: output, shape index: {}]  }
   0x1   :  { %v903_v0 = vld [vmem:[%s1315_s1 + $0x4] ss:$8 sps:$4 sm:$0xff]   ;;  %v907_v2 = vld [vmem:[%s1315_s1] ss:$8 sps:$4 sm:$0xff]   ;;  %v909_v4 = vld [vmem:[%s1315_s1 + $0x14] ss:$8 sps:$4 sm:$0xff]  }
   0x2   :  { %v905_v1 = vld [vmem:[%s1315_s1 + $0x104] ss:$8 sps:$4 sm:$0xff]   ;;  %531 = vmatprep.subr.bf16.mxu1 %v903_v0  ;;  %v908_v3 = vld [vmem:[%s1315_s1 + $0x100] ss:$8 sps:$4 sm:$0xff]   ;;  %v911_v5 = vld [vmem:[%s1315_s1 + $0x114] ss:$8 sps:$4 sm:$0xff]  }
   0x3   :  { %584 = vmatprep.subr.bf16.mxu0 %v905_v1  ;;  %532 = vmatpush1.bf16.msra.mxu1 %v907_v2  ;;  %v913_v6 = vld [vmem:[%s1315_s1 + $0x10] ss:$8 sps:$4 sm:$0xff]   ;;  %v915_v8 = vld [vmem:[%s1315_s1 + $0x24] ss:$8 sps:$4 sm:$0xff]   ;;  %v919_v10 = vld [vmem:[%s1315_s1 + $0x20] ss:$8 sps:$4 sm:$0xff]  }
   0x4   :  { %585 = vmatpush1.bf16.msra.mxu0 %v908_v3  ;;  %533 = vmatprep.subr.bf16.mxu1 %v909_v4  ;;  %v914_v7 = vld [vmem:[%s1315_s1 + $0x110] ss:$8 sps:$4 sm:$0xff]   ;;  %v917_v9 = vld [vmem:[%s1315_s1 + $0x124] ss:$8 sps:$4 sm:$0xff]   ;;  %v920_v11 = vld [vmem:[%s1315_s1 + $0x120] ss:$8 sps:$4 sm:$0xff]  }
   0x5   :  { %586 = vmatprep.subr.bf16.mxu0 %v911_v5  ;;  %v921_v12 = vld [vmem:[%s1315_s1 + $0x34] ss:$8 sps:$4 sm:$0xff]   ;;  %v925_v14 = vld [vmem:[%s1315_s1 + $0x30] ss:$8 sps:$4 sm:$0xff]   ;;  %v927_v16 = vld [vmem:[%s1315_s1 + $0x44] ss:$8 sps:$4 sm:$0xff]  }
   0x6   :  { %v923_v13 = vld [vmem:[%s1315_s1 + $0x134] ss:$8 sps:$4 sm:$0xff]   ;;  %v926_v15 = vld [vmem:[%s1315_s1 + $0x130] ss:$8 sps:$4 sm:$0xff]   ;;  %v929_v17 = vld [vmem:[%s1315_s1 + $0x144] ss:$8 sps:$4 sm:$0xff]  }
   0x7   :  { %534 = vmatpush1.bf16.msra.mxu1 %v913_v6  ;;  %v931_v18 = vld [vmem:[%s1315_s1 + $0x40] ss:$8 sps:$4 sm:$0xff]   ;;  %v933_v20 = vld [vmem:[%s1315_s1 + $0x54] ss:$8 sps:$4 sm:$0xff]   ;;  %v937_v22 = vld [vmem:[%s1315_s1 + $0x50] ss:$8 sps:$4 sm:$0xff]  }
   0x8   :  { %587 = vmatpush1.bf16.msra.mxu0 %v914_v7  ;;  %535 = vmatprep.subr.bf16.mxu1 %v915_v8  ;;  %v932_v19 = vld [vmem:[%s1315_s1 + $0x140] ss:$8 sps:$4 sm:$0xff]   ;;  %v935_v21 = vld [vmem:[%s1315_s1 + $0x154] ss:$8 sps:$4 sm:$0xff]   ;;  %v938_v23 = vld [vmem:[%s1315_s1 + $0x150] ss:$8 sps:$4 sm:$0xff]  }
   0x9   :  { %588 = vmatprep.subr.bf16.mxu0 %v917_v9  ;;  %v939_v24 = vld [vmem:[%s1315_s1 + $0x64] ss:$8 sps:$4 sm:$0xff]   ;;  %v943_v26 = vld [vmem:[%s1315_s1 + $0x60] ss:$8 sps:$4 sm:$0xff]   ;;  %v945_v28 = vld [vmem:[%s1315_s1 + $0x74] ss:$8 sps:$4 sm:$0xff]  }
   0xa   :  { %v941_v25 = vld [vmem:[%s1315_s1 + $0x164] ss:$8 sps:$4 sm:$0xff]   ;;  %v944_v27 = vld [vmem:[%s1315_s1 + $0x160] ss:$8 sps:$4 sm:$0xff]   ;;  %v947_v29 = vld [vmem:[%s1315_s1 + $0x174] ss:$8 sps:$4 sm:$0xff]  }
   0xb   :  { %536 = vmatpush1.bf16.msra.mxu1 %v919_v10  ;;  %v949_v30 = vld [vmem:[%s1315_s1 + $0x70] ss:$8 sps:$4 sm:$0xff]   ;;  %v951_v32 = vld [vmem:[%s1315_s1 + $0x84] ss:$8 sps:$4 sm:$0xff]   ;;  %v955_v34 = vld [vmem:[%s1315_s1 + $0x80] ss:$8 sps:$4 sm:$0xff]  }
   0xc   :  { %589 = vmatpush1.bf16.msra.mxu0 %v920_v11  ;;  %537 = vmatprep.subr.bf16.mxu1 %v921_v12  ;;  %v950_v31 = vld [vmem:[%s1315_s1 + $0x170] ss:$8 sps:$4 sm:$0xff]   ;;  %v953_v33 = vld [vmem:[%s1315_s1 + $0x184] ss:$8 sps:$4 sm:$0xff]   ;;  %v956_v35 = vld [vmem:[%s1315_s1 + $0x180] ss:$8 sps:$4 sm:$0xff]  }
   0xd   :  { %590 = vmatprep.subr.bf16.mxu0 %v923_v13  ;;  %v957_v36 = vld [vmem:[%s1315_s1 + $0x94] ss:$8 sps:$4 sm:$0xff]   ;;  %v961_v38 = vld [vmem:[%s1315_s1 + $0x90] ss:$8 sps:$4 sm:$0xff]   ;;  %v963_v40 = vld [vmem:[%s1315_s1 + $0xa4] ss:$8 sps:$4 sm:$0xff]  }
   0xe   :  { %v959_v37 = vld [vmem:[%s1315_s1 + $0x194] ss:$8 sps:$4 sm:$0xff]   ;;  %v962_v39 = vld [vmem:[%s1315_s1 + $0x190] ss:$8 sps:$4 sm:$0xff]   ;;  %v965_v41 = vld [vmem:[%s1315_s1 + $0x1a4] ss:$8 sps:$4 sm:$0xff]  }
   0xf   :  { %538 = vmatpush1.bf16.msra.mxu1 %v925_v14  ;;  %v967_v42 = vld [vmem:[%s1315_s1 + $0xa0] ss:$8 sps:$4 sm:$0xff]   ;;  %v969_v44 = vld [vmem:[%s1315_s1 + $0xb4] ss:$8 sps:$4 sm:$0xff]   ;;  %v973_v46 = vld [vmem:[%s1315_s1 + $0xb0] ss:$8 sps:$4 sm:$0xff]  }
  0x10   :  { %591 = vmatpush1.bf16.msra.mxu0 %v926_v15  ;;  %539 = vmatprep.subr.bf16.mxu1 %v927_v16  ;;  %v968_v43 = vld [vmem:[%s1315_s1 + $0x1a0] ss:$8 sps:$4 sm:$0xff]   ;;  %v971_v45 = vld [vmem:[%s1315_s1 + $0x1b4] ss:$8 sps:$4 sm:$0xff]   ;;  %v974_v47 = vld [vmem:[%s1315_s1 + $0x1b0] ss:$8 sps:$4 sm:$0xff]  }
  0x11   :  { %592 = vmatprep.subr.bf16.mxu0 %v929_v17  ;;  %v975_v48 = vld [vmem:[%s1315_s1 + $0xc4] ss:$8 sps:$4 sm:$0xff]   ;;  %v979_v52 = vld [vmem:[%s1315_s1 + $0xc0] ss:$8 sps:$4 sm:$0xff]   ;;  %v981_v54 = vld [vmem:[%s1315_s1 + $0xd4] ss:$8 sps:$4 sm:$0xff]  }
  0x12   :  { %v1001_v49 = vld [vmem:[%s1316_s0 + $0x4] ss:$20 sps:$4 sm:$0xff]   ;;  %v1004_v51 = vld [vmem:[%s1316_s0 + $0xc] ss:$20 sps:$4 sm:$0xff]   ;;  %v983_v55 = vld [vmem:[%s1315_s1 + $0x1d4] ss:$8 sps:$4 sm:$0xff]  }
  0x13   :  { %540 = vmatpush1.bf16.msra.mxu1 %v931_v18  ;;  %v977_v50 = vld [vmem:[%s1315_s1 + $0x1c4] ss:$8 sps:$4 sm:$0xff]   ;;  %563 = vmatprep.mubr.bf16.mxu1 %v1001_v49  ;;  %v980_v53 = vld [vmem:[%s1315_s1 + $0x1c0] ss:$8 sps:$4 sm:$0xff]   ;;  %v985_v56 = vld [vmem:[%s1315_s1 + $0xd0] ss:$8 sps:$4 sm:$0xff]  }
  0x14   :  { %593 = vmatpush1.bf16.msra.mxu0 %v932_v19  ;;  %541 = vmatprep.subr.bf16.mxu1 %v933_v20  ;;  %v986_v57 = vld [vmem:[%s1315_s1 + $0x1d0] ss:$8 sps:$4 sm:$0xff]   ;;  %v987_v58 = vld [vmem:[%s1315_s1 + $0xe4] ss:$8 sps:$4 sm:$0xff]   ;;  %v991_v60 = vld [vmem:[%s1315_s1 + $0xe0] ss:$8 sps:$4 sm:$0xff]   ;;  %v104_v19 = vlaneseq }
  0x15   :  { %594 = vmatprep.subr.bf16.mxu0 %v935_v21  ;;  %616 = vmatprep.mubr.bf16.mxu0 %v1004_v51  ;;  %v989_v59 = vld [vmem:[%s1315_s1 + $0x1e4] ss:$8 sps:$4 sm:$0xff]   ;;  %v992_v61 = vld [vmem:[%s1315_s1 + $0x1e0] ss:$8 sps:$4 sm:$0xff]   ;;  %v993_v62 = vld [vmem:[%s1315_s1 + $0xf4] ss:$8 sps:$4 sm:$0xff]  }
  0x16   :  { %v995_v63 = vld [vmem:[%s1315_s1 + $0x1f4] ss:$8 sps:$4 sm:$0xff]   ;;  %v997_v0 = vld [vmem:[%s1315_s1 + $0xf0] ss:$8 sps:$4 sm:$0xff]   ;;  %v1007_v2 = vld [vmem:[%s1315_s1 + $0x204] ss:$8 sps:$4 sm:$0xff]  }
  0x17   :  { %542 = vmatpush1.bf16.msra.mxu1 %v937_v22  ;;  %v998_v1 = vld [vmem:[%s1315_s1 + $0x1f0] ss:$8 sps:$4 sm:$0xff]   ;;  %v999_v3 = vld [vmem:[%s1316_s0] ss:$20 sps:$4 sm:$0xff]   ;;  %v1002_v4 = vld [vmem:[%s1316_s0 + $0x8] ss:$20 sps:$4 sm:$0xff]  }
  0x18   :  { %595 = vmatpush1.bf16.msra.mxu0 %v938_v23  ;;  %543 = vmatprep.subr.bf16.mxu1 %v939_v24  ;;  %v1005_v5 = vld [vmem:[%s1315_s1 + $0x200] ss:$8 sps:$4 sm:$0xff]   ;;  %v1010_v6 = vld [vmem:[%s1315_s1 + $0x214] ss:$8 sps:$4 sm:$0xff]   ;;  %v1008_v9 = vld [vmem:[%s1315_s1 + $0x210] ss:$8 sps:$4 sm:$0xff]  }
  0x19   :  { %596 = vmatprep.subr.bf16.mxu0 %v941_v25  ;;  %v1011_v7 = vld [vmem:[%s1316_s0 + $0x2c] ss:$20 sps:$4 sm:$0xff]   ;;  %v1013_v8 = vld [vmem:[%s1316_s0 + $0x34] ss:$20 sps:$4 sm:$0xff]   ;;  %v1016_v12 = vld [vmem:[%s1316_s0 + $0x30] ss:$20 sps:$4 sm:$0xff]  }
  0x1a   :  { %v1019_v10 = vld [vmem:[%s1315_s1 + $0x224] ss:$8 sps:$4 sm:$0xff]   ;;  %v1015_v11 = vld [vmem:[%s1316_s0 + $0x28] ss:$20 sps:$4 sm:$0xff]   ;;  %v1020_v15 = vld [vmem:[%s1315_s1 + $0x230] ss:$8 sps:$4 sm:$0xff]  }
  0x1b   :  { %544 = vmatpush1.bf16.msra.mxu1 %v943_v26  ;;  %v1017_v13 = vld [vmem:[%s1315_s1 + $0x220] ss:$8 sps:$4 sm:$0xff]   ;;  %v1022_v14 = vld [vmem:[%s1315_s1 + $0x234] ss:$8 sps:$4 sm:$0xff]   ;;  %v1025_v16 = vmov 0   ;;  %v105_v20 = vshrl.u32 %v104_v19, 7 }
  0x1c   :  { %597 = vmatpush1.bf16.msra.mxu0 %v944_v27  ;;  %545 = vmatprep.subr.bf16.mxu1 %v945_v28  ;;  %v1023_v17 = vld [vmem:[%s1316_s0 + $0x10] ss:$20 sps:$4 sm:$0xff]   ;;  %v1024_v18 = vld [vmem:[%s1316_s0 + $0x38] ss:$20 sps:$4 sm:$0xff]   ;;  %v102_v26 = vld [vmem:[%s1317_s2] sm:$0x3] }
  0x1d   :  { %598 = vmatprep.subr.bf16.mxu0 %v947_v29  ;;  %v106_v24 = vsub.s32 0, %v105_v20  ;;  %v110_v27 = vsub.s32 1, %v105_v20 }
  0x1f   :  { %546 = vmatpush1.bf16.msra.mxu1 %v949_v30  ;;  %v107_v28 = vrot.slane %v102_v26, %v106_v24  ;;  %v111_v29 = vrot.slane %v102_v26, %v110_v27 }
  0x20   :  { %599 = vmatpush1.bf16.msra.mxu0 %v950_v31  ;;  %547 = vmatprep.subr.bf16.mxu1 %v951_v32  ;;  %v690_v32 = vld [vmem:[%s1318_s3] sm:$0x3] }
  0x21   :  { %600 = vmatprep.subr.bf16.mxu0 %v953_v33 }
  0x23   :  { %548 = vmatpush1.bf16.msra.mxu1 %v955_v34 }
  0x24   :  { %601 = vmatpush1.bf16.msra.mxu0 %v956_v35  ;;  %549 = vmatprep.subr.bf16.mxu1 %v957_v36 }
  0x25   :  { %602 = vmatprep.subr.bf16.mxu0 %v959_v37 }
  0x27   :  { %550 = vmatpush1.bf16.msra.mxu1 %v961_v38 }
  0x28   :  { %603 = vmatpush1.bf16.msra.mxu0 %v962_v39  ;;  %551 = vmatprep.subr.bf16.mxu1 %v963_v40 }
  0x29   :  { %604 = vmatprep.subr.bf16.mxu0 %v965_v41 }
  0x2b   :  { %552 = vmatpush1.bf16.msra.mxu1 %v967_v42 }
  0x2c   :  { %605 = vmatpush1.bf16.msra.mxu0 %v968_v43  ;;  %553 = vmatprep.subr.bf16.mxu1 %v969_v44  ;;  %v718_v43 = vsub.f32 1.0, %v690_v32 }
  0x2d   :  { %606 = vmatprep.subr.bf16.mxu0 %v971_v45 }
  0x2e   :  { %v723_v49 = vrot.slane %v718_v43, %v106_v24 }
  0x2f   :  { %554 = vmatpush1.bf16.msra.mxu1 %v973_v46 }
  0x30   :  { %607 = vmatpush1.bf16.msra.mxu0 %v974_v47  ;;  %555 = vmatprep.subr.bf16.mxu1 %v975_v48 }
  0x31   :  { %608 = vmatprep.subr.bf16.mxu0 %v977_v50 }
  0x33   :  { %556 = vmatpush1.bf16.msra.mxu1 %v979_v52 }
  0x34   :  { %609 = vmatpush1.bf16.msra.mxu0 %v980_v53  ;;  %557 = vmatprep.subr.bf16.mxu1 %v981_v54  ;;  %v727_v53 = vrot.slane %v718_v43, %v110_v27 }
  0x35   :  { %610 = vmatprep.subr.bf16.mxu0 %v983_v55  ;;  %v703_v55 = vrot.slane %v690_v32, %v106_v24 }
  0x37   :  { %558 = vmatpush1.bf16.msra.mxu1 %v985_v56 }
  0x38   :  { %611 = vmatpush1.bf16.msra.mxu0 %v986_v57  ;;  %559 = vmatprep.subr.bf16.mxu1 %v987_v58  ;;  %v707_v58 = vrot.slane %v690_v32, %v110_v27 }
  0x39   :  { %612 = vmatprep.subr.bf16.mxu0 %v989_v59 }
  0x3b   :  { %560 = vmatpush1.bf16.msra.mxu1 %v991_v60 }
  0x3c   :  { %613 = vmatpush1.bf16.msra.mxu0 %v992_v61  ;;  %561 = vmatprep.subr.bf16.mxu1 %v993_v62 }
  0x3d   :  { %614 = vmatprep.subr.bf16.mxu0 %v995_v63 }
  0x3f   :  { %562 = vmatpush1.bf16.msra.mxu1 %v997_v0 }
  0x40   :  { %615 = vmatpush1.bf16.msra.mxu0 %v998_v1  ;;  %870 = vmatprep.subr.bf16.mxu1 %v1007_v2 }
  0x41   :  { %637 = vmatprep.subr.bf16.mxu0 %v1007_v2 }
  0x42   :  { %564 = vmatmul.mubr.bf16.vlgmr.msra.gmra.mrb[0].mxu1 %v999_v3 }
  0x43   :  { %617 = vmatmul.mubr.bf16.vlgmr.msra.gmra.mrb[0].mxu0 %v1002_v4  ;;  %874 = vmatpush1.bf16.msra.mxu1 %v1005_v5 }
  0x44   :  { %638 = vmatpush1.bf16.msra.mxu0 %v1005_v5  ;;  %871 = vmatprep.subr.bf16.mxu1 %v1010_v6 }
  0x45   :  { %639 = vmatprep.subr.bf16.mxu0 %v1010_v6  ;;  %573 = vmatprep.mubr.bf16.mxu1 %v1011_v7 }
  0x46   :  { %626 = vmatprep.mubr.bf16.mxu0 %v1013_v8 }
  0x47   :  { %875 = vmatpush1.bf16.msra.mxu1 %v1008_v9 }
  0x48   :  { %640 = vmatpush1.bf16.msra.mxu0 %v1008_v9  ;;  %872 = vmatprep.subr.bf16.mxu1 %v1019_v10 }
  0x49   :  { %641 = vmatprep.subr.bf16.mxu0 %v1019_v10 }
  0x4a   :  { %574 = vmatmul.mubr.bf16.gmra.mrb[4].mxu1 %v1015_v11 }
  0x4b   :  { %627 = vmatmul.mubr.bf16.gmra.mrb[4].mxu0 %v1016_v12  ;;  %876 = vmatpush1.bf16.msra.mxu1 %v1017_v13 }
  0x4c   :  { %642 = vmatpush1.bf16.msra.mxu0 %v1017_v13  ;;  %873 = vmatprep.subr.bf16.mxu1 %v1022_v14 }
  0x4d   :  { %643 = vmatprep.subr.bf16.mxu0 %v1022_v14  ;;  %669 = vmatprep.mubr.bf16.mxu0 %v1025_v16 }
  0x4e   :  { %679 = vmatprep.mubr.bf16.mxu1 %v1025_v16 }
  0x4f   :  { %877 = vmatpush1.bf16.msra.mxu1 %v1020_v15 }
  0x50   :  { %644 = vmatpush1.bf16.msra.mxu0 %v1020_v15 }
  0x52   :  { %861 = vmatmul.mubr.msk.bf16.vlgmr.msra.gmra.mrb[8].mxu1 %vm524_vm0, %v1024_v18 }
  0x53   :  { %860 = vmatmul.mubr.msk.bf16.vlgmr.msra.gmra.mrb[0].mxu0 %vm524_vm0, %v1023_v17 }
 0x115   :  { %v565_v21 = vpop.f32.mrb[0].mxu1 }
 0x116   :  { %v567_v22 = vpop.f32.mrb[1].mxu1  ;;  %v566_v48 = vadd.f32 %v565_v21, %v107_v28 }
 0x117   :  { %v569_v23 = vpop.f32.mrb[2].mxu1  ;;  %v568_v50 = vadd.f32 %v567_v22, %v111_v29 }
 0x118   :  { %v571_v25 = vpop.f32.mrb[3].mxu1  ;;  %v570_v60 = vadd.f32 %v569_v23, %v107_v28 }
 0x119   :  { %v572_v61 = vadd.f32 %v571_v25, %v111_v29 }
 0x11d   :  { %v575_v30 = vpop.f32.mrb[4].mxu1 }
 0x11e   :  { %v628_v31 = vpop.f32.mrb[4].mxu0  ;;  %v576_v33 = vadd.f32 %v575_v30, %v107_v28  ;;  %v577_v34 = vpop.f32.mrb[5].mxu1 }
 0x11f   :  { %v630_v35 = vpop.f32.mrb[5].mxu0  ;;  %v578_v36 = vadd.f32 %v577_v34, %v111_v29  ;;  %v579_v37 = vpop.f32.mrb[6].mxu1 }
 0x120   :  { %v632_v38 = vpop.f32.mrb[6].mxu0  ;;  %v629_v39 = vadd.f32 %v628_v31, %v576_v33  ;;  %v580_v40 = vadd.f32 %v579_v37, %v107_v28  ;;  %v581_v41 = vpop.f32.mrb[7].mxu1 }
 0x121   :  { %v634_v42 = vpop.f32.mrb[7].mxu0  ;;  %v631_v44 = vadd.f32 %v630_v35, %v578_v36  ;;  %v582_v45 = vadd.f32 %v581_v41, %v111_v29 }
 0x122   :  { %v633_v46 = vadd.f32 %v632_v38, %v580_v40 }
 0x123   :  { %v635_v47 = vadd.f32 %v634_v42, %v582_v45 }
 0x125   :  { %v681_v52 = vpop.f32.mrb[8].mxu1 }
 0x126   :  { %v671_v51 = vpop.f32.mrb[0].mxu0  ;;  %v682_v56 = vadd.f32 %v681_v52, %v629_v39  ;;  %v683_v59 = vpop.f32.mrb[9].mxu1 }
 0x127   :  { %v879_v54 = vadd.f32 %v671_v51, %v566_v48  ;;  %v673_v57 = vpop.f32.mrb[1].mxu0  ;;  %v684_v63 = vadd.f32 %v683_v59, %v631_v44  ;;  %v685_v1 = vpop.f32.mrb[10].mxu1 }
 0x128   :  { %v881_v62 = vadd.f32 %v673_v57, %v568_v50  ;;  %v675_v0 = vpop.f32.mrb[2].mxu0  ;;  %v695_v4 = vmax.f32 %v682_v56, 0.0  ;;  %v734_v5 = vmul.f32 %v723_v49, %v682_v56  ;;  %v687_v7 = vpop.f32.mrb[11].mxu1  ;;  %v686_v15 = vadd.f32 %v685_v1, %v633_v46 }
 0x129   :  { %v691_v2 = vmax.f32 %v879_v54, 0.0  ;;  %v730_v3 = vmul.f32 %v879_v54, %v723_v49  ;;  %v677_v6 = vpop.f32.mrb[3].mxu0  ;;  %v696_v10 = vmax.f32 %v684_v63, 0.0  ;;  %v735_v11 = vmul.f32 %v727_v53, %v684_v63 }
 0x12a   :  { %v692_v8 = vmax.f32 %v881_v62, 0.0  ;;  %v731_v9 = vmul.f32 %v881_v62, %v727_v53  ;;  %v714_v13 = vmul.f32 %v703_v55, %v695_v4  ;;  %v883_v14 = vadd.f32 %v675_v0, %v570_v60 }
 0x12b   :  { %v710_v12 = vmul.f32 %v703_v55, %v691_v2  ;;  %v715_v17 = vmul.f32 %v707_v58, %v696_v10  ;;  %v885_v18 = vadd.f32 %v677_v6, %v572_v61  ;;  %v688_v19 = vadd.f32 %v687_v7, %v635_v47 }
 0x12c   :  { %v711_v16 = vmul.f32 %v707_v58, %v692_v8  ;;  %v742_v21 = vadd.f32 %v734_v5, %v714_v13  ;;  %v693_v22 = vmax.f32 %v883_v14, 0.0  ;;  %v732_v25 = vmul.f32 %v883_v14, %v723_v49 }
 0x12d   :  { %v738_v20 = vadd.f32 %v730_v3, %v710_v12  ;;  %v743_v24 = vadd.f32 %v735_v11, %v715_v17  ;;  %v697_v26 = vmax.f32 %v686_v15, 0.0  ;;  %v736_v28 = vmul.f32 %v723_v49, %v686_v15 }
 0x12e   :  { %v739_v23 = vadd.f32 %v731_v9, %v711_v16  ;;  %v712_v27 = vmul.f32 %v703_v55, %v693_v22  ;;  %v694_v29 = vmax.f32 %v885_v18, 0.0  ;;  %v698_v30 = vmax.f32 %v688_v19, 0.0 }
 0x12f   :  { %v868_v32 = vpack.c.bf16 %v743_v24, %v742_v21  ;;  %v716_v33 = vmul.f32 %v703_v55, %v697_v26  ;;  %v733_v34 = vmul.f32 %v885_v18, %v727_v53  ;;  %v737_v38 = vmul.f32 %v727_v53, %v688_v19 }
 0x130   :  { %v866_v31 = vpack.c.bf16 %v739_v23, %v738_v20  ;;  %v740_v35 = vadd.f32 %v732_v25, %v712_v27  ;;  %v713_v36 = vmul.f32 %v707_v58, %v694_v29  ;;  %v717_v37 = vmul.f32 %v707_v58, %v698_v30 }
 0x131   :  { %772 = vst [vmem:[%s1319_s4 + $0x10] sm:$0xff] %v868_v32  ;;  %v744_v39 = vadd.f32 %v736_v28, %v716_v33 }
 0x132   :  { %770 = vst [vmem:[%s1319_s4] sm:$0xff] %v866_v31  ;;  %v741_v40 = vadd.f32 %v733_v34, %v713_v36  ;;  %v745_v41 = vadd.f32 %v737_v38, %v717_v37 }
 0x134   :  { %v867_v42 = vpack.c.bf16 %v741_v40, %v740_v35  ;;  %v869_v43 = vpack.c.bf16 %v745_v41, %v744_v39 }
 0x136   :  { %771 = vst [vmem:[%s1319_s4 + $0x8] sm:$0xff] %v867_v42  ;;  %773 = vst [vmem:[%s1319_s4 + $0x18] sm:$0xff] %v869_v43 }

// kernel: forward.11
= control target key start
LH: loop header
LB: loop body
LE: loop exit
PB: predicated region body
PF: predicated region fallthrough
CT: control target
= control target key end

     0   :  { %s1667_s1 = inlined_call_operand.vmem [shape: bf16[1152,128], index: 1, kind: input, shape index: {}]   ;;  %s1668_s0 = inlined_call_operand.vmem [shape: bf16[32,1152], index: 0, kind: input, shape index: {}]   ;;  %s1669_s2 = inlined_call_operand.vmem [shape: f32[1,128], index: 2, kind: input, shape index: {}]   ;;  %s1670_s3 = inlined_call_operand.vmem [shape: bf16[32,128], index: 3, kind: input, shape index: {}]   ;;  %s1671_s4 = inlined_call_operand.vmem [shape: bf16[32,128], index: 4, kind: output, shape index: {}]  }
   0x1   :  { %v1259_v0 = vld [vmem:[%s1667_s1 + $0x40] sm:$0xff]   ;;  %v1263_v4 = vld [vmem:[%s1667_s1 + $0x48] sm:$0xff]   ;;  %v1267_v8 = vld [vmem:[%s1667_s1 + $0x50] sm:$0xff]  }
   0x2   :  { %v1260_v1 = vld [vmem:[%s1667_s1] sm:$0xff]   ;;  %1117 = vmatprep.subr.bf16.mxu0 %v1259_v0  ;;  %v1264_v5 = vld [vmem:[%s1667_s1 + $0x8] sm:$0xff]   ;;  %v1268_v9 = vld [vmem:[%s1667_s1 + $0x10] sm:$0xff]  }
   0x3   :  { %v1261_v2 = vld [vmem:[%s1667_s1 + $0xc0] sm:$0xff]   ;;  %1118 = vmatpush3.bf16.msra.mxu0 %v1260_v1  ;;  %v1265_v6 = vld [vmem:[%s1667_s1 + $0xc8] sm:$0xff]   ;;  %v1269_v10 = vld [vmem:[%s1667_s1 + $0xd0] sm:$0xff]  }
   0x4   :  { %v1262_v3 = vld [vmem:[%s1667_s1 + $0x80] sm:$0xff]   ;;  %1145 = vmatprep.subr.bf16.mxu1 %v1261_v2  ;;  %1119 = vmatprep.subr.bf16.mxu0 %v1263_v4  ;;  %v1266_v7 = vld [vmem:[%s1667_s1 + $0x88] sm:$0xff]   ;;  %v1270_v11 = vld [vmem:[%s1667_s1 + $0x90] sm:$0xff]  }
   0x5   :  { %1146 = vmatpush3.bf16.msra.mxu1 %v1262_v3  ;;  %v1271_v12 = vld [vmem:[%s1667_s1 + $0x58] sm:$0xff]   ;;  %v1275_v16 = vld [vmem:[%s1667_s1 + $0x60] sm:$0xff]   ;;  %v1279_v20 = vld [vmem:[%s1667_s1 + $0x68] sm:$0xff]  }
   0x6   :  { %1147 = vmatprep.subr.bf16.mxu1 %v1265_v6  ;;  %v1272_v13 = vld [vmem:[%s1667_s1 + $0x18] sm:$0xff]   ;;  %v1276_v17 = vld [vmem:[%s1667_s1 + $0x20] sm:$0xff]   ;;  %v1280_v21 = vld [vmem:[%s1667_s1 + $0x28] sm:$0xff]  }
   0x7   :  { %1120 = vmatpush3.bf16.msra.mxu0 %v1264_v5  ;;  %v1273_v14 = vld [vmem:[%s1667_s1 + $0xd8] sm:$0xff]   ;;  %v1277_v18 = vld [vmem:[%s1667_s1 + $0xe0] sm:$0xff]   ;;  %v1281_v22 = vld [vmem:[%s1667_s1 + $0xe8] sm:$0xff]  }
   0x8   :  { %1121 = vmatprep.subr.bf16.mxu0 %v1267_v8  ;;  %v1274_v15 = vld [vmem:[%s1667_s1 + $0x98] sm:$0xff]   ;;  %v1278_v19 = vld [vmem:[%s1667_s1 + $0xa0] sm:$0xff]   ;;  %v1282_v23 = vld [vmem:[%s1667_s1 + $0xa8] sm:$0xff]  }
   0x9   :  { %1148 = vmatpush3.bf16.msra.mxu1 %v1266_v7  ;;  %v1283_v24 = vld [vmem:[%s1667_s1 + $0x70] sm:$0xff]   ;;  %v1287_v28 = vld [vmem:[%s1667_s1 + $0x78] sm:$0xff]   ;;  %v1290_v31 = vld [vmem:[%s1668_s0] ss:$36 sps:$4 sm:$0xff]  }
   0xa   :  { %1149 = vmatprep.subr.bf16.mxu1 %v1269_v10  ;;  %v1284_v25 = vld [vmem:[%s1667_s1 + $0x30] sm:$0xff]   ;;  %v1288_v29 = vld [vmem:[%s1667_s1 + $0x38] sm:$0xff]   ;;  %v1292_v32 = vld [vmem:[%s1668_s0 + $0x4] ss:$36 sps:$4 sm:$0xff]  }
   0xb   :  { %1122 = vmatpush3.bf16.msra.mxu0 %v1268_v9  ;;  %v1285_v26 = vld [vmem:[%s1667_s1 + $0xf0] sm:$0xff]   ;;  %v1289_v30 = vld [vmem:[%s1667_s1 + $0xf8] sm:$0xff]   ;;  %745 = vmatprep.mubr.bf16.mxu0 %v1292_v32  ;;  %v1294_v34 = vld [vmem:[%s1667_s1 + $0x140] sm:$0xff]  }
   0xc   :  { %1123 = vmatprep.subr.bf16.mxu0 %v1271_v12  ;;  %v1286_v27 = vld [vmem:[%s1667_s1 + $0xb0] sm:$0xff]   ;;  %v1293_v33 = vld [vmem:[%s1667_s1 + $0xb8] sm:$0xff]   ;;  %v1295_v35 = vld [vmem:[%s1668_s0 + $0x8] ss:$36 sps:$4 sm:$0xff]  }
   0xd   :  { %1150 = vmatpush3.bf16.msra.mxu1 %v1270_v11  ;;  %v1297_v36 = vld [vmem:[%s1668_s0 + $0xc] ss:$36 sps:$4 sm:$0xff]   ;;  %v1298_v37 = vld [vmem:[%s1667_s1 + $0x100] sm:$0xff]   ;;  %v1309_v48 = vld [vmem:[%s1667_s1 + $0x158] sm:$0xff]  }
   0xe   :  { %1151 = vmatprep.subr.bf16.mxu1 %v1273_v14  ;;  %794 = vmatprep.mubr.bf16.mxu1 %v1297_v36  ;;  %v1299_v38 = vld [vmem:[%s1667_s1 + $0x1c0] sm:$0xff]   ;;  %v1301_v40 = vld [vmem:[%s1667_s1 + $0x148] sm:$0xff]   ;;  %v1305_v44 = vld [vmem:[%s1667_s1 + $0x150] sm:$0xff]  }
   0xf   :  { %1124 = vmatpush3.bf16.msra.mxu0 %v1272_v13  ;;  %v1300_v39 = vld [vmem:[%s1667_s1 + $0x180] sm:$0xff]   ;;  %v1302_v41 = vld [vmem:[%s1667_s1 + $0x108] sm:$0xff]   ;;  %v1306_v45 = vld [vmem:[%s1667_s1 + $0x110] sm:$0xff]  }
  0x10   :  { %1125 = vmatprep.subr.bf16.mxu0 %v1275_v16  ;;  %v1303_v42 = vld [vmem:[%s1667_s1 + $0x1c8] sm:$0xff]   ;;  %v1307_v46 = vld [vmem:[%s1667_s1 + $0x1d0] sm:$0xff]   ;;  %v1310_v49 = vld [vmem:[%s1667_s1 + $0x118] sm:$0xff]  }
  0x11   :  { %1152 = vmatpush3.bf16.msra.mxu1 %v1274_v15  ;;  %v1304_v43 = vld [vmem:[%s1667_s1 + $0x188] sm:$0xff]   ;;  %v1308_v47 = vld [vmem:[%s1667_s1 + $0x190] sm:$0xff]   ;;  %v1311_v50 = vld [vmem:[%s1667_s1 + $0x1d8] sm:$0xff]  }
  0x12   :  { %1153 = vmatprep.subr.bf16.mxu1 %v1277_v18  ;;  %v1312_v51 = vld [vmem:[%s1667_s1 + $0x198] sm:$0xff]   ;;  %v1313_v52 = vld [vmem:[%s1667_s1 + $0x160] sm:$0xff]   ;;  %v1317_v56 = vld [vmem:[%s1667_s1 + $0x168] sm:$0xff]  }
  0x13   :  { %1126 = vmatpush3.bf16.msra.mxu0 %v1276_v17  ;;  %v1314_v53 = vld [vmem:[%s1667_s1 + $0x120] sm:$0xff]   ;;  %v1318_v57 = vld [vmem:[%s1668_s0 + $0x4c] ss:$36 sps:$4 sm:$0xff]   ;;  %v1323_v61 = vld [vmem:[%s1668_s0 + $0x54] ss:$36 sps:$4 sm:$0xff]  }
  0x14   :  { %1127 = vmatprep.subr.bf16.mxu0 %v1279_v20  ;;  %v1315_v54 = vld [vmem:[%s1667_s1 + $0x1e0] sm:$0xff]   ;;  %v1320_v58 = vld [vmem:[%s1667_s1 + $0x128] sm:$0xff]   ;;  %v1326_v63 = vld [vmem:[%s1668_s0 + $0x50] ss:$36 sps:$4 sm:$0xff]  }
  0x15   :  { %1154 = vmatpush3.bf16.msra.mxu1 %v1278_v19  ;;  %v1316_v55 = vld [vmem:[%s1667_s1 + $0x1a0] sm:$0xff]   ;;  %v1321_v59 = vld [vmem:[%s1668_s0 + $0x48] ss:$36 sps:$4 sm:$0xff]   ;;  %v1327_v0 = vld [vmem:[%s1667_s1 + $0x170] sm:$0xff]  }
  0x16   :  { %1155 = vmatprep.subr.bf16.mxu1 %v1281_v22  ;;  %v1322_v60 = vld [vmem:[%s1667_s1 + $0x1e8] sm:$0xff]   ;;  %v1328_v1 = vld [vmem:[%s1667_s1 + $0x130] sm:$0xff]   ;;  %v1331_v4 = vld [vmem:[%s1667_s1 + $0x178] sm:$0xff]  }
  0x17   :  { %1128 = vmatpush3.bf16.msra.mxu0 %v1280_v21  ;;  %v1325_v62 = vld [vmem:[%s1667_s1 + $0x1a8] sm:$0xff]   ;;  %v1329_v2 = vld [vmem:[%s1667_s1 + $0x1f0] sm:$0xff]   ;;  %v1332_v5 = vld [vmem:[%s1667_s1 + $0x138] sm:$0xff]  }
  0x18   :  { %1129 = vmatprep.subr.bf16.mxu0 %v1283_v24  ;;  %v1330_v3 = vld [vmem:[%s1667_s1 + $0x1b0] sm:$0xff]   ;;  %v1333_v6 = vld [vmem:[%s1667_s1 + $0x1f8] sm:$0xff]   ;;  %v1338_v10 = vld [vmem:[%s1667_s1 + $0x200] sm:$0xff]  }
  0x19   :  { %1156 = vmatpush3.bf16.msra.mxu1 %v1282_v23  ;;  %v1334_v7 = vld [vmem:[%s1668_s0 + $0x10] ss:$36 sps:$4 sm:$0xff]   ;;  %v1337_v9 = vld [vmem:[%s1667_s1 + $0x1b8] sm:$0xff]   ;;  %v1342_v13 = vld [vmem:[%s1667_s1 + $0x208] sm:$0xff]  }
  0x1a   :  { %1157 = vmatprep.subr.bf16.mxu1 %v1285_v26  ;;  %v1336_v8 = vld [vmem:[%s1668_s0 + $0x14] ss:$36 sps:$4 sm:$0xff]   ;;  %v1341_v12 = vld [vmem:[%s1668_s0 + $0x1c] ss:$36 sps:$4 sm:$0xff]   ;;  %v1347_v17 = vld [vmem:[%s1668_s0 + $0x64] ss:$36 sps:$4 sm:$0xff]  }
  0x1b   :  { %1130 = vmatpush3.bf16.msra.mxu0 %v1284_v25  ;;  %v1339_v11 = vld [vmem:[%s1668_s0 + $0x18] ss:$36 sps:$4 sm:$0xff]   ;;  %v1346_v16 = vld [vmem:[%s1667_s1 + $0x210] sm:$0xff]   ;;  %v1349_v18 = vld [vmem:[%s1668_s0 + $0x60] ss:$36 sps:$4 sm:$0xff]  }
  0x1c   :  { %1131 = vmatprep.subr.bf16.mxu0 %v1287_v28  ;;  %v1343_v14 = vld [vmem:[%s1668_s0 + $0x5c] ss:$36 sps:$4 sm:$0xff]   ;;  %v1352_v22 = vld [vmem:[%s1667_s1 + $0x228] sm:$0xff]   ;;  %v1353_v23 = vld [vmem:[%s1667_s1 + $0x230] sm:$0xff]  }
  0x1d   :  { %1158 = vmatpush3.bf16.msra.mxu1 %v1286_v27  ;;  %v1345_v15 = vld [vmem:[%s1668_s0 + $0x58] ss:$36 sps:$4 sm:$0xff]   ;;  %v1351_v20 = vld [vmem:[%s1667_s1 + $0x220] sm:$0xff]   ;;  %v1356_v25 = vld [vmem:[%s1668_s0 + $0x68] ss:$36 sps:$4 sm:$0xff]  }
  0x1e   :  { %1159 = vmatprep.subr.bf16.mxu1 %v1289_v30  ;;  %v1350_v19 = vld [vmem:[%s1667_s1 + $0x218] sm:$0xff]   ;;  %v1355_v21 = vld [vmem:[%s1668_s0 + $0x20] ss:$36 sps:$4 sm:$0xff]  }
  0x1f   :  { %1132 = vmatpush3.bf16.msra.mxu0 %v1288_v29  ;;  %v1354_v24 = vld [vmem:[%s1667_s1 + $0x238] sm:$0xff]   ;;  %v998_v27 = vld [vmem:[%s1669_s2] ss:$0 sm:$0xff] }
  0x20   :  { %1173 = vmatprep.subr.bf16.mxu0 %v1294_v34 }
  0x21   :  { %1160 = vmatpush3.bf16.msra.mxu1 %v1293_v33 }
  0x22   :  { %746 = vmatmul.mubr.bf16.vlgmr.msra.gmra.mrb[0].mxu0 %v1290_v31  ;;  %1201 = vmatprep.subr.bf16.mxu1 %v1299_v38 }
  0x23   :  { %1174 = vmatpush3.bf16.msra.mxu0 %v1298_v37  ;;  %753 = vmatprep.mubr.bf16.mxu0 %v1318_v57 }
  0x24   :  { %795 = vmatmul.mubr.bf16.vlgmr.msra.gmra.mrb[0].mxu1 %v1295_v35  ;;  %1175 = vmatprep.subr.bf16.mxu0 %v1301_v40 }
  0x25   :  { %1202 = vmatpush3.bf16.msra.mxu1 %v1300_v39  ;;  %802 = vmatprep.mubr.bf16.mxu1 %v1323_v61 }
  0x26   :  { %1203 = vmatprep.subr.bf16.mxu1 %v1303_v42 }
  0x27   :  { %1176 = vmatpush3.bf16.msra.mxu0 %v1302_v41 }
  0x28   :  { %1177 = vmatprep.subr.bf16.mxu0 %v1305_v44 }
  0x29   :  { %1204 = vmatpush3.bf16.msra.mxu1 %v1304_v43 }
  0x2a   :  { %1205 = vmatprep.subr.bf16.mxu1 %v1307_v46  ;;  %754 = vmatmul.mubr.bf16.gmra.mrb[4].mxu0 %v1321_v59 }
  0x2b   :  { %1178 = vmatpush3.bf16.msra.mxu0 %v1306_v45  ;;  %843 = vmatprep.mubr.bf16.mxu0 %v1336_v8 }
  0x2c   :  { %1179 = vmatprep.subr.bf16.mxu0 %v1309_v48  ;;  %803 = vmatmul.mubr.bf16.gmra.mrb[4].mxu1 %v1326_v63 }
  0x2d   :  { %1206 = vmatpush3.bf16.msra.mxu1 %v1308_v47  ;;  %892 = vmatprep.mubr.bf16.mxu1 %v1341_v12 }
  0x2e   :  { %1207 = vmatprep.subr.bf16.mxu1 %v1311_v50 }
  0x2f   :  { %1180 = vmatpush3.bf16.msra.mxu0 %v1310_v49 }
  0x30   :  { %1181 = vmatprep.subr.bf16.mxu0 %v1313_v52 }
  0x31   :  { %1208 = vmatpush3.bf16.msra.mxu1 %v1312_v51 }
  0x32   :  { %1209 = vmatprep.subr.bf16.mxu1 %v1315_v54 }
  0x33   :  { %1182 = vmatpush3.bf16.msra.mxu0 %v1314_v53 }
  0x34   :  { %1183 = vmatprep.subr.bf16.mxu0 %v1317_v56 }
  0x35   :  { %1210 = vmatpush3.bf16.msra.mxu1 %v1316_v55 }
  0x36   :  { %1211 = vmatprep.subr.bf16.mxu1 %v1322_v60 }
  0x37   :  { %1184 = vmatpush3.bf16.msra.mxu0 %v1320_v58 }
  0x38   :  { %1185 = vmatprep.subr.bf16.mxu0 %v1327_v0 }
  0x39   :  { %1212 = vmatpush3.bf16.msra.mxu1 %v1325_v62 }
  0x3a   :  { %1213 = vmatprep.subr.bf16.mxu1 %v1329_v2 }
  0x3b   :  { %1186 = vmatpush3.bf16.msra.mxu0 %v1328_v1 }
  0x3c   :  { %1187 = vmatprep.subr.bf16.mxu0 %v1331_v4 }
  0x3d   :  { %1214 = vmatpush3.bf16.msra.mxu1 %v1330_v3 }
  0x3e   :  { %1215 = vmatprep.subr.bf16.mxu1 %v1333_v6 }
  0x3f   :  { %1188 = vmatpush3.bf16.msra.mxu0 %v1332_v5 }
  0x40   :  { %1239 = vmatprep.subr.bf16.mxu0 %v1338_v10 }
  0x41   :  { %1216 = vmatpush3.bf16.msra.mxu1 %v1337_v9 }
  0x42   :  { %844 = vmatmul.mubr.bf16.vlgmr.msra.gmra.mrb[8].mxu0 %v1334_v7 }
  0x43   :  { %1240 = vmatpush3.bf16.msra.mxu0 %v1338_v10  ;;  %851 = vmatprep.mubr.bf16.mxu0 %v1343_v14 }
  0x44   :  { %893 = vmatmul.mubr.bf16.vlgmr.msra.gmra.mrb[8].mxu1 %v1339_v11  ;;  %1241 = vmatprep.subr.bf16.mxu0 %v1342_v13 }
  0x45   :  { %900 = vmatprep.mubr.bf16.mxu1 %v1347_v17 }
  0x47   :  { %1242 = vmatpush3.bf16.msra.mxu0 %v1342_v13 }
  0x48   :  { %1243 = vmatprep.subr.bf16.mxu0 %v1346_v16 }
  0x4a   :  { %852 = vmatmul.mubr.bf16.gmra.mrb[12].mxu0 %v1345_v15 }
  0x4b   :  { %1244 = vmatpush3.bf16.msra.mxu0 %v1346_v16  ;;  %1255 = vmatprep.mubr.bf16.mxu0 %v1355_v21 }
  0x4c   :  { %901 = vmatmul.mubr.bf16.gmra.mrb[12].mxu1 %v1349_v18  ;;  %1245 = vmatprep.subr.bf16.mxu0 %v1350_v19 }
  0x4f   :  { %1246 = vmatpush3.bf16.msra.mxu0 %v1350_v19 }
  0x50   :  { %1247 = vmatprep.subr.bf16.mxu0 %v1351_v20 }
  0x53   :  { %1248 = vmatpush3.bf16.msra.mxu0 %v1351_v20 }
  0x54   :  { %1249 = vmatprep.subr.bf16.mxu0 %v1352_v22 }
  0x57   :  { %1250 = vmatpush3.bf16.msra.mxu0 %v1352_v22 }
  0x58   :  { %1251 = vmatprep.subr.bf16.mxu0 %v1353_v23 }
  0x5b   :  { %1252 = vmatpush3.bf16.msra.mxu0 %v1353_v23 }
  0x5c   :  { %1253 = vmatprep.subr.bf16.mxu0 %v1354_v24 }
  0x5f   :  { %1254 = vmatpush3.bf16.msra.mxu0 %v1354_v24 }
  0x62   :  { %1256 = vmatmul.mubr.bf16.vlgmr.msra.gmra.mrb[16].mxu0 %v1356_v25 }
  0xf5   :  { %v1133_v26 = vpop.f32.mrb[0].mxu0 }
  0xf6   :  { %v1134_v28 = vpop.f32.mrb[1].mxu0 }
  0xf7   :  { %v1135_v29 = vadd.f32 %v1134_v28, %v1133_v26  ;;  %v1136_v30 = vpop.f32.mrb[2].mxu0  ;;  %v1161_v31 = vpop.f32.mrb[0].mxu1  ;;  %v1098_v28 = vld [vmem:[%s1670_s3] sm:$0xff]  }
  0xf8   :  { %v1137_v32 = vpop.f32.mrb[3].mxu0  ;;  %v1162_v35 = vpop.f32.mrb[1].mxu1 }
  0xf9   :  { %v748_v33 = vadd.f32 %v1135_v29, %v998_v27  ;;  %v1138_v34 = vadd.f32 %v1137_v32, %v1136_v30  ;;  %v1163_v36 = vadd.f32 %v1162_v35, %v1161_v31  ;;  %v1164_v37 = vpop.f32.mrb[2].mxu1  ;;  %v1099_v31 = vunpack.c.l.bf16 %v1098_v28 }
  0xfa   :  { %v1165_v39 = vpop.f32.mrb[3].mxu1 }
  0xfb   :  { %v751_v38 = vadd.f32 %v1138_v34, %v998_v27  ;;  %v797_v40 = vadd.f32 %v1163_v36, %v748_v33  ;;  %v1166_v41 = vadd.f32 %v1165_v39, %v1164_v37  ;;  %v1100_v37 = vunpack.c.h.bf16 %v1098_v28 }
  0xfd   :  { %v800_v42 = vadd.f32 %v1166_v41, %v751_v38  ;;  %v1139_v43 = vpop.f32.mrb[4].mxu0 }
  0xfe   :  { %v1140_v44 = vpop.f32.mrb[5].mxu0 }
  0xff   :  { %v1141_v45 = vadd.f32 %v1140_v44, %v1139_v43  ;;  %v1142_v46 = vpop.f32.mrb[6].mxu0  ;;  %v1167_v47 = vpop.f32.mrb[4].mxu1 }
 0x100   :  { %v1143_v48 = vpop.f32.mrb[7].mxu0  ;;  %v1168_v51 = vpop.f32.mrb[5].mxu1 }
 0x101   :  { %v756_v49 = vadd.f32 %v1141_v45, %v998_v27  ;;  %v1144_v50 = vadd.f32 %v1143_v48, %v1142_v46  ;;  %v1169_v52 = vadd.f32 %v1168_v51, %v1167_v47  ;;  %v1170_v53 = vpop.f32.mrb[6].mxu1 }
 0x102   :  { %v1171_v55 = vpop.f32.mrb[7].mxu1 }
 0x103   :  { %v759_v54 = vadd.f32 %v1144_v50, %v998_v27  ;;  %v805_v56 = vadd.f32 %v1169_v52, %v756_v49  ;;  %v1172_v57 = vadd.f32 %v1171_v55, %v1170_v53  ;;  %v1115_v27 = vld [vmem:[%s1670_s3 + $0x8] sm:$0xff]  }
 0x104   :  { %v1103_v29 = vunpack.c.l.bf16 %v1115_v27  ;;  %v1104_v34 = vunpack.c.h.bf16 %v1115_v27 }
 0x105   :  { %v808_v58 = vadd.f32 %v1172_v57, %v759_v54 }
 0x115   :  { %v1189_v59 = vpop.f32.mrb[8].mxu0 }
 0x116   :  { %v1190_v60 = vpop.f32.mrb[9].mxu0 }
 0x117   :  { %v1191_v61 = vadd.f32 %v1190_v60, %v1189_v59  ;;  %v1192_v62 = vpop.f32.mrb[10].mxu0  ;;  %v1217_v63 = vpop.f32.mrb[8].mxu1 }
 0x118   :  { %v1193_v0 = vpop.f32.mrb[11].mxu0  ;;  %v1218_v3 = vpop.f32.mrb[9].mxu1 }
 0x119   :  { %v846_v1 = vadd.f32 %v1191_v61, %v797_v40  ;;  %v1194_v2 = vadd.f32 %v1193_v0, %v1192_v62  ;;  %v1219_v4 = vadd.f32 %v1218_v3, %v1217_v63  ;;  %v1220_v5 = vpop.f32.mrb[10].mxu1 }
 0x11a   :  { %v1221_v7 = vpop.f32.mrb[11].mxu1 }
 0x11b   :  { %v849_v6 = vadd.f32 %v1194_v2, %v800_v42  ;;  %v1222_v8 = vadd.f32 %v1221_v7, %v1220_v5  ;;  %v895_v9 = vadd.f32 %v1219_v4, %v846_v1 }
 0x11d   :  { %v1195_v10 = vpop.f32.mrb[12].mxu0  ;;  %v898_v12 = vadd.f32 %v1222_v8, %v849_v6 }
 0x11e   :  { %v1196_v11 = vpop.f32.mrb[13].mxu0 }
 0x11f   :  { %v1197_v13 = vadd.f32 %v1196_v11, %v1195_v10  ;;  %v1198_v14 = vpop.f32.mrb[14].mxu0  ;;  %v1223_v15 = vpop.f32.mrb[12].mxu1 }
 0x120   :  { %v1199_v16 = vpop.f32.mrb[15].mxu0  ;;  %v1224_v19 = vpop.f32.mrb[13].mxu1 }
 0x121   :  { %v854_v17 = vadd.f32 %v1197_v13, %v805_v56  ;;  %v1200_v18 = vadd.f32 %v1199_v16, %v1198_v14  ;;  %v1225_v20 = vadd.f32 %v1224_v19, %v1223_v15  ;;  %v1226_v21 = vpop.f32.mrb[14].mxu1 }
 0x122   :  { %v1227_v23 = vpop.f32.mrb[15].mxu1 }
 0x123   :  { %v857_v22 = vadd.f32 %v1200_v18, %v808_v58  ;;  %v1228_v24 = vadd.f32 %v1227_v23, %v1226_v21  ;;  %v903_v25 = vadd.f32 %v1225_v20, %v854_v17 }
 0x125   :  { %v906_v26 = vadd.f32 %v1228_v24, %v857_v22 }
 0x135   :  { %v1257_v30 = vpop.f32.mrb[16].mxu0 }
 0x136   :  { %v952_v32 = vadd.f32 %v1257_v30, %v903_v25  ;;  %v943_v33 = vpop.f32.mrb[17].mxu0 }
 0x137   :  { %v944_v35 = vadd.f32 %v943_v33, %v895_v9  ;;  %v1258_v36 = vpop.f32.mrb[18].mxu0 }
 0x138   :  { %v968_v38 = vadd.f32 %v1103_v29, %v952_v32  ;;  %v955_v39 = vadd.f32 %v1258_v36, %v906_v26  ;;  %v946_v40 = vpop.f32.mrb[19].mxu0 }
 0x139   :  { %v966_v41 = vadd.f32 %v1099_v31, %v944_v35  ;;  %v947_v42 = vadd.f32 %v946_v40, %v898_v12 }
 0x13a   :  { %v969_v43 = vadd.f32 %v1104_v34, %v955_v39  ;;  %v972_v45 = vmax.f32 %v968_v38, 0.0 }
 0x13b   :  { %v967_v44 = vadd.f32 %v1100_v37, %v947_v42  ;;  %v970_v47 = vmax.f32 %v966_v41, 0.0 }
 0x13c   :  { %v973_v46 = vmax.f32 %v969_v43, 0.0 }
 0x13d   :  { %v971_v48 = vmax.f32 %v967_v44, 0.0 }
 0x13e   :  { %v1113_v49 = vpack.c.bf16 %v973_v46, %v972_v45 }
 0x13f   :  { %v1108_v50 = vpack.c.bf16 %v971_v48, %v970_v47 }
 0x140   :  { %1116 = vst [vmem:[%s1671_s4 + $0x8] sm:$0xff] %v1113_v49  }
 0x141   :  { %1109 = vst [vmem:[%s1671_s4] sm:$0xff] %v1108_v50  }

</bundles_post_ra>
